<compile_context>
chip_gen: v5e
topology: v5e:2x2
jax: 0.10.0
libtpu: 0.0.40
codegen_flags: <defaults>
</compile_context>

<pallas_src>
import functools
import math

import jax
import jax.numpy as jnp
from jax.experimental import pallas as pl
from jax.experimental.pallas import tpu as pltpu

EPS = 1e-5  # PyTorch nn.LayerNorm default eps


# ---------------------------------------------------------------------------
# Pallas kernel
# ---------------------------------------------------------------------------
def kernel_updator_kernel(upd_ref, inp_ref,
                          dyn_w_ref, in_w_ref, gates_w_ref, fc_w_ref,
                          consts_ref, out_ref,
                          *, feat_channels, padded_channels, conv_area):
    """One grid step == nb proposals (M = nb*S rows of per-position work).

    upd_ref   : (nb, Cp)    update feature, ONE row per proposal (un-replicated)
    inp_ref   : (M,  Cp)    input feature, flattened over the S kernel positions
    *_w_ref   : GEMM weights stored (in, out), lane-padded to Cp; f32 or bf16
    consts_ref: (9, 2Cp) f32 packed constants
        row 0: dynamic_layer bias              row 5: [norm_out gamma | beta]
        row 1: input_layer bias                row 6: [input_norm_in gamma | beta]
        row 2: [input_gate b | update_gate b]  row 7: [input_norm_out gamma | beta]
        row 3: [fc_layer bias | zeros]         row 8: [fc_norm gamma | beta]
        row 4: [norm_in gamma | beta]
    """
    C = feat_channels
    Cp = padded_channels
    S = conv_area
    gemm_dtype = dyn_w_ref.dtype

    consts = consts_ref[...]                              # (9, 2Cp) f32
    dyn_b = consts[0:1, :]                                # (1, 2Cp)
    in_b = consts[1:2, :]
    gates_b = consts[2:3, :]
    fc_b = consts[3:4, :Cp]                               # (1, Cp)
    # LayerNorm affine params, hoisted/sliced once (each row is [gamma | beta]).
    g_norm_in,   b_norm_in   = consts[4:5, :Cp], consts[4:5, Cp:]
    g_norm_out,  b_norm_out  = consts[5:6, :Cp], consts[5:6, Cp:]
    g_inorm_in,  b_inorm_in  = consts[6:7, :Cp], consts[6:7, Cp:]
    g_inorm_out, b_inorm_out = consts[7:8, :Cp], consts[7:8, Cp:]
    g_fc,        b_fc        = consts[8:9, :Cp], consts[8:9, Cp:]

    # Masked LayerNorm over the true C channels.  All LN inputs have exact
    # zeros in lanes >= C (weights / biases / gamma / beta are zero-padded), so
    # the mean needs only sum/C and only the variance term needs the mask.
    if Cp == C:
        lane_mask = None
    else:
        lane_mask = jnp.where(
            jax.lax.broadcasted_iota(jnp.int32, (1, Cp), 1) < C, 1.0, 0.0)
    inv_c = jnp.float32(1.0 / C)

    def ln(x, g, b):
        if lane_mask is None:
            mu = jnp.mean(x, axis=-1, keepdims=True)
            d = x - mu
            var = jnp.mean(d * d, axis=-1, keepdims=True)
        else:
            mu = jnp.sum(x, axis=-1, keepdims=True) * inv_c
            d = x - mu
            var = jnp.sum(d * d * lane_mask, axis=-1, keepdims=True) * inv_c
        return d * jax.lax.rsqrt(var + EPS) * g + b

    upd = upd_ref[...]                                    # (nb, Cp)
    x = inp_ref[...]                                      # (M, Cp)
    nb = upd.shape[0]
    m = x.shape[0]

    # ---- dynamic_layer on nb proposals only (no S replication) ----
    params = jnp.dot(upd, dyn_w_ref[...],
                     preferred_element_type=jnp.float32) + dyn_b      # (nb, 2Cp)
    param_in = params[:, :Cp]
    param_out_n = ln(params[:, Cp:], g_norm_out, b_norm_out)          # norm_out

    # Broadcast per-proposal rows across the S kernel positions with a 0/1
    # expansion matmul (row p*S+s of the result == row p of the operand).
    # Chosen over broadcast_to + reshape: the (nb, S)->(nb*S) sublane collapse
    # with S=9 is a relayout/shape-cast Mosaic may reject, while iota/compare/
    # dot always lower; the MXU has plenty of slack in this kernel.
    rows = jax.lax.broadcasted_iota(jnp.int32, (m, nb), 0)
    cols = jax.lax.broadcasted_iota(jnp.int32, (m, nb), 1)
    start = cols * S
    expand = jnp.where(jnp.logical_and(rows >= start, rows < start + S),
                       1.0, 0.0)                                      # (M, nb) f32
    rep = jnp.dot(expand, jnp.concatenate([param_in, param_out_n], axis=1),
                  preferred_element_type=jnp.float32)                 # (M, 2Cp)
    rep_param_in, rep_param_out_n = rep[:, :Cp], rep[:, Cp:]

    # ---- input_layer on all M = nb*S rows ----
    feats = jnp.dot(x, in_w_ref[...],
                    preferred_element_type=jnp.float32) + in_b        # (M, 2Cp)
    input_in, input_out = feats[:, :Cp], feats[:, Cp:]

    gate_feats = input_in * rep_param_in                              # (M, Cp) f32
    # gate_norm_act=False (module default): no gate_norm / activation here.

    # ---- fused [input_gate | update_gate] projection (one MXU push) ----
    gates = jnp.dot(gate_feats.astype(gemm_dtype), gates_w_ref[...],
                    preferred_element_type=jnp.float32) + gates_b     # (M, 2Cp)

    def sigmoid(v):  # explicit form; always lowers (exp -> EUP)
        return 1.0 / (1.0 + jnp.exp(-v))

    input_gate = sigmoid(ln(gates[:, :Cp], g_inorm_in, b_inorm_in))   # input_norm_in
    update_gate = sigmoid(ln(gates[:, Cp:], g_norm_in, b_norm_in))    # norm_in

    input_out_n = ln(input_out, g_inorm_out, b_inorm_out)             # input_norm_out
    # activate_out=False (module default): no activation on *_out here.

    features = update_gate * rep_param_out_n + input_gate * input_out_n

    # ---- fc_layer + fc_norm + ReLU ----
    out = jnp.dot(features.astype(gemm_dtype), fc_w_ref[...],
                  preferred_element_type=jnp.float32) + fc_b
    out = ln(out, g_fc, b_fc)
    out_ref[...] = jnp.maximum(out, 0.0).astype(out_ref.dtype)


# ---------------------------------------------------------------------------
# One-time parameter packing (do this at model-load time, NOT per call)
# ---------------------------------------------------------------------------
def _pad_cols(a, cp):
    return jnp.pad(a, ((0, 0), (0, cp - a.shape[-1])))


def _pad_halves_cols(a, c, cp):
    return jnp.concatenate([_pad_cols(a[:, :c], cp), _pad_cols(a[:, c:], cp)], axis=1)


def _pad_two_halves_w(w, c, cp):
    w = jnp.pad(w, ((0, cp - w.shape[0]), (0, 0)))
    return _pad_halves_cols(w, c, cp)


def pack_params(p, *, use_bf16=True):
    """Fuse / lane-pad / cast parameters once.  Returns a dict for kernel_updator."""
    C = p["dyn_w"].shape[0]
    Cout = p["fc_w"].shape[1]
    assert Cout == C, "constant packing assumes out_channels == feat_channels"
    Cp = ((C + 127) // 128) * 128                 # lane-dense channels (>=128)
    gemm_dtype = jnp.bfloat16 if use_bf16 else jnp.float32

    dyn_w = _pad_two_halves_w(p["dyn_w"], C, Cp).astype(gemm_dtype)
    in_w = _pad_two_halves_w(p["in_w"], C, Cp).astype(gemm_dtype)
    gates_w = _pad_two_halves_w(
        jnp.concatenate([p["gi_w"], p["gu_w"]], axis=1), C, Cp).astype(gemm_dtype)
    fc_w = jnp.pad(p["fc_w"], ((0, Cp - C), (0, Cp - Cout))).astype(gemm_dtype)

    dyn_b = _pad_halves_cols(p["dyn_b"], C, Cp)                       # (1, 2Cp)
    in_b = _pad_halves_cols(p["in_b"], C, Cp)
    gates_b = jnp.concatenate(
        [_pad_cols(p["gi_b"], Cp), _pad_cols(p["gu_b"], Cp)], axis=1)
    fc_b = jnp.pad(p["fc_b"], ((0, 0), (0, 2 * Cp - Cout)))

    # 5 LayerNorms, order: norm_in, norm_out, input_norm_in, input_norm_out, fc_norm.
    ln_pairs = jnp.pad(p["ln"].reshape(5, 2, C),
                       ((0, 0), (0, 0), (0, Cp - C))).reshape(5, 2 * Cp)

    consts = jnp.concatenate([dyn_b, in_b, gates_b, fc_b, ln_pairs],
                             axis=0).astype(jnp.float32)              # (9, 2Cp)

    return dict(dyn_w=dyn_w, in_w=in_w, gates_w=gates_w, fc_w=fc_w, consts=consts,
                feat_channels=C, padded_channels=Cp, out_channels=Cout)


# ---------------------------------------------------------------------------
# Wrapper
# ---------------------------------------------------------------------------
def _pick_nb(n, s, align, target_rows=768):
    """Proposals per block: nb*s a multiple of `align`, ~512-1024 rows, and at
    least 2 grid blocks when possible (v7x dual-TensorCore sharding)."""
    step = align // math.gcd(s, align)
    nb = max(step, ((max(1, target_rows // s) + step - 1) // step) * step)
    while nb > step and (n + nb - 1) // nb < 2:
        nb -= step
    return nb


def kernel_updator(update_feature, input_feature, packed, *, nb=None,
                   out_dtype=jnp.float32):
    """Forward pass.  `packed` comes from pack_params() (one-time).

    out_dtype: set to jnp.bfloat16 to halve output writeback bytes if the
    consumer tolerates it (most useful on v5e)."""
    C = packed["feat_channels"]
    Cp = packed["padded_channels"]
    Cout = packed["out_channels"]
    gemm_dtype = packed["dyn_w"].dtype
    align = 16 if jnp.dtype(gemm_dtype).itemsize == 2 else 8

    update_feature = update_feature.reshape(-1, C)        # (N, C)
    N = update_feature.shape[0]
    input_feature = input_feature.reshape(N, -1, C)       # (N, S, C)
    S = input_feature.shape[1]

    step = align // math.gcd(S, align)
    if nb is None:
        nb = _pick_nb(N, S, align)
    else:
        nb = max(step, ((nb + step - 1) // step) * step)
    num_blocks = (N + nb - 1) // nb
    n_pad = num_blocks * nb
    m_blk = nb * S

    # Per-call activation plumbing: cast GEMM inputs, lane-pad channels to Cp
    # (no-op when C is already a multiple of 128), zero-pad the proposal tail.
    # NOTE: the update feature is fed UN-replicated: (n_pad, Cp) only.
    upd = jnp.pad(update_feature.astype(gemm_dtype),
                  ((0, n_pad - N), (0, Cp - C)))
    inp = jnp.pad(input_feature.reshape(N * S, C).astype(gemm_dtype),
                  ((0, (n_pad - N) * S), (0, Cp - C)))

    kern = functools.partial(kernel_updator_kernel,
                             feat_channels=C, padded_channels=Cp, conv_area=S)

    def const_spec(shape):
        # Resident across the whole grid (index_map never changes).
        return pl.BlockSpec(shape, lambda i: (0,) * len(shape))

    out_flat = pl.pallas_call(
        kern,
        out_shape=jax.ShapeDtypeStruct((n_pad * S, Cp), out_dtype),
        grid=(num_blocks,),
        in_specs=[
            pl.BlockSpec((nb, Cp), lambda i: (i, 0)),      # update feature
            pl.BlockSpec((m_blk, Cp), lambda i: (i, 0)),   # input feature
            const_spec((Cp, 2 * Cp)),    # dynamic_layer W
            const_spec((Cp, 2 * Cp)),    # input_layer W
            const_spec((Cp, 2 * Cp)),    # fused [input_gate | update_gate] W
            const_spec((Cp, Cp)),        # fc_layer W
            const_spec((9, 2 * Cp)),     # packed biases + LN gamma/beta
        ],
        out_specs=pl.BlockSpec((m_blk, Cp), lambda i: (i, 0)),
        # Independent proposal blocks -> megacore / v7x 2-TC sharding.
        compiler_params=pltpu.CompilerParams(
            dimension_semantics=("parallel",),
            vmem_limit_bytes=64 * 1024 * 1024),
    )(upd, inp, packed["dyn_w"], packed["in_w"], packed["gates_w"],
      packed["fc_w"], packed["consts"])

    return out_flat[: N * S, :Cout].reshape(N, S, Cout)


# ---------------------------------------------------------------------------
# Pure-JAX reference (mirrors the PyTorch forward)
# ---------------------------------------------------------------------------
def _ln(x, g, b):
    mu = jnp.mean(x, axis=-1, keepdims=True)
    var = jnp.mean(jnp.square(x - mu), axis=-1, keepdims=True)
    return (x - mu) * jax.lax.rsqrt(var + EPS) * g + b


def reference(update_feature, input_feature, p, *, gemm_dtype=jnp.float32):
    """gemm_dtype applies the same GEMM-input casts as the kernel (f32 accumulate)."""
    C = p["dyn_w"].shape[0]
    update_feature = update_feature.reshape(-1, C)
    N = update_feature.shape[0]
    input_feature = input_feature.reshape(N, -1, C)
    cast = lambda a: a.astype(gemm_dtype)

    params = jnp.dot(cast(update_feature), cast(p["dyn_w"]),
                     preferred_element_type=jnp.float32) + p["dyn_b"]
    param_in, param_out = params[:, :C], params[:, C:]

    feats = jnp.dot(cast(input_feature), cast(p["in_w"]),
                    preferred_element_type=jnp.float32) + p["in_b"]
    input_in, input_out = feats[..., :C], feats[..., C:]

    gate_feats = input_in * param_in[:, None, :]
    ln = p["ln"]
    ig = jnp.dot(cast(gate_feats), cast(p["gi_w"]),
                 preferred_element_type=jnp.float32) + p["gi_b"]
    ug = jnp.dot(cast(gate_feats), cast(p["gu_w"]),
                 preferred_element_type=jnp.float32) + p["gu_b"]
    input_gate = jax.nn.sigmoid(_ln(ig, ln[4], ln[5]))     # input_norm_in
    update_gate = jax.nn.sigmoid(_ln(ug, ln[0], ln[1]))    # norm_in

    param_out = _ln(param_out, ln[2], ln[3])               # norm_out
    input_out = _ln(input_out, ln[6], ln[7])               # input_norm_out

    features = update_gate * param_out[:, None, :] + input_gate * input_out
    out = jnp.dot(cast(features), cast(p["fc_w"]),
                  preferred_element_type=jnp.float32) + p["fc_b"]
    out = _ln(out, ln[8], ln[9])                           # fc_norm
    return jnp.maximum(out, 0.0)


def init_params(key, channels):
    """Deterministic synthetic init (PyTorch-Linear-style uniform, LN ~identity)."""
    C = channels
    keys = jax.random.split(key, 16)

    def linear(kw, kb, fan_in, fan_out):
        bound = 1.0 / jnp.sqrt(jnp.float32(fan_in))
        w = jax.random.uniform(kw, (fan_in, fan_out), jnp.float32, -bound, bound)
        b = jax.random.uniform(kb, (1, fan_out), jnp.float32, -bound, bound)
        return w, b

    dyn_w, dyn_b = linear(keys[0], keys[1], C, 2 * C)
    in_w, in_b = linear(keys[2], keys[3], C, 2 * C)
    gi_w, gi_b = linear(keys[4], keys[5], C, C)
    gu_w, gu_b = linear(keys[6], keys[7], C, C)
    fc_w, fc_b = linear(keys[8], keys[9], C, C)

    # 5 LayerNorms: norm_in, norm_out, input_norm_in, input_norm_out, fc_norm.
    gammas = 1.0 + 0.1 * jax.random.uniform(keys[10], (5, C), jnp.float32, -1.0, 1.0)
    betas = 0.05 * jax.random.uniform(keys[11], (5, C), jnp.float32, -1.0, 1.0)
    ln = jnp.stack(
        [gammas[0], betas[0], gammas[1], betas[1], gammas[2], betas[2],
         gammas[3], betas[3], gammas[4], betas[4]], axis=0)            # (10, C)

    return dict(dyn_w=dyn_w, dyn_b=dyn_b, in_w=in_w, in_b=in_b,
                gi_w=gi_w, gi_b=gi_b, gu_w=gu_w, gu_b=gu_b,
                fc_w=fc_w, fc_b=fc_b, ln=ln)


if __name__ == "__main__":
    # Small test config: feat = in = out channels = 32 (production: 128/256 —
    # the wrapper lane-pads to 128 here), 3x3 conv kernel (S=9), N=20 proposals
    # (deliberately not a multiple of the proposal block -> padded-tail path;
    # the auto-picked nb gives a 2-block parallel grid).
    C = 32
    S = 9
    N = 20

    key = jax.random.PRNGKey(0)
    k_upd, k_inp, k_par = jax.random.split(key, 3)
    update_feature = jax.random.normal(k_upd, (N, C), jnp.float32)
    input_feature = jax.random.normal(k_inp, (N, S, C), jnp.float32)
    params = init_params(k_par, C)

    # f32 GEMM path: tight check against the pure f32 reference.
    packed_f32 = pack_params(params, use_bf16=False)
    out_f32 = jax.block_until_ready(
        kernel_updator(update_feature, input_feature, packed_f32))
    ref_f32 = jax.block_until_ready(reference(update_feature, input_feature, params))
    assert out_f32.shape == (N, S, C), out_f32.shape
    assert jnp.allclose(out_f32, ref_f32, atol=1e-3, rtol=1e-3), (
        float(jnp.max(jnp.abs(out_f32 - ref_f32))))

    # bf16 GEMM path (recommended default on v5e/v6e/v7x): check against a
    # reference applying the same bf16 GEMM-input casts (f32 accumulation) ...
    packed_bf16 = pack_params(params, use_bf16=True)
    out_bf16 = jax.block_until_ready(
        kernel_updator(update_feature, input_feature, packed_bf16))
    ref_bf16 = jax.block_until_ready(
        reference(update_feature, input_feature, params, gemm_dtype=jnp.bfloat16))
    assert jnp.allclose(out_bf16, ref_bf16, atol=1e-2, rtol=1e-2), (
        float(jnp.max(jnp.abs(out_bf16 - ref_bf16))))
    # ... and loosely against the f32 reference.
    assert jnp.allclose(out_bf16, ref_f32, atol=2e-1, rtol=2e-1), (
        float(jnp.max(jnp.abs(out_bf16 - ref_f32))))

    print("KERNEL_OK")
</pallas_src>

<mosaic_0001>
module attributes {stable_mosaic.version = 11 : i64} {
  func.func @kernel_updator_kernel(%arg0: i32, %arg1: memref<16x128xf32, #tpu.memory_space<vmem>>, %arg2: memref<144x128xf32, #tpu.memory_space<vmem>>, %arg3: memref<128x256xf32, #tpu.memory_space<vmem>>, %arg4: memref<128x256xf32, #tpu.memory_space<vmem>>, %arg5: memref<128x256xf32, #tpu.memory_space<vmem>>, %arg6: memref<128x128xf32, #tpu.memory_space<vmem>>, %arg7: memref<9x256xf32, #tpu.memory_space<vmem>>, %arg8: memref<144x128xf32, #tpu.memory_space<vmem>>) attributes {dimension_semantics = [#tpu.dimension_semantics<parallel>], iteration_bounds = array<i64: 2>, scalar_prefetch = 0 : i64, scratch_operands = 0 : i64, tpu.core_type = #tpu.core_type<tc>, window_params = [{transform_indices = @transform_0, window_bounds = array<i64: 16, 128>}, {transform_indices = @transform_1, window_bounds = array<i64: 144, 128>}, {pipeline_mode = #tpu.pipeline_mode<synchronous>, transform_indices = @transform_2, window_bounds = array<i64: 128, 256>}, {pipeline_mode = #tpu.pipeline_mode<synchronous>, transform_indices = @transform_3, window_bounds = array<i64: 128, 256>}, {pipeline_mode = #tpu.pipeline_mode<synchronous>, transform_indices = @transform_4, window_bounds = array<i64: 128, 256>}, {pipeline_mode = #tpu.pipeline_mode<synchronous>, transform_indices = @transform_5, window_bounds = array<i64: 128, 128>}, {pipeline_mode = #tpu.pipeline_mode<synchronous>, transform_indices = @transform_6, window_bounds = array<i64: 9, 256>}, {transform_indices = @transform_7, window_bounds = array<i64: 144, 128>}]} {
    %c0 = arith.constant 0 : index
    %c0_0 = arith.constant 0 : index
    %0 = vector.load %arg7[%c0, %c0_0] : memref<9x256xf32, #tpu.memory_space<vmem>>, vector<9x256xf32>
    %1 = vector.extract_strided_slice %0 {offsets = [0, 0], sizes = [1, 256], strides = [1, 1]} : vector<9x256xf32> to vector<1x256xf32>
    %2 = vector.extract_strided_slice %0 {offsets = [1, 0], sizes = [1, 256], strides = [1, 1]} : vector<9x256xf32> to vector<1x256xf32>
    %3 = vector.extract_strided_slice %0 {offsets = [2, 0], sizes = [1, 256], strides = [1, 1]} : vector<9x256xf32> to vector<1x256xf32>
    %4 = vector.extract_strided_slice %0 {offsets = [3, 0], sizes = [1, 128], strides = [1, 1]} : vector<9x256xf32> to vector<1x128xf32>
    %5 = vector.extract_strided_slice %0 {offsets = [4, 0], sizes = [1, 128], strides = [1, 1]} : vector<9x256xf32> to vector<1x128xf32>
    %6 = vector.extract_strided_slice %0 {offsets = [4, 128], sizes = [1, 128], strides = [1, 1]} : vector<9x256xf32> to vector<1x128xf32>
    %7 = vector.extract_strided_slice %0 {offsets = [5, 0], sizes = [1, 128], strides = [1, 1]} : vector<9x256xf32> to vector<1x128xf32>
    %8 = vector.extract_strided_slice %0 {offsets = [5, 128], sizes = [1, 128], strides = [1, 1]} : vector<9x256xf32> to vector<1x128xf32>
    %9 = vector.extract_strided_slice %0 {offsets = [6, 0], sizes = [1, 128], strides = [1, 1]} : vector<9x256xf32> to vector<1x128xf32>
    %10 = vector.extract_strided_slice %0 {offsets = [6, 128], sizes = [1, 128], strides = [1, 1]} : vector<9x256xf32> to vector<1x128xf32>
    %11 = vector.extract_strided_slice %0 {offsets = [7, 0], sizes = [1, 128], strides = [1, 1]} : vector<9x256xf32> to vector<1x128xf32>
    %12 = vector.extract_strided_slice %0 {offsets = [7, 128], sizes = [1, 128], strides = [1, 1]} : vector<9x256xf32> to vector<1x128xf32>
    %13 = vector.extract_strided_slice %0 {offsets = [8, 0], sizes = [1, 128], strides = [1, 1]} : vector<9x256xf32> to vector<1x128xf32>
    %14 = vector.extract_strided_slice %0 {offsets = [8, 128], sizes = [1, 128], strides = [1, 1]} : vector<9x256xf32> to vector<1x128xf32>
    %15 = tpu.iota {dimensions = array<i32: 1>} : vector<1x128xi32>
    %c32_i32 = arith.constant 32 : i32
    %16 = vector.broadcast %c32_i32 : i32 to vector<1x128xi32>
    %17 = arith.cmpi slt, %15, %16 : vector<1x128xi32>
    %cst = arith.constant 1.000000e+00 : f32
    %cst_1 = arith.constant 0.000000e+00 : f32
    %18 = vector.broadcast %cst : f32 to vector<1x128xf32>
    %19 = vector.broadcast %cst_1 : f32 to vector<1x128xf32>
    %20 = arith.select %17, %18, %19 : vector<1x128xi1>, vector<1x128xf32>
    %c0_2 = arith.constant 0 : index
    %c0_3 = arith.constant 0 : index
    %21 = vector.load %arg1[%c0_2, %c0_3] : memref<16x128xf32, #tpu.memory_space<vmem>>, vector<16x128xf32>
    %c0_4 = arith.constant 0 : index
    %c0_5 = arith.constant 0 : index
    %22 = vector.load %arg2[%c0_4, %c0_5] : memref<144x128xf32, #tpu.memory_space<vmem>>, vector<144x128xf32>
    %c0_6 = arith.constant 0 : index
    %c0_7 = arith.constant 0 : index
    %23 = vector.load %arg3[%c0_6, %c0_7] : memref<128x256xf32, #tpu.memory_space<vmem>>, vector<128x256xf32>
    %cst_8 = arith.constant dense<0.000000e+00> : vector<16x256xf32>
    %24 = tpu.matmul %21, %23, %cst_8 {dimension_numbers = #tpu.dot_dimension_numbers<[1], [0], [0], [1], [0, 0, 1, 1], [], []>} : vector<16x128xf32>, vector<128x256xf32>, vector<16x256xf32> -> vector<16x256xf32>
    %25 = vector.broadcast %1 : vector<1x256xf32> to vector<16x256xf32>
    %26 = arith.addf %24, %25 : vector<16x256xf32>
    %27 = vector.extract_strided_slice %26 {offsets = [0, 0], sizes = [16, 128], strides = [1, 1]} : vector<16x256xf32> to vector<16x128xf32>
    %28 = vector.extract_strided_slice %26 {offsets = [0, 128], sizes = [16, 128], strides = [1, 1]} : vector<16x256xf32> to vector<16x128xf32>
    %cst_9 = arith.constant dense<0.000000e+00> : vector<16xf32>
    %29 = vector.multi_reduction <add>, %28, %cst_9 [1] : vector<16x128xf32> to vector<16xf32>
    %30 = vector.shape_cast %29 : vector<16xf32> to vector<16x1xf32>
    %cst_10 = arith.constant 3.125000e-02 : f32
    %31 = vector.broadcast %cst_10 : f32 to vector<16x1xf32>
    %32 = arith.mulf %30, %31 : vector<16x1xf32>
    %33 = vector.broadcast %32 : vector<16x1xf32> to vector<16x128xf32>
    %34 = arith.subf %28, %33 : vector<16x128xf32>
    %35 = arith.mulf %34, %34 : vector<16x128xf32>
    %36 = vector.broadcast %20 : vector<1x128xf32> to vector<16x128xf32>
    %37 = arith.mulf %35, %36 : vector<16x128xf32>
    %cst_11 = arith.constant dense<0.000000e+00> : vector<16xf32>
    %38 = vector.multi_reduction <add>, %37, %cst_11 [1] : vector<16x128xf32> to vector<16xf32>
    %39 = vector.shape_cast %38 : vector<16xf32> to vector<16x1xf32>
    %cst_12 = arith.constant 3.125000e-02 : f32
    %40 = vector.broadcast %cst_12 : f32 to vector<16x1xf32>
    %41 = arith.mulf %39, %40 : vector<16x1xf32>
    %cst_13 = arith.constant 9.99999974E-6 : f32
    %42 = vector.broadcast %cst_13 : f32 to vector<16x1xf32>
    %43 = arith.addf %41, %42 : vector<16x1xf32>
    %44 = math.rsqrt %43 : vector<16x1xf32>
    %45 = vector.broadcast %44 : vector<16x1xf32> to vector<16x128xf32>
    %46 = arith.mulf %34, %45 : vector<16x128xf32>
    %47 = vector.broadcast %7 : vector<1x128xf32> to vector<16x128xf32>
    %48 = arith.mulf %46, %47 : vector<16x128xf32>
    %49 = vector.broadcast %8 : vector<1x128xf32> to vector<16x128xf32>
    %50 = arith.addf %48, %49 : vector<16x128xf32>
    %51 = tpu.iota {dimensions = array<i32: 0>} : vector<144x16xi32>
    %52 = tpu.iota {dimensions = array<i32: 1>} : vector<144x16xi32>
    %c9_i32 = arith.constant 9 : i32
    %53 = vector.broadcast %c9_i32 : i32 to vector<144x16xi32>
    %54 = arith.muli %52, %53 : vector<144x16xi32>
    %55 = arith.cmpi sge, %51, %54 : vector<144x16xi32>
    %c9_i32_14 = arith.constant 9 : i32
    %56 = vector.broadcast %c9_i32_14 : i32 to vector<144x16xi32>
    %57 = arith.addi %54, %56 : vector<144x16xi32>
    %58 = arith.cmpi slt, %51, %57 : vector<144x16xi32>
    %59 = arith.andi %55, %58 : vector<144x16xi1>
    %cst_15 = arith.constant 1.000000e+00 : f32
    %cst_16 = arith.constant 0.000000e+00 : f32
    %60 = vector.broadcast %cst_15 : f32 to vector<144x16xf32>
    %61 = vector.broadcast %cst_16 : f32 to vector<144x16xf32>
    %62 = arith.select %59, %60, %61 : vector<144x16xi1>, vector<144x16xf32>
    %63 = tpu.concatenate %27, %50 in 1 : vector<16x128xf32>, vector<16x128xf32> -> vector<16x256xf32>
    %cst_17 = arith.constant dense<0.000000e+00> : vector<144x256xf32>
    %64 = tpu.matmul %62, %63, %cst_17 {dimension_numbers = #tpu.dot_dimension_numbers<[1], [0], [0], [1], [0, 0, 1, 1], [], []>} : vector<144x16xf32>, vector<16x256xf32>, vector<144x256xf32> -> vector<144x256xf32>
    %65 = vector.extract_strided_slice %64 {offsets = [0, 0], sizes = [144, 128], strides = [1, 1]} : vector<144x256xf32> to vector<144x128xf32>
    %66 = vector.extract_strided_slice %64 {offsets = [0, 128], sizes = [144, 128], strides = [1, 1]} : vector<144x256xf32> to vector<144x128xf32>
    %c0_18 = arith.constant 0 : index
    %c0_19 = arith.constant 0 : index
    %67 = vector.load %arg4[%c0_18, %c0_19] : memref<128x256xf32, #tpu.memory_space<vmem>>, vector<128x256xf32>
    %cst_20 = arith.constant dense<0.000000e+00> : vector<144x256xf32>
    %68 = tpu.matmul %22, %67, %cst_20 {dimension_numbers = #tpu.dot_dimension_numbers<[1], [0], [0], [1], [0, 0, 1, 1], [], []>} : vector<144x128xf32>, vector<128x256xf32>, vector<144x256xf32> -> vector<144x256xf32>
    %69 = vector.broadcast %2 : vector<1x256xf32> to vector<144x256xf32>
    %70 = arith.addf %68, %69 : vector<144x256xf32>
    %71 = vector.extract_strided_slice %70 {offsets = [0, 0], sizes = [144, 128], strides = [1, 1]} : vector<144x256xf32> to vector<144x128xf32>
    %72 = vector.extract_strided_slice %70 {offsets = [0, 128], sizes = [144, 128], strides = [1, 1]} : vector<144x256xf32> to vector<144x128xf32>
    %73 = arith.mulf %71, %65 : vector<144x128xf32>
    %c0_21 = arith.constant 0 : index
    %c0_22 = arith.constant 0 : index
    %74 = vector.load %arg5[%c0_21, %c0_22] : memref<128x256xf32, #tpu.memory_space<vmem>>, vector<128x256xf32>
    %cst_23 = arith.constant dense<0.000000e+00> : vector<144x256xf32>
    %75 = tpu.matmul %73, %74, %cst_23 {dimension_numbers = #tpu.dot_dimension_numbers<[1], [0], [0], [1], [0, 0, 1, 1], [], []>} : vector<144x128xf32>, vector<128x256xf32>, vector<144x256xf32> -> vector<144x256xf32>
    %76 = vector.broadcast %3 : vector<1x256xf32> to vector<144x256xf32>
    %77 = arith.addf %75, %76 : vector<144x256xf32>
    %78 = vector.extract_strided_slice %77 {offsets = [0, 0], sizes = [144, 128], strides = [1, 1]} : vector<144x256xf32> to vector<144x128xf32>
    %cst_24 = arith.constant dense<0.000000e+00> : vector<144xf32>
    %79 = vector.multi_reduction <add>, %78, %cst_24 [1] : vector<144x128xf32> to vector<144xf32>
    %80 = vector.shape_cast %79 : vector<144xf32> to vector<144x1xf32>
    %cst_25 = arith.constant 3.125000e-02 : f32
    %81 = vector.broadcast %cst_25 : f32 to vector<144x1xf32>
    %82 = arith.mulf %80, %81 : vector<144x1xf32>
    %83 = vector.broadcast %82 : vector<144x1xf32> to vector<144x128xf32>
    %84 = arith.subf %78, %83 : vector<144x128xf32>
    %85 = arith.mulf %84, %84 : vector<144x128xf32>
    %86 = vector.broadcast %20 : vector<1x128xf32> to vector<144x128xf32>
    %87 = arith.mulf %85, %86 : vector<144x128xf32>
    %cst_26 = arith.constant dense<0.000000e+00> : vector<144xf32>
    %88 = vector.multi_reduction <add>, %87, %cst_26 [1] : vector<144x128xf32> to vector<144xf32>
    %89 = vector.shape_cast %88 : vector<144xf32> to vector<144x1xf32>
    %cst_27 = arith.constant 3.125000e-02 : f32
    %90 = vector.broadcast %cst_27 : f32 to vector<144x1xf32>
    %91 = arith.mulf %89, %90 : vector<144x1xf32>
    %cst_28 = arith.constant 9.99999974E-6 : f32
    %92 = vector.broadcast %cst_28 : f32 to vector<144x1xf32>
    %93 = arith.addf %91, %92 : vector<144x1xf32>
    %94 = math.rsqrt %93 : vector<144x1xf32>
    %95 = vector.broadcast %94 : vector<144x1xf32> to vector<144x128xf32>
    %96 = arith.mulf %84, %95 : vector<144x128xf32>
    %97 = vector.broadcast %9 : vector<1x128xf32> to vector<144x128xf32>
    %98 = arith.mulf %96, %97 : vector<144x128xf32>
    %99 = vector.broadcast %10 : vector<1x128xf32> to vector<144x128xf32>
    %100 = arith.addf %98, %99 : vector<144x128xf32>
    %cst_29 = arith.constant 0.000000e+00 : f32
    %101 = vector.broadcast %cst_29 : f32 to vector<144x128xf32>
    %102 = arith.subf %101, %100 : vector<144x128xf32>
    %103 = math.exp %102 : vector<144x128xf32>
    %cst_30 = arith.constant 1.000000e+00 : f32
    %104 = vector.broadcast %cst_30 : f32 to vector<144x128xf32>
    %105 = arith.addf %104, %103 : vector<144x128xf32>
    %cst_31 = arith.constant 1.000000e+00 : f32
    %106 = vector.broadcast %cst_31 : f32 to vector<144x128xf32>
    %107 = arith.divf %106, %105 : vector<144x128xf32>
    %108 = vector.extract_strided_slice %77 {offsets = [0, 128], sizes = [144, 128], strides = [1, 1]} : vector<144x256xf32> to vector<144x128xf32>
    %cst_32 = arith.constant dense<0.000000e+00> : vector<144xf32>
    %109 = vector.multi_reduction <add>, %108, %cst_32 [1] : vector<144x128xf32> to vector<144xf32>
    %110 = vector.shape_cast %109 : vector<144xf32> to vector<144x1xf32>
    %cst_33 = arith.constant 3.125000e-02 : f32
    %111 = vector.broadcast %cst_33 : f32 to vector<144x1xf32>
    %112 = arith.mulf %110, %111 : vector<144x1xf32>
    %113 = vector.broadcast %112 : vector<144x1xf32> to vector<144x128xf32>
    %114 = arith.subf %108, %113 : vector<144x128xf32>
    %115 = arith.mulf %114, %114 : vector<144x128xf32>
    %116 = vector.broadcast %20 : vector<1x128xf32> to vector<144x128xf32>
    %117 = arith.mulf %115, %116 : vector<144x128xf32>
    %cst_34 = arith.constant dense<0.000000e+00> : vector<144xf32>
    %118 = vector.multi_reduction <add>, %117, %cst_34 [1] : vector<144x128xf32> to vector<144xf32>
    %119 = vector.shape_cast %118 : vector<144xf32> to vector<144x1xf32>
    %cst_35 = arith.constant 3.125000e-02 : f32
    %120 = vector.broadcast %cst_35 : f32 to vector<144x1xf32>
    %121 = arith.mulf %119, %120 : vector<144x1xf32>
    %cst_36 = arith.constant 9.99999974E-6 : f32
    %122 = vector.broadcast %cst_36 : f32 to vector<144x1xf32>
    %123 = arith.addf %121, %122 : vector<144x1xf32>
    %124 = math.rsqrt %123 : vector<144x1xf32>
    %125 = vector.broadcast %124 : vector<144x1xf32> to vector<144x128xf32>
    %126 = arith.mulf %114, %125 : vector<144x128xf32>
    %127 = vector.broadcast %5 : vector<1x128xf32> to vector<144x128xf32>
    %128 = arith.mulf %126, %127 : vector<144x128xf32>
    %129 = vector.broadcast %6 : vector<1x128xf32> to vector<144x128xf32>
    %130 = arith.addf %128, %129 : vector<144x128xf32>
    %cst_37 = arith.constant 0.000000e+00 : f32
    %131 = vector.broadcast %cst_37 : f32 to vector<144x128xf32>
    %132 = arith.subf %131, %130 : vector<144x128xf32>
    %133 = math.exp %132 : vector<144x128xf32>
    %cst_38 = arith.constant 1.000000e+00 : f32
    %134 = vector.broadcast %cst_38 : f32 to vector<144x128xf32>
    %135 = arith.addf %134, %133 : vector<144x128xf32>
    %cst_39 = arith.constant 1.000000e+00 : f32
    %136 = vector.broadcast %cst_39 : f32 to vector<144x128xf32>
    %137 = arith.divf %136, %135 : vector<144x128xf32>
    %cst_40 = arith.constant dense<0.000000e+00> : vector<144xf32>
    %138 = vector.multi_reduction <add>, %72, %cst_40 [1] : vector<144x128xf32> to vector<144xf32>
    %139 = vector.shape_cast %138 : vector<144xf32> to vector<144x1xf32>
    %cst_41 = arith.constant 3.125000e-02 : f32
    %140 = vector.broadcast %cst_41 : f32 to vector<144x1xf32>
    %141 = arith.mulf %139, %140 : vector<144x1xf32>
    %142 = vector.broadcast %141 : vector<144x1xf32> to vector<144x128xf32>
    %143 = arith.subf %72, %142 : vector<144x128xf32>
    %144 = arith.mulf %143, %143 : vector<144x128xf32>
    %145 = vector.broadcast %20 : vector<1x128xf32> to vector<144x128xf32>
    %146 = arith.mulf %144, %145 : vector<144x128xf32>
    %cst_42 = arith.constant dense<0.000000e+00> : vector<144xf32>
    %147 = vector.multi_reduction <add>, %146, %cst_42 [1] : vector<144x128xf32> to vector<144xf32>
    %148 = vector.shape_cast %147 : vector<144xf32> to vector<144x1xf32>
    %cst_43 = arith.constant 3.125000e-02 : f32
    %149 = vector.broadcast %cst_43 : f32 to vector<144x1xf32>
    %150 = arith.mulf %148, %149 : vector<144x1xf32>
    %cst_44 = arith.constant 9.99999974E-6 : f32
    %151 = vector.broadcast %cst_44 : f32 to vector<144x1xf32>
    %152 = arith.addf %150, %151 : vector<144x1xf32>
    %153 = math.rsqrt %152 : vector<144x1xf32>
    %154 = vector.broadcast %153 : vector<144x1xf32> to vector<144x128xf32>
    %155 = arith.mulf %143, %154 : vector<144x128xf32>
    %156 = vector.broadcast %11 : vector<1x128xf32> to vector<144x128xf32>
    %157 = arith.mulf %155, %156 : vector<144x128xf32>
    %158 = vector.broadcast %12 : vector<1x128xf32> to vector<144x128xf32>
    %159 = arith.addf %157, %158 : vector<144x128xf32>
    %160 = arith.mulf %137, %66 : vector<144x128xf32>
    %161 = arith.mulf %107, %159 : vector<144x128xf32>
    %162 = arith.addf %160, %161 : vector<144x128xf32>
    %c0_45 = arith.constant 0 : index
    %c0_46 = arith.constant 0 : index
    %163 = vector.load %arg6[%c0_45, %c0_46] : memref<128x128xf32, #tpu.memory_space<vmem>>, vector<128x128xf32>
    %cst_47 = arith.constant dense<0.000000e+00> : vector<144x128xf32>
    %164 = tpu.matmul %162, %163, %cst_47 {dimension_numbers = #tpu.dot_dimension_numbers<[1], [0], [0], [1], [0, 0, 1, 1], [], []>} : vector<144x128xf32>, vector<128x128xf32>, vector<144x128xf32> -> vector<144x128xf32>
    %165 = vector.broadcast %4 : vector<1x128xf32> to vector<144x128xf32>
    %166 = arith.addf %164, %165 : vector<144x128xf32>
    %cst_48 = arith.constant dense<0.000000e+00> : vector<144xf32>
    %167 = vector.multi_reduction <add>, %166, %cst_48 [1] : vector<144x128xf32> to vector<144xf32>
    %168 = vector.shape_cast %167 : vector<144xf32> to vector<144x1xf32>
    %cst_49 = arith.constant 3.125000e-02 : f32
    %169 = vector.broadcast %cst_49 : f32 to vector<144x1xf32>
    %170 = arith.mulf %168, %169 : vector<144x1xf32>
    %171 = vector.broadcast %170 : vector<144x1xf32> to vector<144x128xf32>
    %172 = arith.subf %166, %171 : vector<144x128xf32>
    %173 = arith.mulf %172, %172 : vector<144x128xf32>
    %174 = vector.broadcast %20 : vector<1x128xf32> to vector<144x128xf32>
    %175 = arith.mulf %173, %174 : vector<144x128xf32>
    %cst_50 = arith.constant dense<0.000000e+00> : vector<144xf32>
    %176 = vector.multi_reduction <add>, %175, %cst_50 [1] : vector<144x128xf32> to vector<144xf32>
    %177 = vector.shape_cast %176 : vector<144xf32> to vector<144x1xf32>
    %cst_51 = arith.constant 3.125000e-02 : f32
    %178 = vector.broadcast %cst_51 : f32 to vector<144x1xf32>
    %179 = arith.mulf %177, %178 : vector<144x1xf32>
    %cst_52 = arith.constant 9.99999974E-6 : f32
    %180 = vector.broadcast %cst_52 : f32 to vector<144x1xf32>
    %181 = arith.addf %179, %180 : vector<144x1xf32>
    %182 = math.rsqrt %181 : vector<144x1xf32>
    %183 = vector.broadcast %182 : vector<144x1xf32> to vector<144x128xf32>
    %184 = arith.mulf %172, %183 : vector<144x128xf32>
    %185 = vector.broadcast %13 : vector<1x128xf32> to vector<144x128xf32>
    %186 = arith.mulf %184, %185 : vector<144x128xf32>
    %187 = vector.broadcast %14 : vector<1x128xf32> to vector<144x128xf32>
    %188 = arith.addf %186, %187 : vector<144x128xf32>
    %cst_53 = arith.constant 0.000000e+00 : f32
    %189 = vector.broadcast %cst_53 : f32 to vector<144x128xf32>
    %190 = arith.maximumf %188, %189 : vector<144x128xf32>
    %c0_54 = arith.constant 0 : index
    %c0_55 = arith.constant 0 : index
    %191 = vector.load %arg8[%c0_54, %c0_55] : memref<144x128xf32, #tpu.memory_space<vmem>>, vector<144x128xf32>
    tpu.vector_store %arg8[%c0_54, %c0_55], %190 {strides = array<i32>} : memref<144x128xf32, #tpu.memory_space<vmem>>, vector<144x128xf32>,
    return
  }
  func.func @transform_0(%arg0: i32) -> (i32, i32) {
    %c0_i32 = arith.constant 0 : i32
    %c0_i32_0 = arith.constant 0 : i32
    return %arg0, %c0_i32 : i32, i32
  }
  func.func @transform_1(%arg0: i32) -> (i32, i32) {
    %c0_i32 = arith.constant 0 : i32
    %c0_i32_0 = arith.constant 0 : i32
    return %arg0, %c0_i32 : i32, i32
  }
  func.func @transform_2(%arg0: i32) -> (i32, i32) {
    %c0_i32 = arith.constant 0 : i32
    %c0_i32_0 = arith.constant 0 : i32
    %c0_i32_1 = arith.constant 0 : i32
    return %c0_i32, %c0_i32_0 : i32, i32
  }
  func.func @transform_3(%arg0: i32) -> (i32, i32) {
    %c0_i32 = arith.constant 0 : i32
    %c0_i32_0 = arith.constant 0 : i32
    %c0_i32_1 = arith.constant 0 : i32
    return %c0_i32, %c0_i32_0 : i32, i32
  }
  func.func @transform_4(%arg0: i32) -> (i32, i32) {
    %c0_i32 = arith.constant 0 : i32
    %c0_i32_0 = arith.constant 0 : i32
    %c0_i32_1 = arith.constant 0 : i32
    return %c0_i32, %c0_i32_0 : i32, i32
  }
  func.func @transform_5(%arg0: i32) -> (i32, i32) {
    %c0_i32 = arith.constant 0 : i32
    %c0_i32_0 = arith.constant 0 : i32
    %c0_i32_1 = arith.constant 0 : i32
    return %c0_i32, %c0_i32_0 : i32, i32
  }
  func.func @transform_6(%arg0: i32) -> (i32, i32) {
    %c0_i32 = arith.constant 0 : i32
    %c0_i32_0 = arith.constant 0 : i32
    %c0_i32_1 = arith.constant 0 : i32
    return %c0_i32, %c0_i32_0 : i32, i32
  }
  func.func @transform_7(%arg0: i32) -> (i32, i32) {
    %c0_i32 = arith.constant 0 : i32
    %c0_i32_0 = arith.constant 0 : i32
    return %arg0, %c0_i32 : i32, i32
  }
}

</mosaic_0001>

<bundles_post_ra>
// kernel: tpu_custom_call.1
= control target key start
LH: loop header
LB: loop body
LE: loop exit
PB: predicated region body
PF: predicated region fallthrough
CT: control target
= control target key end

     0   :  { %s8240_s0 = inlined_call_operand.hbm [shape: f32[32,128], index: 0, kind: input, shape index: {}]   ;;  %s8241_s1 = inlined_call_operand.hbm [shape: f32[288,128], index: 1, kind: input, shape index: {}]   ;;  %s8242_s2 = inlined_call_operand.hbm [shape: f32[128,256], index: 2, kind: input, shape index: {}]   ;;  %s8243_s3 = inlined_call_operand.hbm [shape: f32[128,256], index: 3, kind: input, shape index: {}]   ;;  %s8244_s4 = inlined_call_operand.hbm [shape: f32[128,256], index: 4, kind: input, shape index: {}]   ;;  %s8245_s5 = inlined_call_operand.hbm [shape: f32[128,128], index: 5, kind: input, shape index: {}]   ;;  %s8246_s6 = inlined_call_operand.hbm [shape: f32[9,256], index: 6, kind: input, shape index: {}]   ;;  %s8247_s7 = inlined_call_operand.hbm [shape: f32[288,128], index: 7, kind: output, shape index: {}]  }
   0x1   :  { %8303 = sst [smem:[#allocation76_spill]] %s8242_s2 }
   0x2   :  { %8304 = sst [smem:[#allocation77_spill]] %s8243_s3 }
   0x3   :  { %8305 = sst [smem:[#allocation78_spill]] %s8244_s4 }
   0x4   :  { %8306 = sst [smem:[#allocation79_spill]] %s8245_s5 }
   0x5   :  { %8307 = sst [smem:[#allocation80_spill]] %s8246_s6 }
   0x6   :  { %12 = vsyncpa [#allocation3], 0 }
   0x7   :  { %14 = vsyncpa [#allocation3 + $0x1], 0 }
   0x8   :  { %15 = vsyncpa [#allocation6], 0 }
   0x9   :  { %17 = vsyncpa [#allocation6 + $0x1], 0 }
   0xa   :  { %18 = vsyncpa [#allocation9], 0 }
   0xb   :  { %19 = vsyncpa [#allocation12], 0 }
   0xc   :  { %20 = vsyncpa [#allocation4], 0 }
   0xd   :  { %22 = vsyncpa [#allocation4 + $0x1], 0  ;;  %s4760_s24 = smov 0   ;;  %s4762_s25 = smov 0  }
   0xe   :  { %s4764_s26 = smov 0   ;;  %s4766_s27 = smov 0  }
   0xf LB: > { %8308 = sst [smem:[#allocation21_spill]] %s4702_s26  ;;  %s4784_s8 = sadd.s32 4294967295, %s4706_s27   ;;  %s4706_s27 = sphi %s4766_s27, %s8589_s27   ;;  %s4702_s26 = sphi %s4764_s26, %s8591_s26   ;;  %s4698_s25 = sphi %s4762_s25, %s8593_s25   ;;  %s4694_s24 = sphi %s4760_s24, %s8592_s24  }
  0x10   : > { %s8309_s2 = sld [smem:[#allocation76_spill]]  ;;  %p3928_p0 = scmp.ge.s32.totalorder %s4706_s27, 1 }
  0x11   : > { %p49_p1 = scmp.eq.s32.totalorder %s4784_s8, 0  ;;  %p216_p2 = scmp.lt.s32.totalorder %s4706_s27, 3 }
  0x12   : > { %s4708_s10 = smov [#allocation7]   ;;  %s8311_s3 = sld [smem:[#allocation77_spill]] }
  0x13   : > { %p4789_p3 = pnand %p3928_p0, %p216_p2  ;;  %s229_s11 = sshll.u32 %s4708_s10, 4  ;;  %s230_s11 = int_to_ptr.vmem [resolvable:$true] %s229_s11 }
  0x14   : > { %s8313_s5 = sld [smem:[#allocation79_spill]]  ;;  %s4709_s19 = smov [#allocation8]  }
  0x15   : > { %p4032_p4 = pneg %p4789_p3  ;;  %s243_s20 = sshll.u32 %s4709_s19, 4  ;;  %s244_s20 = int_to_ptr.vmem [resolvable:$true] %s243_s20 }
  0x16   : > { %s227_s30 = sshll.u32 %s8309_s2, 4  ;;  %s4710_s21 = smov 256   ;;  %s228_s30 = int_to_ptr.hbm [resolvable:$true] %s227_s30 }
  0x17   : > { %p4801_p6 = pnand %p4032_p4, %p49_p1  ;;  %s4711_s22 = smov 16  }
  0x18   : > { %s241_s14 = sshll.u32 %s8311_s3, 4  ;;  %s4712_s23 = smov [#allocation11]   ;;  %s242_s14 = int_to_ptr.hbm [resolvable:$true] %s241_s14 }
  0x19   : > { %4035 = dma.hbm_to_vmem [thread:$0]  (!%p4801_p6), %s228_s30, 4096, %s230_s11, [#allocation6], %s4710_s21, %s4710_s21, %s4711_s22  }
  0x1a   : > { %s269_s18 = sshll.u32 %s8313_s5, 4  ;;  %s271_s28 = sshll.u32 %s4712_s23, 4  ;;  %s270_s18 = int_to_ptr.hbm [resolvable:$true] %s269_s18  ;;  %s272_s28 = int_to_ptr.vmem [resolvable:$true] %s271_s28 }
  0x1b   : > { %4038 = dma.hbm_to_vmem [thread:$0]  (!%p4801_p6), %s242_s14, 4096, %s244_s20, [#allocation9], %s4710_s21, %s4710_s21, %s4711_s22  }
  0x1c   : > { %s8314_s4 = sld [smem:[#allocation78_spill]]  ;;  %s8248_s13 = smov 128  }
  0x1d   : > { %s8250_s16 = smov 8   ;;  %s4715_s30 = smov [#allocation10]  }
  0x1e   : > { %4044 = dma.hbm_to_vmem [thread:$0]  (!%p4801_p6), %s270_s18, 2048, %s272_s28, [#allocation12], %s8248_s13, %s8248_s13, %s8250_s16  }
  0x1f   : > { %s257_s11 = sshll.u32 %s4715_s30, 4  ;;  %s8315_s6 = sld [smem:[#allocation80_spill]]  ;;  %s258_s11 = int_to_ptr.vmem [resolvable:$true] %s257_s11 }
  0x20   : > { %s4716_s18 = smov [#allocation13]   ;;  %s3927_s23 = sadd.s32 4294967294, %s4706_s27  }
  0x21   : > { %s285_s20 = sshll.u32 %s4716_s18, 4  ;;  %s4829_s28 = sadd.s32 1, %s4706_s27   ;;  %s286_s20 = int_to_ptr.vmem [resolvable:$true] %s285_s20 }
  0x22   : > { %s255_s12 = sshll.u32 %s8314_s4, 4  ;;  %8316 = sst [smem:[#allocation22_spill]] %s4829_s28  ;;  %s256_s12 = int_to_ptr.hbm [resolvable:$true] %s255_s12 }
  0x23   : > { %4041 = dma.hbm_to_vmem [thread:$0]  (!%p4801_p6), %s256_s12, 4096, %s258_s11, [#allocation9], %s4710_s21, %s4710_s21, %s4711_s22  }
  0x24   : > { %s35_s29 = sadd.s32 1, %s4702_s26  ;;  %s32_s10 = ssub.s32 %s4706_s27, %s4829_s28 }
  0x25   : > { %s283_s19 = sshll.u32 %s8315_s6, 4  ;;  %p42_p7 = scmp.ne.s32.totalorder %s4702_s26, %s4698_s25  ;;  %s284_s19 = int_to_ptr.hbm [resolvable:$true] %s283_s19 }
  0x26   : > { %4047 = dma.hbm_to_vmem [thread:$0]  (!%p4801_p6), %s284_s19, 512, %s286_s20, [#allocation12], %s4710_s21, %s4710_s21, %s4711_s22  }
  0x27   : > { %p33_p8 = scmp.eq.s32.totalorder %s32_s10, 0  ;;  %p43_p9 = scmp.eq.s32.totalorder %s4706_s27, 0 }
  0x28   : > { %p48_p10 = scmp.ne.s32.totalorder %s4698_s25, %s4694_s24  ;;  %p203_p11 = scmp.eq.s32.totalorder %s4784_s8, 1 }
  0x29   : > { %s4841_s12 = scalar_select %p33_p8, %s4702_s26, %s35_s29  }
  0x2a   : > { %p4843_p12 = por %p43_p9, %p42_p7  ;;  %p4849_p13 = por %p49_p1, %p48_p10 }
  0x2b   : > { %8317 = sst [smem:[#allocation23_spill]] %s4841_s12  ;;  %p4853_p0 = por %p203_p11, %p42_p7 }
  0x2c   : > { %p209_p2 = scmp.eq.s32.totalorder %s3927_s23, 1  ;;  %p4064_p4 = scmp.lt.s32.totalorder %s4706_s27, 2 }
  0x2d   : > { %s4859_s22 = sand.u32 1, %s4702_s26   ;;  %s3985_s17 = sshll.u32 %s4706_s27, 4 }
  0x2e   : > { %p4861_p6 = por %p209_p2, %p48_p10  ;;  %s3935_s14 = sshll.u32 %s4859_s22, 4 }
  0x2f   : > { %s308_s20 = scalar_lea.hbm %s8240_s0, %s3985_s17  ;;  %s303_s10 = scalar_lea.vmem [#allocation2], %s3935_s14 }
  0x30   : > { %s309_s29 = sshll.u32 %s308_s20, 4  ;;  %s311_s13 = sshll.u32 %s303_s10, 4  ;;  %s310_s29 = int_to_ptr.hbm [resolvable:$true] %s309_s29  ;;  %s312_s13 = int_to_ptr.vmem [resolvable:$true] %s311_s13 }
  0x31   : > { %p4872_p7 = pnand %p4064_p4, %p4843_p12  ;;  %s321_s16 = sand.u32 1, %s4706_s27  }
  0x32   : > { %s4004_s2 = smul.u32 144, %s4859_s22  ;;  %s300_s4 = scalar_lea.sflag [#allocation3], %s4859_s22 }
  0x33   : > { %s3986_s3 = smul.u32 144, %s4706_s27  ;;  %s4564_s5 = sshra.s32 %s310_s29, 4  ;;  %s4565_s5 = int_to_ptr.hbm [resolvable:$true] %s4564_s5 }
  0x34   : > { %s4566_s19 = scalar_lea.hbm %s4565_s5, 16  ;;  %p4568_p9 = pneg %p4872_p7 }
  0x35   : > { %p4567_p8 = scmp.ne.s32.totalorder %s4565_s5, %s4566_s19  ;;  %s4571_s17 = scalar_lea.hbm %s8240_s0, 32 }
  0x36   : > { %p4572_p12 = scmp.lt.s32.totalorder %s4565_s5, %s8240_s0  ;;  %p4573_p2 = scmp.lt.s32.totalorder %s4571_s17, %s4566_s19 }
  0x37   : > { %p4569_p10 = pnand %p4568_p9, %p4567_p8 }
  0x38   : > { %p4574_p4 = por %p4573_p2, %p4572_p12 }
  0x39   : > { %p4570_p11 = pneg %p4569_p10 }
  0x3b   : > { %p4575_p5 = pnand %p4574_p4, %p4570_p11 }
  0x3d   : > { %4578 = shalt.err (!%p4575_p5)
}
  0x3e   : > { %s8323_s22 = smov 8   ;;  %s8324_s10 = smov 128  }
  0x3f   : > { %4051 = dma.hbm_to_vmem [thread:$0]  (!%p4872_p7), %s310_s29, 256, %s312_s13, %s300_s4, %s8324_s10, %s8324_s10, %s8323_s22  }
  0x40   : > { %s330_s30 = scalar_lea.hbm %s8241_s1, %s3986_s3  ;;  %s325_s26 = scalar_lea.vmem [#allocation5], %s4004_s2 }
  0x41   : > { %s331_s14 = sshll.u32 %s330_s30, 4  ;;  %s333_s28 = sshll.u32 %s325_s26, 4  ;;  %s332_s14 = int_to_ptr.hbm [resolvable:$true] %s331_s14  ;;  %s334_s28 = int_to_ptr.vmem [resolvable:$true] %s333_s28 }
  0x42   : > { %s322_s5 = scalar_lea.sflag [#allocation6], %s321_s16  ;;  %s4594_s19 = sshra.s32 %s332_s14, 4  ;;  %s4595_s19 = int_to_ptr.hbm [resolvable:$true] %s4594_s19 }
  0x43   : > { %s4596_s17 = scalar_lea.hbm %s4595_s19, 144  ;;  %s4601_s13 = scalar_lea.hbm %s8241_s1, 288 }
  0x44   : > { %p4597_p5 = scmp.ne.s32.totalorder %s4595_s19, %s4596_s17  ;;  %p4602_p11 = scmp.lt.s32.totalorder %s4595_s19, %s8241_s1 }
  0x45   : > { %p4603_p12 = scmp.lt.s32.totalorder %s4601_s13, %s4596_s17 }
  0x46   : > { %p4599_p8 = pnand %p4597_p5, %p4568_p9 }
  0x47   : > { %p4604_p2 = por %p4603_p12, %p4602_p11 }
  0x48   : > { %p4600_p10 = pneg %p4599_p8 }
  0x4a   : > { %p4605_p4 = pnand %p4604_p2, %p4600_p10 }
  0x4c   : > { %4608 = shalt.err (!%p4605_p4)
}
  0x4d   : > { %4054 = dma.hbm_to_vmem [thread:$0]  (!%p4872_p7), %s332_s14, 2304, %s334_s28, %s322_s5, %s8324_s10, %s8324_s10, %s8323_s22  }
  0x4e   : > { %345 = sbr.rel (%p4789_p3) target bundleno = 1801 (0x709), region = 48 }
  0x53   : > { %s4916_s2 = sand.u32 1, %s4698_s25  }
  0x54   : > { %s3940_s26 = sshll.u32 %s4916_s2, 4  ;;  %s348_s16 = scalar_lea.sflag [#allocation3], %s4916_s2 }
  0x55   : > { %s4920_s12 = scalar_lea.vmem [#allocation2], %s3940_s26 }
  0x56   : > { %4669 = dma.done.wait (%p4849_p13), %s348_s16, 256  }
  0x57   : > { %4671 = vsyncadd (%p4849_p13), %s348_s16, 4294967040  ;;  %s357_s9 = sand.u32 1, %s4784_s8   ;;  %s4005_s28 = smul.u32 144, %s4916_s2 }
  0x58   : > { %s358_s29 = scalar_lea.sflag [#allocation6], %s357_s9 }
  0x59   : > { %s4930_s23 = scalar_lea.vmem [#allocation5], %s4005_s28 }
  0x5a   : > { %4673 = dma.done.wait (%p4849_p13), %s358_s29, 2304  }
  0x5b   : > { %4675 = vsyncadd (%p4849_p13), %s358_s29, 4294964992 }
  0x5c   : > { %4677 = dma.done.wait (%p49_p1), [#allocation6], 4096  }
  0x5d   : > { %4679 = vsyncadd (%p49_p1), [#allocation6], 4294963200 }
  0x5e   : > { %4681 = dma.done.wait (%p49_p1), [#allocation9], 8192  }
  0x5f   : > { %4683 = vsyncadd (%p49_p1), [#allocation9], 4294959104 }
  0x60   : > { %4685 = dma.done.wait (%p49_p1), [#allocation12], 2560  }
  0x61   : > { %4687 = vsyncadd (%p49_p1), [#allocation12], 4294964736  ;;  %v484_v0 = vld [vmem:[#allocation7 + $0xf0] sm:$0xff]  ;;  %v485_v1 = vld [vmem:[#allocation7 + $0xf8] sm:$0xff]  ;;  %vm675_vm3 = vcmask 130048   ;;  %s8096_s15 = scalar_lea.vmem [#allocation14], %s4005_s28 }
  0x62   : > { %v482_v2 = vld [vmem:[#allocation7 + $0xe0] sm:$0xff]  ;;  %488 = vmatpush.msra.mxu0 %v484_v0  ;;  %511 = vmatpush.msra.mxu1 %v485_v1  ;;  %v483_v3 = vld [vmem:[#allocation7 + $0xe8] sm:$0xff]  ;;  %v480_v4 = vld [vmem:[#allocation7 + $0xd0] sm:$0xff]  ;;  %s3987_s20 = smul.u32 144, %s4784_s8  ;;  %s3781_s8 = sshll.u32 %s8096_s15, 4  ;;  %s3782_s8 = int_to_ptr.vmem [resolvable:$true] %s3781_s8 }
  0x63   : > { %v481_v5 = vld [vmem:[#allocation7 + $0xd8] sm:$0xff]  ;;  %v478_v6 = vld [vmem:[#allocation7 + $0xc0] sm:$0xff]  ;;  %v479_v7 = vld [vmem:[#allocation7 + $0xc8] sm:$0xff]  ;;  %s3769_s5 = scalar_lea.sflag [#allocation4], %s4916_s2  ;;  %s4644_s13 = scalar_lea.hbm %s8247_s7, 288 }
  0x64   : > { %489 = vmatpush.msra.mxu0 %v482_v2  ;;  %512 = vmatpush.msra.mxu1 %v483_v3  ;;  %v476_v8 = vld [vmem:[#allocation7 + $0xb0] sm:$0xff]  ;;  %v477_v9 = vld [vmem:[#allocation7 + $0xb8] sm:$0xff]  ;;  %v474_v10 = vld [vmem:[#allocation7 + $0xa0] sm:$0xff]  ;;  %s3780_s30 = scalar_lea.hbm %s8247_s7, %s3987_s20 }
  0x65   : > { %v475_v11 = vld [vmem:[#allocation7 + $0xa8] sm:$0xff]  ;;  %v472_v12 = vld [vmem:[#allocation7 + $0x90] sm:$0xff]  ;;  %v473_v13 = vld [vmem:[#allocation7 + $0x98] sm:$0xff]  ;;  %s3783_s14 = sshll.u32 %s3780_s30, 4  ;;  %s3784_s14 = int_to_ptr.hbm [resolvable:$true] %s3783_s14 }
  0x66   : > { %490 = vmatpush.msra.mxu0 %v480_v4  ;;  %513 = vmatpush.msra.mxu1 %v481_v5  ;;  %v470_v14 = vld [vmem:[#allocation7 + $0x80] sm:$0xff]  ;;  %v471_v15 = vld [vmem:[#allocation7 + $0x88] sm:$0xff]  ;;  %v468_v16 = vld [vmem:[#allocation7 + $0x70] sm:$0xff]  ;;  %s4638_s19 = sshra.s32 %s3784_s14, 4  ;;  %s4639_s19 = int_to_ptr.hbm [resolvable:$true] %s4638_s19 }
  0x67   : > { %v469_v17 = vld [vmem:[#allocation7 + $0x78] sm:$0xff]  ;;  %v466_v18 = vld [vmem:[#allocation7 + $0x60] sm:$0xff]  ;;  %v467_v19 = vld [vmem:[#allocation7 + $0x68] sm:$0xff]  ;;  %s4640_s17 = scalar_lea.hbm %s4639_s19, 144  ;;  %p4645_p7 = scmp.lt.s32.totalorder %s4639_s19, %s8247_s7 }
  0x68   : > { %491 = vmatpush.msra.mxu0 %v478_v6  ;;  %514 = vmatpush.msra.mxu1 %v479_v7  ;;  %v464_v20 = vld [vmem:[#allocation7 + $0x50] sm:$0xff]  ;;  %v465_v21 = vld [vmem:[#allocation7 + $0x58] sm:$0xff]  ;;  %v462_v22 = vld [vmem:[#allocation7 + $0x40] sm:$0xff]  ;;  %p4641_p1 = scmp.ne.s32.totalorder %s4639_s19, %s4640_s17  ;;  %p4646_p9 = scmp.lt.s32.totalorder %s4644_s13, %s4640_s17 }
  0x69   : > { %v463_v23 = vld [vmem:[#allocation7 + $0x48] sm:$0xff]  ;;  %v460_v24 = vld [vmem:[#allocation7 + $0x30] sm:$0xff]  ;;  %v461_v25 = vld [vmem:[#allocation7 + $0x38] sm:$0xff] }
  0x6a   : > { %492 = vmatpush.msra.mxu0 %v476_v8  ;;  %515 = vmatpush.msra.mxu1 %v477_v9  ;;  %v458_v26 = vld [vmem:[#allocation7 + $0x20] sm:$0xff]  ;;  %v459_v27 = vld [vmem:[#allocation7 + $0x28] sm:$0xff]  ;;  %v456_v28 = vld [vmem:[#allocation7 + $0x10] sm:$0xff]  ;;  %p4642_p3 = pnand %p4641_p1, %p4853_p0  ;;  %p4647_p5 = por %p4646_p9, %p4645_p7 }
  0x6b   : > { %v457_v29 = vld [vmem:[#allocation7 + $0x18] sm:$0xff]  ;;  %v454_v30 = vld [vmem:[#allocation7] sm:$0xff]  ;;  %v455_v31 = vld [vmem:[#allocation7 + $0x8] sm:$0xff] }
  0x6c   : > { %493 = vmatpush.msra.mxu0 %v474_v10  ;;  %516 = vmatpush.msra.mxu1 %v475_v11  ;;  %v434_v32 = vld [vmem:[%s4920_s12] sm:$0xff]  ;;  %v435_v37 = vld [vmem:[%s4920_s12 + $0x8] sm:$0xff]  ;;  %v4951_v50 = vld [vmem:[%s4930_s23 + $0x50] sm:$0xff]  ;;  %p4643_p13 = pneg %p4642_p3 }
  0x6d   : > { %v902_v33 = vld [vmem:[#allocation8 + $0xf0] sm:$0xff]  ;;  %v900_v34 = vld [vmem:[#allocation8 + $0xe0] sm:$0xff]  ;;  %v903_v51 = vld [vmem:[#allocation8 + $0xf8] sm:$0xff] }
  0x6e   : > { %494 = vmatpush.msra.mxu0 %v472_v12  ;;  %517 = vmatpush.msra.mxu1 %v473_v13  ;;  %v898_v35 = vld [vmem:[#allocation8 + $0xd0] sm:$0xff]  ;;  %v896_v36 = vld [vmem:[#allocation8 + $0xc0] sm:$0xff]  ;;  %v901_v52 = vld [vmem:[#allocation8 + $0xe8] sm:$0xff]  ;;  %v430_v13 = vlaneseq  ;;  %p4648_p8 = pnand %p4647_p5, %p4643_p13 }
  0x6f   : > { %v894_v38 = vld [vmem:[#allocation8 + $0xb0] sm:$0xff]  ;;  %v892_v39 = vld [vmem:[#allocation8 + $0xa0] sm:$0xff]  ;;  %v899_v53 = vld [vmem:[#allocation8 + $0xd8] sm:$0xff] }
  0x70   : > { %495 = vmatpush.msra.mxu0 %v470_v14  ;;  %518 = vmatpush.msra.mxu1 %v471_v15  ;;  %v890_v40 = vld [vmem:[#allocation8 + $0x90] sm:$0xff]  ;;  %v888_v41 = vld [vmem:[#allocation8 + $0x80] sm:$0xff]  ;;  %v897_v54 = vld [vmem:[#allocation8 + $0xc8] sm:$0xff]  ;;  %v4985_v14 = vand.u32 127, %v430_v13 }
  0x71   : > { %v886_v42 = vld [vmem:[#allocation8 + $0x70] sm:$0xff]  ;;  %v884_v43 = vld [vmem:[#allocation8 + $0x60] sm:$0xff]  ;;  %v4955_v55 = vld [vmem:[%s4930_s23 + $0x58] sm:$0xff] }
  0x72   : > { %496 = vmatpush.msra.mxu0 %v468_v16  ;;  %519 = vmatpush.msra.mxu1 %v469_v17  ;;  %v882_v44 = vld [vmem:[#allocation8 + $0x50] sm:$0xff]  ;;  %v880_v45 = vld [vmem:[#allocation8 + $0x40] sm:$0xff]  ;;  %v895_v56 = vld [vmem:[#allocation8 + $0xb8] sm:$0xff]  ;;  %v4988_v15 = vmul.u32 9, %v4985_v14 }
  0x73   : > { %v878_v46 = vld [vmem:[#allocation8 + $0x30] sm:$0xff]  ;;  %v876_v47 = vld [vmem:[#allocation8 + $0x20] sm:$0xff]  ;;  %v893_v57 = vld [vmem:[#allocation8 + $0xa8] sm:$0xff] }
  0x74   : > { %497 = vmatpush.msra.mxu0 %v466_v18  ;;  %520 = vmatpush.msra.mxu1 %v467_v19  ;;  %v874_v48 = vld [vmem:[#allocation8 + $0x10] sm:$0xff]  ;;  %v872_v49 = vld [vmem:[#allocation8] sm:$0xff]  ;;  %v891_v58 = vld [vmem:[#allocation8 + $0x98] sm:$0xff]  ;;  %v4990_v18 = vshrl.u32 %v430_v13, 7  ;;  %v4993_v19 = vadd.s32 9, %v4988_v15 }
  0x75   : > { %v889_v59 = vld [vmem:[#allocation8 + $0x88] sm:$0xff]  ;;  %v4959_v60 = vld [vmem:[%s4930_s23 + $0x60] sm:$0xff]  ;;  %v887_v61 = vld [vmem:[#allocation8 + $0x78] sm:$0xff] }
  0x76   : > { %498 = vmatpush.msra.mxu0 %v464_v20  ;;  %521 = vmatpush.msra.mxu1 %v465_v21  ;;  %v885_v62 = vld [vmem:[#allocation8 + $0x68] sm:$0xff]  ;;  %v883_v63 = vld [vmem:[#allocation8 + $0x58] sm:$0xff]  ;;  %v436_v4 = vld [vmem:[%s4930_s23] sm:$0xff]  ;;  %vm602_vm0 = vcmp.ge.s32.totalorder %v4990_v18, %v4988_v15  ;;  %vm621_vm1 = vcmp.lt.s32.totalorder %v4990_v18, %v4993_v19 }
  0x77   : > { %v881_v0 = vld [vmem:[#allocation8 + $0x48] sm:$0xff]  ;;  %v879_v2 = vld [vmem:[#allocation8 + $0x38] sm:$0xff]  ;;  %v4968_v7 = vld [vmem:[%s4930_s23 + $0x70] sm:$0xff] }
  0x78   : > { %499 = vmatpush.msra.mxu0 %v462_v22  ;;  %522 = vmatpush.msra.mxu1 %v463_v23  ;;  %v4963_v1 = vld [vmem:[%s4930_s23 + $0x68] sm:$0xff]  ;;  %v4973_v9 = vld [vmem:[%s4930_s23 + $0x78] sm:$0xff]  ;;  %v438_v10 = vld [vmem:[%s4930_s23 + $0x10] sm:$0xff] }
  0x79   : > { %v877_v3 = vld [vmem:[#allocation8 + $0x28] sm:$0xff]  ;;  %v875_v5 = vld [vmem:[#allocation8 + $0x18] sm:$0xff]  ;;  %v4978_v11 = vld [vmem:[%s4930_s23 + $0x80] sm:$0xff] }
  0x7a   : > { %500 = vmatpush.msra.mxu0 %v460_v24  ;;  %523 = vmatpush.msra.mxu1 %v461_v25  ;;  %v873_v6 = vld [vmem:[#allocation8 + $0x8] sm:$0xff]  ;;  %v4995_v20 = vld [vmem:[#allocation13] sm:$0xff]  ;;  %vm639_vm2 = vmand %vm602_vm0, %vm621_vm1 }
  0x7b   : > { %v437_v8 = vld [vmem:[%s4930_s23 + $0x8] sm:$0xff]  ;;  %v486_v22 = vperm.slane %v4995_v20, 0 }
  0x7c   : > { %501 = vmatpush.msra.mxu0 %v458_v26  ;;  %524 = vmatpush.msra.mxu1 %v459_v27  ;;  %v4982_v12 = vld [vmem:[%s4930_s23 + $0x88] sm:$0xff] }
  0x7d   : > { %v4997_v21 = vld [vmem:[#allocation13 + $0x8] sm:$0xff] }
  0x7e   : > { %502 = vmatpush.msra.mxu0 %v456_v28  ;;  %525 = vmatpush.msra.mxu1 %v457_v29  ;;  %v487_v23 = vperm.slane %v4997_v21, 0  ;;  %v584_v29 = vadd.s32 8, %v4990_v18  ;;  %v5122_v13 = vperm.slane %v4997_v21, 1 }
  0x80   : > { %503 = vmatpush.msra.mxu0 %v454_v30  ;;  %526 = vmatpush.msra.mxu1 %v455_v31  ;;  %v4717_v30 = vmov 0.0   ;;  %vm603_vm4 = vcmp.ge.s32.totalorder %v584_v29, %v4988_v15  ;;  %vm622_vm5 = vcmp.lt.s32.totalorder %v584_v29, %v4993_v19  ;;  %v1086_v29 = vld [vmem:[#allocation10 + $0xa0] sm:$0xff] }
  0x81   : > { %504 = vmatmul.f32.vlgmr.msra.gmra.mxu0 %v434_v32  ;;  %527 = vmatmul.f32.vlgmr.msra.gmra.mxu1 %v434_v32  ;;  %v5010_v31 = vsel %vm639_vm2, 1.0, %v4717_v30  ;;  %vm640_vm6 = vmand %vm603_vm4, %vm622_vm5 }
  0x82   : > { %3988 = vmatpush.msrb.mxu1 %v902_v33  ;;  %906 = vmatpush.msrb.mxu0 %v902_v33  ;;  %v585_v33 = vadd.s32 16, %v4990_v18 }
  0x84   : > { %3989 = vmatpush.msrb.mxu1 %v900_v34  ;;  %907 = vmatpush.msrb.mxu0 %v900_v34  ;;  %v439_v34 = vld [vmem:[%s4930_s23 + $0x18] sm:$0xff]  ;;  %vm604_vm7 = vcmp.ge.s32.totalorder %v585_v33, %v4988_v15  ;;  %vm623_vm8 = vcmp.lt.s32.totalorder %v585_v33, %v4993_v19  ;;  %v1084_v33 = vld [vmem:[#allocation10 + $0x90] sm:$0xff] }
  0x85   : > { %vm641_vm9 = vmand %vm604_vm7, %vm623_vm8 }
  0x86   : > { %3990 = vmatpush.msrb.mxu1 %v898_v35  ;;  %908 = vmatpush.msrb.mxu0 %v898_v35  ;;  %v5022_v35 = vsel %vm640_vm6, 1.0, %v4717_v30 }
  0x88   : > { %3991 = vmatpush.msrb.mxu1 %v896_v36  ;;  %909 = vmatpush.msrb.mxu0 %v896_v36  ;;  %v586_v36 = vadd.s32 24, %v4990_v18 }
  0x89   : > { %507 = vmatmul.f32.gmra.mxu0 %v435_v37  ;;  %530 = vmatmul.f32.gmra.mxu1 %v435_v37  ;;  %v440_v37 = vld [vmem:[%s4930_s23 + $0x20] sm:$0xff] }
  0x8a   : > { %3992 = vmatpush.msrb.mxu1 %v894_v38  ;;  %910 = vmatpush.msrb.mxu0 %v894_v38  ;;  %v5031_v38 = vsel %vm641_vm9, 1.0, %v4717_v30  ;;  %vm605_vm10 = vcmp.ge.s32.totalorder %v586_v36, %v4988_v15  ;;  %vm624_vm11 = vcmp.lt.s32.totalorder %v586_v36, %v4993_v19  ;;  %v1080_v36 = vld [vmem:[#allocation10 + $0x70] sm:$0xff] }
  0x8b   : > { %vm642_vm12 = vmand %vm605_vm10, %vm624_vm11 }
  0x8c   : > { %3993 = vmatpush.msrb.mxu1 %v892_v39  ;;  %911 = vmatpush.msrb.mxu0 %v892_v39 }
  0x8e   : > { %3994 = vmatpush.msrb.mxu1 %v890_v40  ;;  %912 = vmatpush.msrb.mxu0 %v890_v40  ;;  %v587_v40 = vadd.s32 32, %v4990_v18 }
  0x90   : > { %3995 = vmatpush.msrb.mxu1 %v888_v41  ;;  %913 = vmatpush.msrb.mxu0 %v888_v41  ;;  %v441_v41 = vld [vmem:[%s4930_s23 + $0x28] sm:$0xff]  ;;  %vm606_vm13 = vcmp.ge.s32.totalorder %v587_v40, %v4988_v15  ;;  %vm625_vm14 = vcmp.lt.s32.totalorder %v587_v40, %v4993_v19 }
  0x91   : > { %vm643_vm15 = vmand %vm606_vm13, %vm625_vm14 }
  0x92   : > { %3996 = vmatpush.msrb.mxu1 %v886_v42  ;;  %914 = vmatpush.msrb.mxu0 %v886_v42  ;;  %v5042_v42 = vsel %vm642_vm12, 1.0, %v4717_v30 }
  0x94   : > { %3997 = vmatpush.msrb.mxu1 %v884_v43  ;;  %915 = vmatpush.msrb.mxu0 %v884_v43 }
  0x96   : > { %3998 = vmatpush.msrb.mxu1 %v882_v44  ;;  %916 = vmatpush.msrb.mxu0 %v882_v44  ;;  %v588_v44 = vadd.s32 40, %v4990_v18 }
  0x98   : > { %3999 = vmatpush.msrb.mxu1 %v880_v45  ;;  %917 = vmatpush.msrb.mxu0 %v880_v45  ;;  %v442_v45 = vld [vmem:[%s4930_s23 + $0x30] sm:$0xff]  ;;  %vm607_vm0 = vcmp.ge.s32.totalorder %v588_v44, %v4988_v15  ;;  %vm626_vm1 = vcmp.lt.s32.totalorder %v588_v44, %v4993_v19 }
  0x99   : > { %vm644_vm2 = vmand %vm607_vm0, %vm626_vm1  ;;  %v1078_v44 = vld [vmem:[#allocation10 + $0x60] sm:$0xff] }
  0x9a   : > { %4000 = vmatpush.msrb.mxu1 %v878_v46  ;;  %918 = vmatpush.msrb.mxu0 %v878_v46  ;;  %v5053_v46 = vsel %vm643_vm15, 1.0, %v4717_v30 }
  0x9c   : > { %4001 = vmatpush.msrb.mxu1 %v876_v47  ;;  %919 = vmatpush.msrb.mxu0 %v876_v47 }
  0x9e   : > { %4002 = vmatpush.msrb.mxu1 %v874_v48  ;;  %920 = vmatpush.msrb.mxu0 %v874_v48  ;;  %v589_v48 = vadd.s32 48, %v4990_v18 }
  0xa0   : > { %4003 = vmatpush.msrb.mxu1 %v872_v49  ;;  %921 = vmatpush.msrb.mxu0 %v872_v49  ;;  %v443_v49 = vld [vmem:[%s4930_s23 + $0x38] sm:$0xff]  ;;  %vm608_vm4 = vcmp.ge.s32.totalorder %v589_v48, %v4988_v15  ;;  %vm627_vm5 = vcmp.lt.s32.totalorder %v589_v48, %v4993_v19  ;;  %v1074_v48 = vld [vmem:[#allocation10 + $0x40] sm:$0xff] }
  0xa1   : > { %952 = vmatmul.f32.vlgmr.msrb.gmra.mxu1 %v4951_v50  ;;  %922 = vmatmul.f32.vlgmr.msrb.gmra.mxu0 %v436_v4  ;;  %vm645_vm6 = vmand %vm608_vm4, %vm627_vm5 }
  0xa2   : > { %977 = vmatpush.msra.mxu1 %v903_v51  ;;  %v5064_v51 = vsel %vm644_vm2, 1.0, %v4717_v30 }
  0xa4   : > { %978 = vmatpush.msra.mxu1 %v901_v52 }
  0xa6   : > { %979 = vmatpush.msra.mxu1 %v899_v53  ;;  %v590_v53 = vadd.s32 56, %v4990_v18 }
  0xa8   : > { %980 = vmatpush.msra.mxu1 %v897_v54  ;;  %v444_v54 = vld [vmem:[%s4930_s23 + $0x40] sm:$0xff]  ;;  %vm609_vm7 = vcmp.ge.s32.totalorder %v590_v53, %v4988_v15  ;;  %vm628_vm8 = vcmp.lt.s32.totalorder %v590_v53, %v4993_v19  ;;  %v598_v53 = vadd.s32 120, %v4990_v18 }
  0xa9   : > { %955 = vmatmul.f32.gmra.mxu1 %v4955_v55  ;;  %925 = vmatmul.f32.gmra.mxu0 %v437_v8  ;;  %vm646_vm9 = vmand %vm609_vm7, %vm628_vm8 }
  0xaa   : > { %981 = vmatpush.msra.mxu1 %v895_v56  ;;  %v5075_v56 = vsel %vm645_vm6, 1.0, %v4717_v30 }
  0xac   : > { %982 = vmatpush.msra.mxu1 %v893_v57 }
  0xae   : > { %983 = vmatpush.msra.mxu1 %v891_v58  ;;  %v591_v58 = vadd.s32 64, %v4990_v18 }
  0xb0   : > { %984 = vmatpush.msra.mxu1 %v889_v59  ;;  %v5085_v59 = vsel %vm646_vm9, 1.0, %v4717_v30  ;;  %vm610_vm10 = vcmp.ge.s32.totalorder %v591_v58, %v4988_v15  ;;  %vm629_vm11 = vcmp.lt.s32.totalorder %v591_v58, %v4993_v19  ;;  %v1068_v58 = vld [vmem:[#allocation10 + $0x10] sm:$0xff] }
  0xb1   : > { %958 = vmatmul.f32.gmra.mxu1 %v4959_v60  ;;  %928 = vmatmul.f32.gmra.mxu0 %v438_v10  ;;  %vm647_vm12 = vmand %vm610_vm10, %vm629_vm11 }
  0xb2   : > { %985 = vmatpush.msra.mxu1 %v887_v61  ;;  %v445_v61 = vld [vmem:[%s4930_s23 + $0x48] sm:$0xff] }
  0xb4   : > { %986 = vmatpush.msra.mxu1 %v885_v62 }
  0xb6   : > { %987 = vmatpush.msra.mxu1 %v883_v63  ;;  %v592_v63 = vadd.s32 72, %v4990_v18 }
  0xb8   : > { %988 = vmatpush.msra.mxu1 %v881_v0  ;;  %v5096_v0 = vsel %vm647_vm12, 1.0, %v4717_v30  ;;  %vm611_vm13 = vcmp.ge.s32.totalorder %v592_v63, %v4988_v15  ;;  %vm630_vm14 = vcmp.lt.s32.totalorder %v592_v63, %v4993_v19 }
  0xb9   : > { %961 = vmatmul.f32.gmra.mxu1 %v4963_v1  ;;  %931 = vmatmul.f32.gmra.mxu0 %v439_v34  ;;  %vm648_vm15 = vmand %vm611_vm13, %vm630_vm14 }
  0xba   : > { %989 = vmatpush.msra.mxu1 %v879_v2  ;;  %v1096_v2 = vld [vmem:[#allocation10 + $0xf0] sm:$0xff] }
  0xbc   : > { %990 = vmatpush.msra.mxu1 %v877_v3 }
  0xbe   : > { %991 = vmatpush.msra.mxu1 %v875_v5  ;;  %v5107_v5 = vsel %vm648_vm15, 1.0, %v4717_v30 }
  0xc0   : > { %992 = vmatpush.msra.mxu1 %v873_v6  ;;  %v1094_v6 = vld [vmem:[#allocation10 + $0xe0] sm:$0xff] }
  0xc1   : > { %964 = vmatmul.f32.gmra.mxu1 %v4968_v7  ;;  %934 = vmatmul.f32.gmra.mxu0 %v440_v37 }
  0xc9   : > { %967 = vmatmul.f32.gmra.mxu1 %v4973_v9  ;;  %937 = vmatmul.f32.gmra.mxu0 %v441_v41 }
  0xd1   : > { %970 = vmatmul.f32.gmra.mxu1 %v4978_v11  ;;  %940 = vmatmul.f32.gmra.mxu0 %v442_v45 }
  0xd9   : > { %973 = vmatmul.f32.gmra.mxu1 %v4982_v12  ;;  %943 = vmatmul.f32.gmra.mxu0 %v443_v49 }
  0xe1   : > { %993 = vmatmul.f32.vlgmr.msra.gmra.mxu1 %v436_v4  ;;  %946 = vmatmul.f32.gmra.mxu0 %v444_v54  ;;  %v593_v4 = vadd.s32 80, %v4990_v18 }
  0xe3   : > { %vm612_vm0 = vcmp.ge.s32.totalorder %v593_v4, %v4988_v15  ;;  %vm631_vm1 = vcmp.lt.s32.totalorder %v593_v4, %v4993_v19 }
  0xe4   : > { %vm649_vm2 = vmand %vm612_vm0, %vm631_vm1  ;;  %vm617_vm0 = vcmp.ge.s32.totalorder %v598_v53, %v4988_v15  ;;  %vm636_vm1 = vcmp.lt.s32.totalorder %v598_v53, %v4993_v19 }
  0xe9   : > { %996 = vmatmul.f32.gmra.mxu1 %v437_v8  ;;  %949 = vmatmul.f32.gmra.mxu0 %v445_v61  ;;  %v594_v8 = vadd.s32 88, %v4990_v18 }
  0xeb   : > { %vm613_vm4 = vcmp.ge.s32.totalorder %v594_v8, %v4988_v15  ;;  %vm632_vm5 = vcmp.lt.s32.totalorder %v594_v8, %v4993_v19 }
  0xec   : > { %vm650_vm6 = vmand %vm613_vm4, %vm632_vm5 }
  0xed   : > { %vm654_vm4 = vmand %vm617_vm0, %vm636_vm1 }
  0xf1   : > { %999 = vmatmul.f32.gmra.mxu1 %v438_v10  ;;  %v5118_v10 = vsel %vm649_vm2, 1.0, %v4717_v30  ;;  %vm432_vm2 = vcmp.lt.s32.totalorder %v4985_v14, 32 }
  0xf2   : > { %v5182_v8 = vsel %vm432_vm2, 1.0, %v4717_v30 }
  0xf9   : > { %1002 = vmatmul.f32.gmra.mxu1 %v439_v34  ;;  %v1082_v34 = vld [vmem:[#allocation10 + $0x80] sm:$0xff] }
  0xfe   : > { %v505_v16 = vpop.f32.mrf.mxu0  ;;  %v528_v17 = vpop.f32.mrf.mxu1 }
  0xff   : > { %v506_v28 = vadd.f32 %v505_v16, %v486_v22  ;;  %v5016_v32 = vadd.f32 %v528_v17, %v487_v23  ;;  %v595_v17 = vadd.s32 96, %v4990_v18 }
 0x101   : > { %1005 = vmatmul.f32.gmra.mxu1 %v440_v37  ;;  %vm614_vm7 = vcmp.ge.s32.totalorder %v595_v17, %v4988_v15  ;;  %vm633_vm8 = vcmp.lt.s32.totalorder %v595_v17, %v4993_v19 }
 0x102   : > { %vm651_vm9 = vmand %vm614_vm7, %vm633_vm8 }
 0x106   : > { %v508_v24 = vpop.f32.mrf.mxu0  ;;  %v531_v25 = vpop.f32.mrf.mxu1 }
 0x107   : > { %v5005_v26 = vadd.f32 %v531_v25, %v487_v23  ;;  %v509_v27 = vadd.f32 %v508_v24, %v486_v22  ;;  %v1092_v22 = vld [vmem:[#allocation10 + $0xd0] sm:$0xff]  ;;  %v1090_v23 = vld [vmem:[#allocation10 + $0xc0] sm:$0xff] }
 0x108   : > { %v1088_v24 = vld [vmem:[#allocation10 + $0xb0] sm:$0xff] }
 0x109   : > { %536 = vadd.xlane.f32.xlu0 %v5005_v26  ;;  %744 = vmatpush.msra.mxu2 %v509_v27 }
 0x10a   : > { %1008 = vmatmul.f32.gmra.mxu1 %v441_v41  ;;  %v597_v41 = vadd.s32 112, %v4990_v18 }
 0x10b   : > { %745 = vmatpush.msra.mxu2 %v506_v28  ;;  %v596_v28 = vadd.s32 104, %v4990_v18 }
 0x10c   : > { %3946 = vmatmul.msk.f32.vlgmr.msra.gmra.mxu2 %vm675_vm3, %v5010_v31  ;;  %vm616_vm13 = vcmp.ge.s32.totalorder %v597_v41, %v4988_v15  ;;  %vm635_vm14 = vcmp.lt.s32.totalorder %v597_v41, %v4993_v19 }
 0x10d   : > { %1100 = vmatpush.msrb.mxu2 %v1096_v2  ;;  %vm615_vm10 = vcmp.ge.s32.totalorder %v596_v28, %v4988_v15  ;;  %vm634_vm11 = vcmp.lt.s32.totalorder %v596_v28, %v4993_v19  ;;  %vm653_vm15 = vmand %vm616_vm13, %vm635_vm14 }
 0x10e   : > { %vm652_vm12 = vmand %vm615_vm10, %vm634_vm11 }
 0x10f   : > { %1101 = vmatpush.msrb.mxu2 %v1094_v6  ;;  %v599_v6 = vadd.s32 128, %v4990_v18 }
 0x111   : > { %534 = vadd.xlane.f32.xlu0 %v5016_v32  ;;  %1102 = vmatpush.msrb.mxu2 %v1092_v22  ;;  %vm618_vm5 = vcmp.ge.s32.totalorder %v599_v6, %v4988_v15 }
 0x112   : > { %1011 = vmatmul.f32.gmra.mxu1 %v442_v45  ;;  %v1076_v45 = vld [vmem:[#allocation10 + $0x50] sm:$0xff] }
 0x113   : > { %1103 = vmatpush.msrb.mxu2 %v1090_v23 }
 0x114   : > { %3947 = vmatmul.msk.f32.gmra.mxu2 %vm675_vm3, %v5022_v35 }
 0x115   : > { %1104 = vmatpush.msrb.mxu2 %v1088_v24  ;;  %v600_v24 = vadd.s32 136, %v4990_v18  ;;  %v5210_v18 = vperm.slane %v4995_v20, 1 }
 0x117   : > { %1105 = vmatpush.msrb.mxu2 %v1086_v29  ;;  %vm619_vm8 = vcmp.ge.s32.totalorder %v600_v24, %v4988_v15 }
 0x119   : > { %1106 = vmatpush.msrb.mxu2 %v1084_v33 }
 0x11a   : > { %1014 = vmatmul.f32.gmra.mxu1 %v443_v49  ;;  %v1072_v49 = vld [vmem:[#allocation10 + $0x30] sm:$0xff] }
 0x11b   : > { %1107 = vmatpush.msrb.mxu2 %v1082_v34 }
 0x11c   : > { %3948 = vmatmul.msk.f32.gmra.mxu2 %vm675_vm3, %v5031_v38 }
 0x11d   : > { %1108 = vmatpush.msrb.mxu2 %v1080_v36 }
 0x11e   : > { %v5037_v39 = vpop.f32.mrf.mxu1 }
 0x11f   : > { %1109 = vmatpush.msrb.mxu2 %v1078_v44 }
 0x121   : > { %1110 = vmatpush.msrb.mxu2 %v1076_v45 }
 0x122   : > { %1017 = vmatmul.f32.gmra.mxu1 %v444_v54  ;;  %v1070_v54 = vld [vmem:[#allocation10 + $0x20] sm:$0xff] }
 0x123   : > { %1111 = vmatpush.msrb.mxu2 %v1074_v48 }
 0x124   : > { %3949 = vmatmul.msk.f32.gmra.mxu2 %vm675_vm3, %v5042_v42 }
 0x125   : > { %1112 = vmatpush.msrb.mxu2 %v1072_v49 }
 0x126   : > { %v5048_v43 = vpop.f32.mrf.mxu1 }
 0x127   : > { %1113 = vmatpush.msrb.mxu2 %v1070_v54 }
 0x129   : > { %1114 = vmatpush.msrb.mxu2 %v1068_v58 }
 0x12a   : > { %1020 = vmatmul.f32.gmra.mxu1 %v445_v61  ;;  %v5169_v61 = vsel %vm653_vm15, 1.0, %v4717_v30 }
 0x12c   : > { %3950 = vmatmul.msk.f32.gmra.mxu2 %vm675_vm3, %v5053_v46 }
 0x12e   : > { %v5059_v47 = vpop.f32.mrf.mxu1 }
 0x132   : > { %1023 = vmatmul.f32.gmra.mxu1 %v4951_v50 }
 0x134   : > { %3951 = vmatmul.msk.f32.gmra.mxu2 %vm675_vm3, %v5064_v51 }
 0x136   : > { %v5070_v52 = vpop.f32.mrf.mxu1 }
 0x13a   : > { %1026 = vmatmul.f32.gmra.mxu1 %v4955_v55 }
 0x13c   : > { %3952 = vmatmul.msk.f32.gmra.mxu2 %vm675_vm3, %v5075_v56 }
 0x13e   : > { %v5081_v57 = vpop.f32.mrf.mxu1 }
 0x142   : > { %1029 = vmatmul.f32.gmra.mxu1 %v4959_v60  ;;  %v5134_v60 = vsel %vm650_vm6, 1.0, %v4717_v30  ;;  %vm637_vm6 = vcmp.lt.s32.totalorder %v599_v6, %v4993_v19 }
 0x143   : > { %vm655_vm7 = vmand %vm618_vm5, %vm637_vm6 }
 0x144   : > { %3953 = vmatmul.msk.f32.gmra.mxu2 %vm675_vm3, %v5085_v59 }
 0x146   : > { %v5092_v62 = vpop.f32.mrf.mxu1 }
 0x14a   : > { %1032 = vmatmul.f32.gmra.mxu1 %v4963_v1  ;;  %v5147_v1 = vsel %vm651_vm9, 1.0, %v4717_v30  ;;  %vm638_vm9 = vcmp.lt.s32.totalorder %v600_v24, %v4993_v19 }
 0x14b   : > { %vm656_vm10 = vmand %vm619_vm8, %vm638_vm9 }
 0x14c   : > { %3954 = vmatmul.msk.f32.gmra.mxu2 %vm675_vm3, %v5096_v0  ;;  %v5213_v33 = vsel %vm656_vm10, 1.0, %v4717_v30 }
 0x14e   : > { %v5103_v3 = vpop.f32.mrf.mxu1 }
 0x152   : > { %1035 = vmatmul.f32.gmra.mxu1 %v4968_v7  ;;  %v5160_v7 = vsel %vm652_vm12, 1.0, %v4717_v30 }
 0x154   : > { %3955 = vmatmul.msk.f32.gmra.mxu2 %vm675_vm3, %v5107_v5 }
 0x156   : > { %v5114_v50 = vpop.f32.mrf.mxu1 }
 0x15a   : > { %1038 = vmatmul.f32.gmra.mxu1 %v4973_v9  ;;  %v1066_v9 = vld [vmem:[#allocation10] sm:$0xff] }
 0x15b   : > { %1115 = vmatpush.msrb.mxu2 %v1066_v9 }
 0x15c   : > { %3956 = vmatmul.msk.f32.gmra.mxu2 %vm675_vm3, %v5118_v10 }
 0x15e   : > { %v994_v55 = vpop.f32.mrf.mxu1 }
 0x15f   : > { %v5129_v16 = vadd.f32 %v994_v55, %v5122_v13  ;;  %v5185_v55 = vsel %vm654_vm4, 1.0, %v4717_v30 }
 0x161   : > { %2758 = vadd.xlane.f32.xlu0 %v5129_v16 }
 0x162   : > { %1041 = vmatmul.f32.gmra.mxu1 %v4978_v11  ;;  %v923_v11 = vpop.f32.mrf.mxu0 }
 0x163   : > { %v924_v15 = vadd.f32 %v923_v11, %v5210_v18 }
 0x164   : > { %3957 = vmatmul.msk.f32.gmra.mxu2 %vm675_vm3, %v5134_v60 }
 0x166   : > { %v997_v25 = vpop.f32.mrf.mxu1 }
 0x167   : > { %v5142_v27 = vadd.f32 %v997_v25, %v5122_v13 }
 0x169   : > { %2760 = vadd.xlane.f32.xlu0 %v5142_v27 }
 0x16a   : > { %1044 = vmatmul.f32.gmra.mxu1 %v4982_v12  ;;  %v5200_v12 = vsel %vm655_vm7, 1.0, %v4717_v30  ;;  %v926_v28 = vpop.f32.mrf.mxu0 }
 0x16c   : > { %3958 = vmatmul.msk.f32.gmra.mxu2 %vm675_vm3, %v5147_v1 }
 0x16e   : > { %v1000_v37 = vpop.f32.mrf.mxu1 }
 0x16f   : > { %v5155_v40 = vadd.f32 %v1000_v37, %v5122_v13  ;;  %v927_v37 = vadd.f32 %v926_v28, %v5210_v18 }
 0x171   : > { %2762 = vadd.xlane.f32.xlu0 %v5155_v40 }
 0x172   : > { %v929_v34 = vpop.f32.mrf.mxu0 }
 0x173   : > { %v930_v49 = vadd.f32 %v929_v34, %v5210_v18 }
 0x174   : > { %3959 = vmatmul.msk.f32.gmra.mxu2 %vm675_vm3, %v5160_v7 }
 0x176   : > { %v1003_v48 = vpop.f32.mrf.mxu1 }
 0x177   : > { %v5225_v30 = vadd.f32 %v1003_v48, %v5122_v13 }
 0x179   : > { %2764 = vadd.xlane.f32.xlu2 %v5225_v30 }
 0x17a   : > { %v932_v41 = vpop.f32.mrf.mxu0 }
 0x17c   : > { %v537_v63 = vpop.xlane.xlu0 %536  ;;  %3960 = vmatmul.msk.f32.gmra.mxu2 %vm675_vm3, %v5169_v61 }
 0x17d   : > { %v539_v2 = vmul.f32 0.03125, %v537_v63 }
 0x17e   : > { %v1006_v9 = vpop.f32.mrf.mxu1 }
 0x17f   : > { %v5178_v4 = vsub.f32 %v5005_v26, %v539_v2  ;;  %v5233_v63 = vadd.f32 %v1006_v9, %v5122_v13  ;;  %v933_v2 = vadd.f32 %v932_v41, %v5210_v18 }
 0x181   : > { %v543_v17 = vmul.f32 %v5178_v4, %v5178_v4  ;;  %8325 = vst [vmem:[#allocation24_spill] sm:$0xff] %v5233_v63 }
 0x182   : > { %v935_v54 = vpop.f32.mrf.mxu0 }
 0x183   : > { %v545_v14 = vmul.f32 %v543_v17, %v5182_v8 }
 0x184   : > { %v535_v26 = vpop.xlane.xlu0 %534  ;;  %3961 = vmatmul.msk.f32.gmra.mxu2 %vm675_vm3, %v5185_v55 }
 0x185   : > { %v538_v22 = vmul.f32 0.03125, %v535_v26  ;;  %548 = vadd.xlane.f32.xlu1 %v545_v14 }
 0x187   : > { %v5196_v23 = vsub.f32 %v5016_v32, %v538_v22  ;;  %v1009_v17 = vpop.f32.mrf.mxu1  ;;  %v936_v22 = vadd.f32 %v935_v54, %v5210_v18 }
 0x188   : > { %v5241_v26 = vadd.f32 %v1009_v17, %v5122_v13 }
 0x189   : > { %v542_v25 = vmul.f32 %v5196_v23, %v5196_v23 }
 0x18a   : > { %v938_v14 = vpop.f32.mrf.mxu0  ;;  %8326 = vst [vmem:[#allocation25_spill] sm:$0xff] %v5241_v26  ;;  %2768 = vadd.xlane.f32.xlu0 %v5241_v26 }
 0x18b   : > { %v544_v29 = vmul.f32 %v542_v25, %v5182_v8 }
 0x18c   : > { %3962 = vmatmul.msk.f32.gmra.mxu2 %vm675_vm3, %v5200_v12 }
 0x18d   : > { %546 = vadd.xlane.f32.xlu1 %v544_v29  ;;  %v939_v29 = vadd.f32 %v938_v14, %v5210_v18 }
 0x18f   : > { %v747_v32 = vpop.f32.mrf.mxu2 }
 0x190   : > { %v5218_v19 = vmul.f32 %v924_v15, %v747_v32 }
 0x192   : > { %v941_v28 = vpop.f32.mrf.mxu0 }
 0x193   : > { %v942_v15 = vadd.f32 %v941_v28, %v5210_v18 }
 0x194   : > { %3963 = vmatmul.msk.f32.gmra.mxu2 %vm675_vm3, %v5213_v33 }
 0x195   : > { %2766 = vadd.xlane.f32.xlu1 %v5233_v63 }
 0x197   : > { %v750_v36 = vpop.f32.mrf.mxu2 }
 0x198   : > { %v5222_v45 = vmul.f32 %v927_v37, %v750_v36 }
 0x19a   : > { %v944_v36 = vpop.f32.mrf.mxu0 }
 0x19c   : > { %1116 = vmatmul.f32.vlgmr.msrb.gmra.mxu2 %v5218_v19 }
 0x19f   : > { %v753_v44 = vpop.f32.mrf.mxu2 }
 0x1a0   : > { %v5230_v58 = vmul.f32 %v930_v49, %v753_v44  ;;  %v945_v44 = vadd.f32 %v944_v36, %v5210_v18 }
 0x1a2   : > { %v947_v49 = vpop.f32.mrf.mxu0 }
 0x1a3   : > { %v948_v9 = vadd.f32 %v947_v49, %v5210_v18 }
 0x1a4   : > { %1119 = vmatmul.f32.gmra.mxu2 %v5222_v45 }
 0x1a7   : > { %v756_v53 = vpop.f32.mrf.mxu2 }
 0x1a8   : > { %v5238_v11 = vmul.f32 %v933_v2, %v756_v53 }
 0x1ac   : > { %1122 = vmatmul.f32.gmra.mxu2 %v5230_v58 }
 0x1af   : > { %v759_v6 = vpop.f32.mrf.mxu2 }
 0x1b0   : > { %v5246_v25 = vmul.f32 %v936_v22, %v759_v6 }
 0x1b4   : > { %1125 = vmatmul.f32.gmra.mxu2 %v5238_v11 }
 0x1b7   : > { %v762_v24 = vpop.f32.mrf.mxu2 }
 0x1b8   : > { %v5250_v34 = vmul.f32 %v939_v29, %v762_v24  ;;  %v950_v24 = vpop.f32.mrf.mxu0 }
 0x1bc   : > { %1128 = vmatmul.f32.gmra.mxu2 %v5246_v25 }
 0x1bf   : > { %v765_v32 = vpop.f32.mrf.mxu2 }
 0x1c0   : > { %v5254_v41 = vmul.f32 %v942_v15, %v765_v32  ;;  %v951_v32 = vadd.f32 %v950_v24, %v5210_v18 }
 0x1c4   : > { %1131 = vmatmul.f32.gmra.mxu2 %v5250_v34 }
 0x1c7   : > { %v768_v37 = vpop.f32.mrf.mxu2 }
 0x1c8   : > { %v5258_v53 = vmul.f32 %v945_v44, %v768_v37  ;;  %v1012_v44 = vpop.f32.mrf.mxu1 }
 0x1c9   : > { %v5280_v49 = vadd.f32 %v1012_v44, %v5122_v13 }
 0x1cb   : > { %8328 = vst [vmem:[#allocation27_spill] sm:$0xff] %v5280_v49  ;;  %2770 = vadd.xlane.f32.xlu2 %v5280_v49 }
 0x1cc   : > { %1134 = vmatmul.f32.gmra.mxu2 %v5254_v41 }
 0x1cf   : > { %v771_v48 = vpop.f32.mrf.mxu2 }
 0x1d0   : > { %v5265_v14 = vmul.f32 %v948_v9, %v771_v48  ;;  %v954_v9 = vadd.f32 %v5037_v39, %v5210_v18 }
 0x1d4   : > { %v2759_v54 = vpop.xlane.xlu0 %2758  ;;  %1137 = vmatmul.f32.gmra.mxu2 %v5258_v53 }
 0x1d5   : > { %v2794_v2 = vmul.f32 0.03125, %v2759_v54 }
 0x1d7   : > { %v5263_v6 = vsub.f32 %v5129_v16, %v2794_v2  ;;  %v774_v17 = vpop.f32.mrf.mxu2 }
 0x1d8   : > { %v5275_v37 = vmul.f32 %v951_v32, %v774_v17 }
 0x1d9   : > { %v2830_v22 = vmul.f32 %v5263_v6, %v5263_v6 }
 0x1db   : > { %v2848_v28 = vmul.f32 %v2830_v22, %v5182_v8 }
 0x1dc   : > { %v2761_v29 = vpop.xlane.xlu0 %2760  ;;  %1140 = vmatmul.f32.gmra.mxu2 %v5265_v14 }
 0x1dd   : > { %v2795_v15 = vmul.f32 0.03125, %v2761_v29  ;;  %2866 = vadd.xlane.f32.xlu0 %v2848_v28  ;;  %v1015_v28 = vpop.f32.mrf.mxu1 }
 0x1de   : > { %v5295_v32 = vadd.f32 %v1015_v28, %v5122_v13 }
 0x1df   : > { %v5273_v36 = vsub.f32 %v5142_v27, %v2795_v15  ;;  %v777_v16 = vpop.f32.mrf.mxu2  ;;  %v957_v15 = vadd.f32 %v5048_v43, %v5210_v18 }
 0x1e0   : > { %v5290_v24 = vmul.f32 %v954_v9, %v777_v16  ;;  %8330 = vst [vmem:[#allocation29_spill] sm:$0xff] %v5295_v32  ;;  %2772 = vadd.xlane.f32.xlu2 %v5295_v32 }
 0x1e1   : > { %8327 = vst [vmem:[#allocation26_spill] sm:$0xff] %v5273_v36  ;;  %v2831_v48 = vmul.f32 %v5273_v36, %v5273_v36 }
 0x1e3   : > { %v2849_v54 = vmul.f32 %v2831_v48, %v5182_v8 }
 0x1e4   : > { %v2763_v2 = vpop.xlane.xlu0 %2762  ;;  %1143 = vmatmul.f32.gmra.mxu2 %v5275_v37 }
 0x1e5   : > { %v2796_v27 = vmul.f32 0.03125, %v2763_v2  ;;  %2868 = vadd.xlane.f32.xlu0 %v2849_v54  ;;  %v1018_v44 = vpop.f32.mrf.mxu1  ;;  %v960_v54 = vadd.f32 %v5059_v47, %v5210_v18 }
 0x1e6   : > { %v5305_v48 = vadd.f32 %v1018_v44, %v5122_v13 }
 0x1e7   : > { %v5288_v17 = vsub.f32 %v5155_v40, %v2796_v27  ;;  %v780_v22 = vpop.f32.mrf.mxu2 }
 0x1e8   : > { %v5302_v16 = vmul.f32 %v957_v15, %v780_v22  ;;  %8331 = vst [vmem:[#allocation30_spill] sm:$0xff] %v5305_v48  ;;  %2774 = vadd.xlane.f32.xlu2 %v5305_v48  ;;  %v963_v22 = vadd.f32 %v5070_v52, %v5210_v18 }
 0x1e9   : > { %8329 = vst [vmem:[#allocation28_spill] sm:$0xff] %v5288_v17  ;;  %v2832_v29 = vmul.f32 %v5288_v17, %v5288_v17 }
 0x1eb   : > { %v2850_v39 = vmul.f32 %v2832_v29, %v5182_v8 }
 0x1ec   : > { %1146 = vmatmul.f32.gmra.mxu2 %v5290_v24 }
 0x1ed   : > { %2870 = vadd.xlane.f32.xlu0 %v2850_v39 }
 0x1ef   : > { %v783_v40 = vpop.f32.mrf.mxu2 }
 0x1f0   : > { %v5311_v2 = vmul.f32 %v960_v54, %v783_v40  ;;  %v966_v40 = vadd.f32 %v5081_v57, %v5210_v18  ;;  %v576_v57 = vperm.slane %v4995_v20, 5 }
 0x1f4   : > { %1149 = vmatmul.f32.gmra.mxu2 %v5302_v16 }
 0x1f7   : > { %v786_v9 = vpop.f32.mrf.mxu2 }
 0x1f8   : > { %v549_v43 = vpop.xlane.xlu1 %548  ;;  %v5316_v39 = vmul.f32 %v963_v22, %v786_v9  ;;  %v969_v22 = vadd.f32 %v5092_v62, %v5210_v18 }
 0x1f9   : > { %v551_v27 = vmul.f32 0.03125, %v549_v43 }
 0x1fb   : > { %v553_v28 = vadd.f32 1e-05, %v551_v27 }
 0x1fc   : > { %1152 = vmatmul.f32.gmra.mxu2 %v5311_v2 }
 0x1fd   : > { %4117 = vrsqrt.f32 %v553_v28  ;;  %vm570_vm12 = vweird.f32 %v553_v28 }
 0x1ff   : > { %v789_v29 = vpop.f32.mrf.mxu2 }
 0x200   : > { %v547_v15 = vpop.xlane.xlu1 %546  ;;  %v5321_v32 = vmul.f32 %v966_v40, %v789_v29  ;;  %v579_v40 = vperm.slane %v4997_v21, 5 }
 0x201   : > { %v550_v44 = vmul.f32 0.03125, %v547_v15 }
 0x203   : > { %v4118_v47 = vpop.eup %4117  ;;  %v552_v48 = vadd.f32 1e-05, %v550_v44 }
 0x204   : > { %v565_v54 = vmul.f32 %v4118_v47, %v553_v28  ;;  %1155 = vmatmul.f32.gmra.mxu2 %v5316_v39  ;;  %vm571_vm11 = vweird.f32 %v4118_v47 }
 0x205   : > { %4119 = vrsqrt.f32 %v552_v48  ;;  %vm572_vm13 = vmor %vm570_vm12, %vm571_vm11  ;;  %vm560_vm15 = vweird.f32 %v552_v48 }
 0x206   : > { %v566_v43 = vmul.f32 %v4118_v47, %v565_v54 }
 0x207   : > { %v792_v27 = vpop.f32.mrf.mxu2 }
 0x208   : > { %v567_v52 = vmul.f32 0.5, %v566_v43 }
 0x20a   : > { %v568_v49 = vsub.f32 1.5, %v567_v52  ;;  %v5329_v52 = vmul.f32 %v969_v22, %v792_v27 }
 0x20b   : > { %v4120_v9 = vpop.eup %4119 }
 0x20c   : > { %v555_v15 = vmul.f32 %v4120_v9, %v552_v48  ;;  %v569_v44 = vmul.f32 %v4118_v47, %v568_v49  ;;  %1158 = vmatmul.f32.gmra.mxu2 %v5321_v32  ;;  %vm561_vm14 = vweird.f32 %v4120_v9  ;;  %v972_v49 = vadd.f32 %v5103_v3, %v5210_v18 }
 0x20d   : > { %vm562_vm0 = vmor %vm560_vm15, %vm561_vm14  ;;  %v975_v3 = vadd.f32 %v5114_v50, %v5210_v18  ;;  %v1091_v50 = vld [vmem:[#allocation10 + $0xc8] sm:$0xff]  ;;  %v1089_v18 = vld [vmem:[#allocation10 + $0xb8] sm:$0xff] }
 0x20e   : > { %v556_v26 = vmul.f32 %v4120_v9, %v555_v15  ;;  %v573_v54 = vsel %vm572_vm13, %v4118_v47, %v569_v44  ;;  %v5338_v15 = vperm.slane %v4995_v20, 2  ;;  %v1093_v20 = vld [vmem:[#allocation10 + $0xd8] sm:$0xff]  ;;  %v1087_v44 = vld [vmem:[#allocation10 + $0xa8] sm:$0xff] }
 0x20f   : > { %v795_v63 = vpop.f32.mrf.mxu2  ;;  %v575_v29 = vmul.f32 %v573_v54, %v5178_v4 }
 0x210   : > { %v557_v43 = vmul.f32 0.5, %v556_v26  ;;  %v5335_v26 = vmul.f32 %v972_v49, %v795_v63 }
 0x211   : > { %v578_v17 = vmul.f32 %v576_v57, %v575_v29 }
 0x212   : > { %v558_v62 = vsub.f32 1.5, %v557_v43 }
 0x213   : > { %v581_v28 = vadd.f32 %v579_v40, %v578_v17  ;;  %v1097_v17 = vld [vmem:[#allocation10 + $0xf8] sm:$0xff] }
 0x214   : > { %v559_v36 = vmul.f32 %v4120_v9, %v558_v62  ;;  %1161 = vmatmul.f32.gmra.mxu2 %v5329_v52  ;;  %v1085_v62 = vld [vmem:[#allocation10 + $0x98] sm:$0xff] }
 0x215   : > { %815 = vmatpush.msra.mxu3 %v581_v28 }
 0x216   : > { %v563_v47 = vsel %vm562_vm0, %v4120_v9, %v559_v36  ;;  %v1095_v36 = vld [vmem:[#allocation10 + $0xe8] sm:$0xff] }
 0x217   : > { %v798_v4 = vpop.f32.mrf.mxu2  ;;  %v574_v21 = vmul.f32 %v563_v47, %v5196_v23  ;;  %v1079_v47 = vld [vmem:[#allocation10 + $0x68] sm:$0xff] }
 0x218   : > { %v5345_v63 = vmul.f32 %v975_v3, %v798_v4  ;;  %v1073_v3 = vld [vmem:[#allocation10 + $0x38] sm:$0xff] }
 0x219   : > { %v577_v27 = vmul.f32 %v576_v57, %v574_v21 }
 0x21b   : > { %v580_v22 = vadd.f32 %v579_v40, %v577_v27  ;;  %v1077_v27 = vld [vmem:[#allocation10 + $0x58] sm:$0xff] }
 0x21c   : > { %1164 = vmatmul.f32.gmra.mxu2 %v5335_v26 }
 0x21d   : > { %816 = vmatpush.msra.mxu3 %v580_v22 }
 0x21e   : > { %3964 = vmatmul.msk.f32.vlgmr.msra.gmra.mxu3 %vm675_vm3, %v5010_v31 }
 0x21f   : > { %1171 = vmatpush.msrb.mxu3 %v1097_v17  ;;  %v1117_v23 = vpop.f32.mrf.mxu2 }
 0x220   : > { %v5348_v48 = vadd.f32 %v1117_v23, %v5338_v15 }
 0x221   : > { %1172 = vmatpush.msrb.mxu3 %v1095_v36 }
 0x222   : > { %1242 = vadd.xlane.f32.xlu2 %v5348_v48 }
 0x223   : > { %1173 = vmatpush.msrb.mxu3 %v1093_v20 }
 0x224   : > { %1167 = vmatmul.f32.gmra.mxu2 %v5345_v63 }
 0x225   : > { %1174 = vmatpush.msrb.mxu3 %v1091_v50  ;;  %v2765_v50 = vpop.xlane.xlu2 %2764 }
 0x226   : > { %3965 = vmatmul.msk.f32.gmra.mxu3 %vm675_vm3, %v5022_v35 }
 0x227   : > { %v1120_v31 = vpop.f32.mrf.mxu2  ;;  %1175 = vmatpush.msrb.mxu3 %v1089_v18 }
 0x228   : > { %v5355_v9 = vadd.f32 %v1120_v31, %v5338_v15 }
 0x229   : > { %1176 = vmatpush.msrb.mxu3 %v1087_v44  ;;  %v1069_v44 = vld [vmem:[#allocation10 + $0x18] sm:$0xff] }
 0x22a   : > { %1244 = vadd.xlane.f32.xlu0 %v5355_v9 }
 0x22b   : > { %1177 = vmatpush.msrb.mxu3 %v1085_v62 }
 0x22e   : > { %3966 = vmatmul.msk.f32.gmra.mxu3 %vm675_vm3, %v5031_v38 }
 0x22f   : > { %v1123_v57 = vpop.f32.mrf.mxu2 }
 0x230   : > { %v5361_v54 = vadd.f32 %v1123_v57, %v5338_v15 }
 0x232   : > { %1246 = vadd.xlane.f32.xlu2 %v5361_v54 }
 0x236   : > { %3967 = vmatmul.msk.f32.gmra.mxu3 %vm675_vm3, %v5042_v42 }
 0x237   : > { %v1126_v35 = vpop.f32.mrf.mxu2 }
 0x238   : > { %v5367_v29 = vadd.f32 %v1126_v35, %v5338_v15 }
 0x23a   : > { %1248 = vadd.xlane.f32.xlu1 %v5367_v29 }
 0x23e   : > { %3968 = vmatmul.msk.f32.gmra.mxu3 %vm675_vm3, %v5053_v46  ;;  %v1083_v46 = vld [vmem:[#allocation10 + $0x88] sm:$0xff] }
 0x23f   : > { %v1129_v40 = vpop.f32.mrf.mxu2  ;;  %1178 = vmatpush.msrb.mxu3 %v1083_v46 }
 0x240   : > { %v5373_v38 = vadd.f32 %v1129_v40, %v5338_v15  ;;  %v1067_v40 = vld [vmem:[#allocation10 + $0x8] sm:$0xff] }
 0x242   : > { %1250 = vadd.xlane.f32.xlu1 %v5373_v38 }
 0x246   : > { %3969 = vmatmul.msk.f32.gmra.mxu3 %vm675_vm3, %v5064_v51  ;;  %v1081_v51 = vld [vmem:[#allocation10 + $0x78] sm:$0xff] }
 0x247   : > { %v1132_v43 = vpop.f32.mrf.mxu2  ;;  %1179 = vmatpush.msrb.mxu3 %v1081_v51 }
 0x248   : > { %v5379_v42 = vadd.f32 %v1132_v43, %v5338_v15 }
 0x249   : > { %1180 = vmatpush.msrb.mxu3 %v1079_v47 }
 0x24a   : > { %1252 = vadd.xlane.f32.xlu1 %v5379_v42 }
 0x24b   : > { %1181 = vmatpush.msrb.mxu3 %v1077_v27 }
 0x24e   : > { %3970 = vmatmul.msk.f32.gmra.mxu3 %vm675_vm3, %v5075_v56 }
 0x24f   : > { %v1135_v28 = vpop.f32.mrf.mxu2 }
 0x250   : > { %v5385_v49 = vadd.f32 %v1135_v28, %v5338_v15 }
 0x252   : > { %1254 = vadd.xlane.f32.xlu1 %v5385_v49 }
 0x256   : > { %3971 = vmatmul.msk.f32.gmra.mxu3 %vm675_vm3, %v5085_v59  ;;  %v1075_v59 = vld [vmem:[#allocation10 + $0x48] sm:$0xff] }
 0x257   : > { %v1138_v4 = vpop.f32.mrf.mxu2  ;;  %1182 = vmatpush.msrb.mxu3 %v1075_v59 }
 0x258   : > { %v5391_v21 = vadd.f32 %v1138_v4, %v5338_v15 }
 0x259   : > { %1183 = vmatpush.msrb.mxu3 %v1073_v3  ;;  %v5460_v3 = vpop.xlane.xlu1 %2766 }
 0x25a   : > { %1256 = vadd.xlane.f32.xlu0 %v5391_v21 }
 0x25e   : > { %3972 = vmatmul.msk.f32.gmra.mxu3 %vm675_vm3, %v5096_v0  ;;  %v1071_v0 = vld [vmem:[#allocation10 + $0x28] sm:$0xff] }
 0x25f   : > { %v1141_v56 = vpop.f32.mrf.mxu2  ;;  %1184 = vmatpush.msrb.mxu3 %v1071_v0 }
 0x260   : > { %v5397_v22 = vadd.f32 %v1141_v56, %v5338_v15 }
 0x261   : > { %1185 = vmatpush.msrb.mxu3 %v1069_v44 }
 0x262   : > { %1258 = vadd.xlane.f32.xlu2 %v5397_v22 }
 0x263   : > { %1186 = vmatpush.msrb.mxu3 %v1067_v40 }
 0x266   : > { %3973 = vmatmul.msk.f32.gmra.mxu3 %vm675_vm3, %v5107_v5  ;;  %v5414_v5 = vpop.xlane.xlu0 %2768 }
 0x267   : > { %v1144_v17 = vpop.f32.mrf.mxu2 }
 0x268   : > { %v5403_v36 = vadd.f32 %v1144_v17, %v5338_v15 }
 0x26a   : > { %1260 = vadd.xlane.f32.xlu1 %v5403_v36 }
 0x26e   : > { %3974 = vmatmul.msk.f32.gmra.mxu3 %vm675_vm3, %v5118_v10  ;;  %v5419_v10 = vpop.xlane.xlu2 %2770 }
 0x26f   : > { %v1147_v23 = vpop.f32.mrf.mxu2 }
 0x270   : > { %v5409_v20 = vadd.f32 %v1147_v23, %v5338_v15 }
 0x272   : > { %1262 = vadd.xlane.f32.xlu1 %v5409_v20 }
 0x276   : > { %3975 = vmatmul.msk.f32.gmra.mxu3 %vm675_vm3, %v5134_v60  ;;  %v5427_v60 = vpop.xlane.xlu0 %2866  ;;  %v5430_v43 = vpop.xlane.xlu2 %2772 }
 0x277   : > { %v1150_v18 = vpop.f32.mrf.mxu2 }
 0x278   : > { %v5417_v31 = vadd.f32 %v1150_v18, %v5338_v15 }
 0x27a   : > { %1264 = vadd.xlane.f32.xlu1 %v5417_v31 }
 0x27e   : > { %3976 = vmatmul.msk.f32.gmra.mxu3 %vm675_vm3, %v5147_v1  ;;  %v5434_v62 = vpop.xlane.xlu0 %2868  ;;  %v5436_v46 = vpop.xlane.xlu2 %2774 }
 0x27f   : > { %v1153_v57 = vpop.f32.mrf.mxu2 }
 0x280   : > { %v5425_v35 = vadd.f32 %v1153_v57, %v5338_v15 }
 0x282   : > { %1266 = vadd.xlane.f32.xlu1 %v5425_v35 }
 0x286   : > { %3977 = vmatmul.msk.f32.gmra.mxu3 %vm675_vm3, %v5160_v7  ;;  %v5440_v1 = vpop.xlane.xlu0 %2870 }
 0x287   : > { %v1156_v23 = vpop.f32.mrf.mxu2 }
 0x288   : > { %v5472_v57 = vadd.f32 %v1156_v23, %v5338_v15 }
 0x28e   : > { %3978 = vmatmul.msk.f32.gmra.mxu3 %vm675_vm3, %v5169_v61 }
 0x295   : > { %v1243_v28 = vpop.xlane.xlu2 %1242 }
 0x296   : > { %v1278_v51 = vmul.f32 0.03125, %v1243_v28  ;;  %3979 = vmatmul.msk.f32.gmra.mxu3 %vm675_vm3, %v5185_v55 }
 0x298   : > { %v5445_v47 = vsub.f32 %v5348_v48, %v1278_v51 }
 0x29a   : > { %v1314_v7 = vmul.f32 %v5445_v47, %v5445_v47 }
 0x29c   : > { %v1332_v4 = vmul.f32 %v1314_v7, %v5182_v8 }
 0x29d   : > { %v1245_v27 = vpop.xlane.xlu0 %1244 }
 0x29e   : > { %v1279_v56 = vmul.f32 0.03125, %v1245_v27  ;;  %3980 = vmatmul.msk.f32.gmra.mxu3 %vm675_vm3, %v5200_v12  ;;  %1350 = vadd.xlane.f32.xlu2 %v1332_v4 }
 0x2a0   : > { %v5453_v61 = vsub.f32 %v5355_v9, %v1279_v56  ;;  %v2797_v9 = vmul.f32 0.03125, %v2765_v50 }
 0x2a1   : > { %v5455_v59 = vpop.f32.mrf.mxu3 }
 0x2a2   : > { %8332 = vst [vmem:[#allocation31_spill] sm:$0xff] %v5455_v59  ;;  %v1315_v55 = vmul.f32 %v5453_v61, %v5453_v61  ;;  %v5476_v28 = vsub.f32 %v5225_v30, %v2797_v9 }
 0x2a4   : > { %v1333_v48 = vmul.f32 %v1315_v55, %v5182_v8  ;;  %v2833_v7 = vmul.f32 %v5476_v28, %v5476_v28 }
 0x2a5   : > { %v1247_v17 = vpop.xlane.xlu2 %1246 }
 0x2a6   : > { %v1280_v0 = vmul.f32 0.03125, %v1247_v17  ;;  %3981 = vmatmul.msk.f32.gmra.mxu3 %vm675_vm3, %v5213_v33  ;;  %1352 = vadd.xlane.f32.xlu1 %v1333_v48  ;;  %v2851_v56 = vmul.f32 %v2833_v7, %v5182_v8 }
 0x2a8   : > { %v5465_v12 = vsub.f32 %v5361_v54, %v1280_v0 }
 0x2a9   : > { %v5467_v18 = vpop.f32.mrf.mxu3 }
 0x2aa   : > { %8333 = vst [vmem:[#allocation32_spill] sm:$0xff] %v5467_v18  ;;  %v1316_v44 = vmul.f32 %v5465_v12, %v5465_v12 }
 0x2ac   : > { %v1334_v40 = vmul.f32 %v1316_v44, %v5182_v8 }
 0x2ad   : > { %v1249_v33 = vpop.xlane.xlu1 %1248 }
 0x2ae   : > { %v1281_v51 = vmul.f32 0.03125, %v1249_v33  ;;  %1187 = vmatmul.f32.vlgmr.msrb.gmra.mxu3 %v5218_v19  ;;  %1268 = vadd.xlane.f32.xlu1 %v5472_v57 }
 0x2af   : > { %1354 = vadd.xlane.f32.xlu0 %v1334_v40 }
 0x2b0   : > { %v5481_v54 = vsub.f32 %v5367_v29, %v1281_v51 }
 0x2b1   : > { %v5483_v50 = vpop.f32.mrf.mxu3 }
 0x2b2   : > { %8334 = vst [vmem:[#allocation33_spill] sm:$0xff] %v5483_v50  ;;  %v1317_v4 = vmul.f32 %v5481_v54, %v5481_v54 }
 0x2b4   : > { %v1335_v30 = vmul.f32 %v1317_v4, %v5182_v8 }
 0x2b5   : > { %v1251_v27 = vpop.xlane.xlu1 %1250 }
 0x2b6   : > { %v1282_v19 = vmul.f32 0.03125, %v1251_v27  ;;  %1190 = vmatmul.f32.gmra.mxu3 %v5222_v45  ;;  %1356 = vadd.xlane.f32.xlu2 %v1335_v30 }
 0x2b7   : > { %2872 = vadd.xlane.f32.xlu0 %v2851_v56 }
 0x2b8   : > { %v5493_v29 = vsub.f32 %v5373_v38, %v1282_v19 }
 0x2b9   : > { %v5495_v55 = vpop.f32.mrf.mxu3 }
 0x2ba   : > { %8335 = vst [vmem:[#allocation34_spill] sm:$0xff] %v5495_v55  ;;  %v1318_v48 = vmul.f32 %v5493_v29, %v5493_v29 }
 0x2bc   : > { %v1336_v17 = vmul.f32 %v1318_v48, %v5182_v8 }
 0x2bd   : > { %v1253_v0 = vpop.xlane.xlu1 %1252 }
 0x2be   : > { %v1283_v9 = vmul.f32 0.03125, %v1253_v0  ;;  %1193 = vmatmul.f32.gmra.mxu3 %v5230_v58  ;;  %1358 = vadd.xlane.f32.xlu2 %v1336_v17 }
 0x2c0   : > { %v5502_v23 = vsub.f32 %v5379_v42, %v1283_v9 }
 0x2c1   : > { %v5504_v45 = vpop.f32.mrf.mxu3 }
 0x2c2   : > { %8336 = vst [vmem:[#allocation35_spill] sm:$0xff] %v5504_v45  ;;  %v1319_v38 = vmul.f32 %v5502_v23, %v5502_v23 }
 0x2c4   : > { %v1337_v44 = vmul.f32 %v1319_v38, %v5182_v8 }
 0x2c5   : > { %v1255_v40 = vpop.xlane.xlu1 %1254 }
 0x2c6   : > { %v1284_v33 = vmul.f32 0.03125, %v1255_v40  ;;  %1196 = vmatmul.f32.gmra.mxu3 %v5238_v11  ;;  %1360 = vadd.xlane.f32.xlu2 %v1337_v44 }
 0x2c8   : > { %v5511_v51 = vsub.f32 %v5385_v49, %v1284_v33  ;;  %v2902_v33 = vmul.f32 0.03125, %v5427_v60 }
 0x2c9   : > { %v5513_v58 = vpop.f32.mrf.mxu3 }
 0x2ca   : > { %8337 = vst [vmem:[#allocation36_spill] sm:$0xff] %v5513_v58  ;;  %v1320_v42 = vmul.f32 %v5511_v51, %v5511_v51 }
 0x2cc   : > { %v1338_v7 = vmul.f32 %v1320_v42, %v5182_v8 }
 0x2ce   : > { %1199 = vmatmul.f32.gmra.mxu3 %v5246_v25  ;;  %1362 = vadd.xlane.f32.xlu2 %v1338_v7 }
 0x2d1   : > { %v5519_v4 = vpop.f32.mrf.mxu3 }
 0x2d2   : > { %8338 = vst [vmem:[#allocation37_spill] sm:$0xff] %v5519_v4 }
 0x2d6   : > { %1202 = vmatmul.f32.gmra.mxu3 %v5250_v34 }
 0x2d9   : > { %v5522_v30 = vpop.f32.mrf.mxu3 }
 0x2da   : > { %8339 = vst [vmem:[#allocation38_spill] sm:$0xff] %v5522_v30 }
 0x2dd   : > { %v5533_v25 = vpop.xlane.xlu1 %1260 }
 0x2de   : > { %1205 = vmatmul.f32.gmra.mxu3 %v5254_v41 }
 0x2e1   : > { %v5525_v11 = vpop.f32.mrf.mxu3 }
 0x2e2   : > { %8340 = vst [vmem:[#allocation39_spill] sm:$0xff] %v5525_v11 }
 0x2e5   : > { %v5538_v34 = vpop.xlane.xlu1 %1262 }
 0x2e6   : > { %1208 = vmatmul.f32.gmra.mxu3 %v5258_v53  ;;  %v5546_v53 = vpop.xlane.xlu2 %1258 }
 0x2e9   : > { %v5528_v49 = vpop.f32.mrf.mxu3 }
 0x2ea   : > { %8341 = vst [vmem:[#allocation40_spill] sm:$0xff] %v5528_v49 }
 0x2ed   : > { %v5543_v19 = vpop.xlane.xlu1 %1264 }
 0x2ee   : > { %1211 = vmatmul.f32.gmra.mxu3 %v5265_v14 }
 0x2f1   : > { %v5531_v27 = vpop.f32.mrf.mxu3 }
 0x2f2   : > { %8342 = vst [vmem:[#allocation41_spill] sm:$0xff] %v5531_v27 }
 0x2f5   : > { %v5551_v48 = vpop.xlane.xlu1 %1266 }
 0x2f6   : > { %1214 = vmatmul.f32.gmra.mxu3 %v5275_v37 }
 0x2f9   : > { %v5536_v56 = vpop.f32.mrf.mxu3 }
 0x2fa   : > { %8343 = vst [vmem:[#allocation42_spill] sm:$0xff] %v5536_v56 }
 0x2fe   : > { %1217 = vmatmul.f32.gmra.mxu3 %v5290_v24 }
 0x301   : > { %v5541_v41 = vpop.f32.mrf.mxu3 }
 0x302   : > { %8344 = vst [vmem:[#allocation43_spill] sm:$0xff] %v5541_v41 }
 0x306   : > { %1220 = vmatmul.f32.gmra.mxu3 %v5302_v16  ;;  %v5558_v16 = vpop.xlane.xlu0 %1256 }
 0x309   : > { %v5548_v14 = vpop.f32.mrf.mxu3 }
 0x30a   : > { %8345 = vst [vmem:[#allocation44_spill] sm:$0xff] %v5548_v14 }
 0x30e   : > { %1223 = vmatmul.f32.gmra.mxu3 %v5311_v2 }
 0x311   : > { %v5553_v37 = vpop.f32.mrf.mxu3  ;;  %v1351_v17 = vpop.xlane.xlu2 %1350 }
 0x312   : > { %8346 = vst [vmem:[#allocation45_spill] sm:$0xff] %v5553_v37  ;;  %v1386_v0 = vmul.f32 0.03125, %v1351_v17  ;;  %v5562_v17 = vadd.f32 1e-05, %v2902_v33  ;;  %v5570_v33 = vld [vmem:[#allocation13] sm:$0xff] }
 0x314   : > { %v1404_v9 = vadd.f32 1e-05, %v1386_v0  ;;  %v2903_v0 = vmul.f32 0.03125, %v5434_v62  ;;  %v5573_v62 = vperm.slane %v5570_v33, 6  ;;  %vm2944_vm10 = vweird.f32 %v5562_v17 }
 0x316   : > { %4121 = vrsqrt.f32 %v1404_v9  ;;  %1226 = vmatmul.f32.gmra.mxu3 %v5316_v39  ;;  %v5568_v60 = vadd.f32 1e-05, %v2903_v0  ;;  %vm1428_vm1 = vweird.f32 %v1404_v9 }
 0x318   : > { %vm2954_vm13 = vweird.f32 %v5568_v60 }
 0x319   : > { %v5556_v24 = vpop.f32.mrf.mxu3  ;;  %v1353_v38 = vpop.xlane.xlu1 %1352 }
 0x31a   : > { %8347 = vst [vmem:[#allocation46_spill] sm:$0xff] %v5556_v24  ;;  %v1387_v44 = vmul.f32 0.03125, %v1353_v38 }
 0x31c   : > { %v4122_v40 = vpop.eup %4121  ;;  %v1405_v2 = vadd.f32 1e-05, %v1387_v44 }
 0x31d   : > { %v1423_v42 = vmul.f32 %v4122_v40, %v1404_v9  ;;  %vm1429_vm3 = vweird.f32 %v4122_v40 }
 0x31e   : > { %4123 = vrsqrt.f32 %v1405_v2  ;;  %1229 = vmatmul.f32.gmra.mxu3 %v5321_v32  ;;  %vm1430_vm2 = vmor %vm1428_vm1, %vm1429_vm3  ;;  %vm1438_vm5 = vweird.f32 %v1405_v2 }
 0x31f   : > { %v1424_v7 = vmul.f32 %v4122_v40, %v1423_v42  ;;  %4125 = vrsqrt.f32 %v5562_v17 }
 0x321   : > { %v1425_v39 = vmul.f32 0.5, %v1424_v7  ;;  %v5565_v37 = vpop.f32.mrf.mxu3 }
 0x322   : > { %8348 = vst [vmem:[#allocation47_spill] sm:$0xff] %v5565_v37  ;;  %v1355_v24 = vpop.xlane.xlu0 %1354 }
 0x323   : > { %v1426_v14 = vsub.f32 1.5, %v1425_v39  ;;  %v1388_v38 = vmul.f32 0.03125, %v1355_v24  ;;  %v5576_v24 = vld [vmem:[#allocation13 + $0x8] sm:$0xff] }
 0x324   : > { %v4124_v41 = vpop.eup %4123  ;;  %v5579_v0 = vperm.slane %v5576_v24, 6 }
 0x325   : > { %v1427_v44 = vmul.f32 %v4122_v40, %v1426_v14  ;;  %v1433_v32 = vmul.f32 %v4124_v41, %v1405_v2  ;;  %v1406_v42 = vadd.f32 1e-05, %v1388_v38  ;;  %v5585_v37 = vpop.eup %4125  ;;  %vm1439_vm4 = vweird.f32 %v4124_v41 }
 0x326   : > { %1232 = vmatmul.f32.gmra.mxu3 %v5329_v52  ;;  %vm1440_vm6 = vmor %vm1438_vm5, %vm1439_vm4  ;;  %vm2945_vm11 = vweird.f32 %v5585_v37 }
 0x327   : > { %v1431_v7 = vsel %vm1430_vm2, %v4122_v40, %v1427_v44  ;;  %v1434_v39 = vmul.f32 %v4124_v41, %v1433_v32  ;;  %4127 = vrsqrt.f32 %v1406_v42  ;;  %v2939_v32 = vmul.f32 %v5585_v37, %v5562_v17  ;;  %vm5636_vm12 = vmor %vm2944_vm10, %vm2945_vm11 }
 0x328   : > { %4129 = vrsqrt.f32 %v5568_v60  ;;  %v1602_v14 = vmul.f32 %v1431_v7, %v5445_v47  ;;  %v5594_v47 = vperm.slane %v5576_v24, 2  ;;  %vm1448_vm8 = vweird.f32 %v1406_v42 }
 0x329   : > { %v1435_v9 = vmul.f32 0.5, %v1434_v39  ;;  %v5583_v38 = vpop.f32.mrf.mxu3 }
 0x32a   : > { %8349 = vst [vmem:[#allocation48_spill] sm:$0xff] %v5583_v38  ;;  %v1621_v56 = vmul.f32 %v5573_v62, %v1602_v14  ;;  %v2904_v14 = vmul.f32 0.03125, %v5440_v1  ;;  %v5760_v45 = vpop.xlane.xlu0 %2872 }
 0x32b   : > { %v1436_v52 = vsub.f32 1.5, %v1435_v9 }
 0x32c   : > { %v1640_v40 = vadd.f32 %v5579_v0, %v1621_v56 }
 0x32d   : > { %v4128_v44 = vpop.eup %4127  ;;  %v1437_v27 = vmul.f32 %v4124_v41, %v1436_v52  ;;  %v2940_v52 = vmul.f32 %v5585_v37, %v2939_v32  ;;  %v1021_v32 = vpop.f32.mrf.mxu1 }
 0x32e   : > { %v5591_v49 = vpop.eup %4129  ;;  %v1658_v7 = vsub.f32 0.0, %v1640_v40  ;;  %v1443_v39 = vmul.f32 %v4128_v44, %v1406_v42  ;;  %1235 = vmatmul.f32.gmra.mxu3 %v5335_v26  ;;  %v5606_v26 = vadd.f32 1e-05, %v2904_v14  ;;  %vm1449_vm7 = vweird.f32 %v4128_v44 }
 0x32f   : > { %v1441_v9 = vsel %vm1440_vm6, %v4124_v41, %v1437_v27  ;;  %v2949_v2 = vmul.f32 %v5591_v49, %v5568_v60  ;;  %vm1450_vm9 = vmor %vm1448_vm8, %vm1449_vm7  ;;  %v5615_v14 = vadd.f32 %v1021_v32, %v5122_v13  ;;  %vm2955_vm14 = vweird.f32 %v5591_v49 }
 0x330   : > { %v1676_v56 = vmul.f32 1.442695, %v1658_v7  ;;  %v1603_v38 = vmul.f32 %v1441_v9, %v5453_v61  ;;  %v1444_v11 = vmul.f32 %v4128_v44, %v1443_v39  ;;  %v2941_v61 = vmul.f32 0.5, %v2940_v52  ;;  %vm5654_vm15 = vmor %vm2954_vm13, %vm2955_vm14 }
 0x331   : > { %v1188_v30 = vpop.f32.mrf.mxu3  ;;  %v2950_v41 = vmul.f32 %v5591_v49, %v2949_v2  ;;  %v1285_v7 = vmul.f32 0.03125, %v5558_v16  ;;  %vm2964_vm2 = vweird.f32 %v5606_v26 }
 0x332   : > { %4131 = vpow2.f32 %v1676_v56  ;;  %v1622_v40 = vmul.f32 %v5573_v62, %v1603_v38  ;;  %v1445_v4 = vmul.f32 0.5, %v1444_v11  ;;  %v5604_v58 = vadd.f32 %v1188_v30, %v5594_v47 }
 0x333   : > { %4133 = vrsqrt.f32 %v5606_v26  ;;  %v2942_v9 = vsub.f32 1.5, %v2941_v61  ;;  %v2951_v2 = vmul.f32 0.5, %v2950_v41  ;;  %v5621_v42 = vsub.f32 %v5391_v21, %v1285_v7 }
 0x334   : > { %v1641_v1 = vadd.f32 %v5579_v0, %v1622_v40  ;;  %v1446_v27 = vsub.f32 1.5, %v1445_v4  ;;  %2000 = vadd.xlane.f32.xlu2 %v5604_v58 }
 0x335   : > { %v2943_v21 = vmul.f32 %v5585_v37, %v2942_v9  ;;  %v2952_v17 = vsub.f32 1.5, %v2951_v2  ;;  %v5660_v2 = vperm.slane %v5570_v33, 7 }
 0x336   : > { %v1659_v39 = vsub.f32 0.0, %v1641_v1  ;;  %v1447_v38 = vmul.f32 %v4128_v44, %v1446_v27  ;;  %1238 = vmatmul.f32.gmra.mxu3 %v5345_v63  ;;  %v1321_v27 = vmul.f32 %v5621_v42, %v5621_v42 }
 0x337   : > { %8354 = vst [vmem:[#allocation49_spill] sm:$0xff] %v5660_v2 }
 0x338   : > { %v4132_v30 = vpop.eup %4131  ;;  %v1678_v11 = vmul.f32 1.442695, %v1659_v39  ;;  %v1451_v4 = vsel %vm1450_vm9, %v4128_v44, %v1447_v38  ;;  %v2947_v39 = vsel %vm5636_vm12, %v5585_v37, %v2943_v21  ;;  %v1339_v60 = vmul.f32 %v1321_v27, %v5182_v8 }
 0x339   : > { %v5617_v56 = vadd.f32 1.0, %v4132_v30  ;;  %v1604_v52 = vmul.f32 %v1451_v4, %v5465_v12  ;;  %v1191_v16 = vpop.f32.mrf.mxu3  ;;  %v5632_v12 = vpop.eup %4133  ;;  %v2953_v4 = vmul.f32 %v5591_v49, %v2952_v17  ;;  %v3118_v37 = vmul.f32 %v2947_v39, %v5263_v6 }
 0x33a   : > { %4135 = vpow2.f32 %v1678_v11  ;;  %v5624_v63 = vadd.f32 %v1191_v16, %v5594_v47  ;;  %v2959_v32 = vmul.f32 %v5632_v12, %v5606_v26  ;;  %v5671_v27 = vperm.slane %v5576_v24, 7 }
 0x33b   : > { %4137 = vrcp.f32 %v5617_v56  ;;  %v1623_v44 = vmul.f32 %v5573_v62, %v1604_v52  ;;  %v1741_v1 = vand.u32 2147483648, %v5617_v56  ;;  %v1739_v33 = vand.u32 2147483647, %v5617_v56 }
 0x33c   : > { %2002 = vadd.xlane.f32.xlu1 %v5624_v63  ;;  %2776 = vadd.xlane.f32.xlu2 %v5615_v14  ;;  %8355 = vst [vmem:[#allocation50_spill] sm:$0xff] %v5671_v27  ;;  %v3137_v6 = vmul.f32 %v5660_v2, %v3118_v37  ;;  %vm1735_vm3 = vweird.f32 %v5617_v56  ;;  %vm2965_vm5 = vweird.f32 %v5632_v12 }
 0x33d   : > { %v1642_v40 = vadd.f32 %v5579_v0, %v1623_v44  ;;  %v2960_v44 = vmul.f32 %v5632_v12, %v2959_v32  ;;  %vm1740_vm4 = vcmp.eq.f32.partialorder %v1739_v33, 8.507059e+37  ;;  %vm5689_vm7 = vmor %vm2964_vm2, %vm2965_vm5 }
 0x33f   : > { %v1660_v61 = vsub.f32 0.0, %v1642_v40  ;;  %v2957_v40 = vsel %vm5654_vm15, %v5591_v49, %v2953_v4 }
 0x340   : > { %v4136_v41 = vpop.eup %4135 }
 0x341   : > { %v4138_v7 = vpop.eup %4137  ;;  %v1713_v38 = vadd.f32 1.0, %v4136_v41  ;;  %v1680_v30 = vmul.f32 1.442695, %v1660_v61  ;;  %v1194_v11 = vpop.f32.mrf.mxu3  ;;  %v2961_v61 = vmul.f32 0.5, %v2960_v44 }
 0x342   : > { %v5651_v9 = vadd.f32 %v1194_v11, %v5594_v47  ;;  %v1731_v16 = vmul.f32 %v4138_v7, %v5617_v56  ;;  %vm1736_vm0 = vweird.f32 %v4138_v7  ;;  %v3156_v56 = vadd.f32 %v5671_v27, %v3137_v6 }
 0x343   : > { %4139 = vrcp.f32 %v1713_v38  ;;  %vm1737_vm1 = vmor %vm1735_vm3, %vm1736_vm0  ;;  %v2962_v37 = vsub.f32 1.5, %v2961_v61  ;;  %vm1750_vm8 = vweird.f32 %v1713_v38 }
 0x344   : > { %4141 = vpow2.f32 %v1680_v30  ;;  %1364 = vadd.xlane.f32.xlu2 %v1339_v60  ;;  %2004 = vadd.xlane.f32.xlu0 %v5651_v9  ;;  %v1732_v21 = vsub.f32 1.0, %v1731_v16  ;;  %v8356_v30 = vld [vmem:[#allocation26_spill] sm:$0xff]  ;;  %v1742_v60 = vor.u32 1.1754944e-38, %v1741_v1 }
 0x345   : > { %v3119_v11 = vmul.f32 %v2957_v40, %v8356_v30  ;;  %v1756_v40 = vand.u32 2147483648, %v1713_v38  ;;  %v1754_v30 = vand.u32 2147483647, %v1713_v38 }
 0x346   : > { %v1733_v17 = vmul.f32 %v4138_v7, %v1732_v21 }
 0x347   : > { %vm1755_vm10 = vcmp.eq.f32.partialorder %v1754_v30, 8.507059e+37 }
 0x348   : > { %v1734_v39 = vadd.f32 %v4138_v7, %v1733_v17  ;;  %v3138_v17 = vmul.f32 %v5660_v2, %v3119_v11 }
 0x349   : > { %v4140_v41 = vpop.eup %4139  ;;  %v1197_v32 = vpop.f32.mrf.mxu3 }
 0x34a   : > { %v4142_v49 = vpop.eup %4141  ;;  %v5677_v4 = vadd.f32 %v1197_v32, %v5594_v47  ;;  %v1746_v52 = vmul.f32 %v4140_v41, %v1713_v38  ;;  %v1738_v16 = vsel %vm1737_vm1, %v4138_v7, %v1734_v39  ;;  %vm1751_vm6 = vweird.f32 %v4140_v41 }
 0x34b   : > { %v1714_v24 = vadd.f32 1.0, %v4142_v49  ;;  %v1743_v44 = vsel %vm1740_vm4, %v1742_v60, %v1738_v16  ;;  %v2963_v7 = vmul.f32 %v5632_v12, %v2962_v37  ;;  %vm1752_vm9 = vmor %vm1750_vm8, %vm1751_vm6  ;;  %v1757_v39 = vor.u32 1.1754944e-38, %v1756_v40 }
 0x34c   : > { %2006 = vadd.xlane.f32.xlu2 %v5677_v4  ;;  %v1747_v21 = vsub.f32 1.0, %v1746_v52  ;;  %v5684_v1 = vmul.f32 %v3156_v56, %v1743_v44  ;;  %v3157_v60 = vadd.f32 %v5671_v27, %v3138_v17  ;;  %v8361_v56 = vld [vmem:[#allocation28_spill] sm:$0xff] }
 0x34d   : > { %4143 = vrcp.f32 %v1714_v24  ;;  %v2967_v26 = vsel %vm5689_vm7, %v5632_v12, %v2963_v7  ;;  %v1769_v30 = vand.u32 2147483647, %v1714_v24  ;;  %vm1765_vm12 = vweird.f32 %v1714_v24 }
 0x34e   : > { %8357 = vst [vmem:[#allocation26_spill] sm:$0xff] %v5684_v1  ;;  %v1748_v32 = vmul.f32 %v4140_v41, %v1747_v21  ;;  %v3120_v21 = vmul.f32 %v2967_v26, %v8361_v56 }
 0x34f   : > { %vm1770_vm14 = vcmp.eq.f32.partialorder %v1769_v30, 8.507059e+37 }
 0x350   : > { %v1749_v6 = vadd.f32 %v4140_v41, %v1748_v32  ;;  %v3139_v12 = vmul.f32 %v5660_v2, %v3120_v21 }
 0x351   : > { %v1200_v61 = vpop.f32.mrf.mxu3 }
 0x352   : > { %v5694_v11 = vadd.f32 %v1200_v61, %v5594_v47  ;;  %v1753_v49 = vsel %vm1752_vm9, %v4140_v41, %v1749_v6  ;;  %v1771_v41 = vand.u32 2147483648, %v1714_v24 }
 0x353   : > { %v4144_v52 = vpop.eup %4143  ;;  %v1758_v16 = vsel %vm1755_vm10, %v1757_v39, %v1753_v49  ;;  %v3158_v39 = vadd.f32 %v5671_v27, %v3139_v12 }
 0x354   : > { %2008 = vadd.xlane.f32.xlu2 %v5694_v11  ;;  %v5701_v37 = vmul.f32 %v3157_v60, %v1758_v16  ;;  %v1761_v38 = vmul.f32 %v4144_v52, %v1714_v24  ;;  %vm1766_vm11 = vweird.f32 %v4144_v52  ;;  %v1772_v33 = vor.u32 1.1754944e-38, %v1771_v41  ;;  %v5732_v41 = vpop.xlane.xlu2 %1356 }
 0x355   : > { %vm1767_vm13 = vmor %vm1765_vm12, %vm1766_vm11 }
 0x356   : > { %8360 = vst [vmem:[#allocation51_spill] sm:$0xff] %v5701_v37  ;;  %v1762_v44 = vsub.f32 1.0, %v1761_v38 }
 0x358   : > { %v1763_v40 = vmul.f32 %v4144_v52, %v1762_v44 }
 0x359   : > { %v1203_v32 = vpop.f32.mrf.mxu3 }
 0x35a   : > { %v5705_v17 = vadd.f32 %v1203_v32, %v5594_v47  ;;  %v1764_v6 = vadd.f32 %v4144_v52, %v1763_v40 }
 0x35c   : > { %2010 = vadd.xlane.f32.xlu2 %v5705_v17  ;;  %v1768_v7 = vsel %vm1767_vm13, %v4144_v52, %v1764_v6  ;;  %v1024_v52 = vpop.f32.mrf.mxu1 }
 0x35d   : > { %v1773_v61 = vsel %vm1770_vm14, %v1772_v33, %v1768_v7  ;;  %v5721_v38 = vadd.f32 %v1024_v52, %v5122_v13  ;;  %v5741_v7 = vpop.xlane.xlu2 %1358 }
 0x35e   : > { %v5710_v60 = vmul.f32 %v3158_v39, %v1773_v61 }
 0x360   : > { %8362 = vst [vmem:[#allocation28_spill] sm:$0xff] %v5710_v60 }
 0x361   : > { %v1206_v49 = vpop.f32.mrf.mxu3 }
 0x362   : > { %v5713_v16 = vadd.f32 %v1206_v49, %v5594_v47 }
 0x364   : > { %2012 = vadd.xlane.f32.xlu0 %v5713_v16 }
 0x365   : > { %v5748_v39 = vpop.xlane.xlu2 %1360 }
 0x369   : > { %v1209_v24 = vpop.f32.mrf.mxu3 }
 0x36a   : > { %v5717_v26 = vadd.f32 %v1209_v24, %v5594_v47  ;;  %v5752_v24 = vpop.xlane.xlu1 %1268 }
 0x36c   : > { %2014 = vadd.xlane.f32.xlu2 %v5717_v26 }
 0x36d   : > { %v5750_v49 = vpop.xlane.xlu2 %1362 }
 0x371   : > { %v1212_v44 = vpop.f32.mrf.mxu3 }
 0x372   : > { %v5724_v56 = vadd.f32 %v1212_v44, %v5594_v47 }
 0x374   : > { %2016 = vadd.xlane.f32.xlu1 %v5724_v56  ;;  %2778 = vadd.xlane.f32.xlu2 %v5721_v38 }
 0x379   : > { %v1215_v21 = vpop.f32.mrf.mxu3 }
 0x37a   : > { %v5729_v40 = vadd.f32 %v1215_v21, %v5594_v47 }
 0x37c   : > { %2018 = vadd.xlane.f32.xlu0 %v5729_v40 }
 0x381   : > { %v1218_v32 = vpop.f32.mrf.mxu3 }
 0x382   : > { %v5735_v30 = vadd.f32 %v1218_v32, %v5594_v47 }
 0x384   : > { %2020 = vadd.xlane.f32.xlu0 %v5735_v30 }
 0x389   : > { %v1221_v6 = vpop.f32.mrf.mxu3 }
 0x38a   : > { %v5739_v12 = vadd.f32 %v1221_v6, %v5594_v47  ;;  %v1159_v6 = vpop.f32.mrf.mxu2 }
 0x38c   : > { %2022 = vadd.xlane.f32.xlu0 %v5739_v12 }
 0x391   : > { %v1224_v33 = vpop.f32.mrf.mxu3 }
 0x392   : > { %v5745_v61 = vadd.f32 %v1224_v33, %v5594_v47  ;;  %v1162_v18 = vpop.f32.mrf.mxu2 }
 0x394   : > { %2024 = vadd.xlane.f32.xlu0 %v5745_v61 }
 0x3a7   : > { %v2001_v52 = vpop.xlane.xlu2 %2000 }
 0x3a8   : > { %v2036_v44 = vmul.f32 0.03125, %v2001_v52 }
 0x3aa   : > { %v5755_v21 = vsub.f32 %v5604_v58, %v2036_v44  ;;  %v5768_v58 = vadd.f32 %v1159_v6, %v5338_v15 }
 0x3ac   : > { %v2072_v32 = vmul.f32 %v5755_v21, %v5755_v21 }
 0x3ae   : > { %v2090_v33 = vmul.f32 %v2072_v32, %v5182_v8 }
 0x3af   : > { %v2003_v55 = vpop.xlane.xlu1 %2002  ;;  %v5771_v1 = vpop.xlane.xlu2 %2776 }
 0x3b0   : > { %v2037_v60 = vmul.f32 0.03125, %v2003_v55  ;;  %2108 = vadd.xlane.f32.xlu1 %v2090_v33  ;;  %v2798_v55 = vmul.f32 0.03125, %v5460_v3  ;;  %v1227_v33 = vpop.f32.mrf.mxu3 }
 0x3b2   : > { %v5763_v50 = vsub.f32 %v5624_v63, %v2037_v60  ;;  %v1286_v63 = vmul.f32 0.03125, %v5546_v53  ;;  %v5792_v53 = vadd.f32 %v1162_v18, %v5338_v15 }
 0x3b4   : > { %v2073_v52 = vmul.f32 %v5763_v50, %v5763_v50  ;;  %v5785_v27 = vsub.f32 %v5397_v22, %v1286_v63 }
 0x3b6   : > { %v2091_v44 = vmul.f32 %v2073_v52, %v5182_v8  ;;  %v8364_v52 = vld [vmem:[#allocation24_spill] sm:$0xff]  ;;  %8366 = vst [vmem:[#allocation53_spill] sm:$0xff] %v5785_v27 }
 0x3b7   : > { %v2005_v37 = vpop.xlane.xlu0 %2004  ;;  %v5782_v59 = vsub.f32 %v8364_v52, %v2798_v55  ;;  %v1287_v52 = vmul.f32 0.03125, %v5533_v25 }
 0x3b8   : > { %v2038_v32 = vmul.f32 0.03125, %v2005_v37  ;;  %2110 = vadd.xlane.f32.xlu0 %v2091_v44  ;;  %1270 = vadd.xlane.f32.xlu1 %v5768_v58  ;;  %v5788_v37 = vadd.f32 %v1227_v33, %v5594_v47  ;;  %v5796_v44 = vpop.xlane.xlu2 %1364  ;;  %v1027_v33 = vpop.f32.mrf.mxu1 }
 0x3b9   : > { %8365 = vst [vmem:[#allocation24_spill] sm:$0xff] %v5782_v59  ;;  %v2834_v22 = vmul.f32 %v5782_v59, %v5782_v59  ;;  %v1230_v59 = vpop.f32.mrf.mxu3 }
 0x3ba   : > { %v5777_v60 = vsub.f32 %v5651_v9, %v2038_v32  ;;  %v1165_v9 = vpop.f32.mrf.mxu2  ;;  %v1322_v32 = vmul.f32 %v5785_v27, %v5785_v27 }
 0x3bb   : > { %v2852_v55 = vmul.f32 %v2834_v22, %v5182_v8  ;;  %v5805_v18 = vadd.f32 %v1165_v9, %v5338_v15  ;;  %v5812_v22 = vadd.f32 %v1027_v33, %v5122_v13 }
 0x3bc   : > { %8363 = vst [vmem:[#allocation52_spill] sm:$0xff] %v5777_v60  ;;  %v2074_v6 = vmul.f32 %v5777_v60, %v5777_v60  ;;  %v1340_v63 = vmul.f32 %v1322_v32, %v5182_v8  ;;  %v8367_v32 = vld [vmem:[#allocation25_spill] sm:$0xff] }
 0x3be   : > { %v2092_v3 = vmul.f32 %v2074_v6, %v5182_v8  ;;  %v2799_v6 = vmul.f32 0.03125, %v5414_v5 }
 0x3c0   : > { %2026 = vadd.xlane.f32.xlu0 %v5788_v37  ;;  %2112 = vadd.xlane.f32.xlu2 %v2092_v3  ;;  %v1290_v3 = vmul.f32 0.03125, %v5551_v48  ;;  %v2007_v60 = vpop.xlane.xlu2 %2006  ;;  %v5815_v9 = vsub.f32 %v8367_v32, %v2799_v6  ;;  %v2800_v32 = vmul.f32 0.03125, %v5419_v10 }
 0x3c1   : > { %1272 = vadd.xlane.f32.xlu1 %v5792_v53 }
 0x3c2   : > { %v1168_v27 = vpop.f32.mrf.mxu2  ;;  %8368 = vst [vmem:[#allocation25_spill] sm:$0xff] %v5815_v9  ;;  %v5827_v25 = vsub.f32 %v5425_v35, %v1290_v3  ;;  %v2835_v48 = vmul.f32 %v5815_v9, %v5815_v9  ;;  %v1030_v3 = vpop.f32.mrf.mxu1 }
 0x3c3   : > { %v5824_v5 = vadd.f32 %v1168_v27, %v5338_v15  ;;  %v1233_v9 = vpop.f32.mrf.mxu3 }
 0x3c4   : > { %8369 = vst [vmem:[#allocation54_spill] sm:$0xff] %v5827_v25  ;;  %v1326_v15 = vmul.f32 %v5827_v25, %v5827_v25  ;;  %v2853_v35 = vmul.f32 %v2835_v48, %v5182_v8  ;;  %v5859_v10 = vadd.f32 %v1233_v9, %v5594_v47 }
 0x3c8   : > { %2874 = vadd.xlane.f32.xlu0 %v2852_v55  ;;  %1366 = vadd.xlane.f32.xlu2 %v1340_v63  ;;  %v5818_v55 = vsub.f32 %v5403_v36, %v1287_v52  ;;  %v5821_v63 = vadd.f32 %v1230_v59, %v5594_v47  ;;  %v2039_v59 = vmul.f32 0.03125, %v2007_v60  ;;  %v2009_v27 = vpop.xlane.xlu2 %2008  ;;  %v1344_v52 = vmul.f32 %v1326_v15, %v5182_v8 }
 0x3c9   : > { %1274 = vadd.xlane.f32.xlu1 %v5805_v18  ;;  %v1288_v60 = vmul.f32 0.03125, %v5538_v34  ;;  %v2040_v25 = vmul.f32 0.03125, %v2009_v27 }
 0x3ca   : > { %v1323_v36 = vmul.f32 %v5818_v55, %v5818_v55  ;;  %v5841_v6 = vsub.f32 %v5677_v4, %v2039_v59  ;;  %v1389_v4 = vmul.f32 0.03125, %v5732_v41  ;;  %v8370_v59 = vld [vmem:[#allocation27_spill] sm:$0xff] }
 0x3cb   : > { %v5853_v15 = vsub.f32 %v8370_v59, %v2800_v32  ;;  %v5862_v34 = vsub.f32 %v5694_v11, %v2040_v25  ;;  %v1033_v59 = vpop.f32.mrf.mxu1 }
 0x3cc   : > { %v1341_v33 = vmul.f32 %v1323_v36, %v5182_v8  ;;  %v2075_v48 = vmul.f32 %v5841_v6, %v5841_v6  ;;  %v5849_v36 = vadd.f32 %v1030_v3, %v5122_v13  ;;  %v5867_v41 = vadd.f32 1e-05, %v1389_v4 }
 0x3cd   : > { %8371 = vst [vmem:[#allocation27_spill] sm:$0xff] %v5853_v15  ;;  %v2076_v11 = vmul.f32 %v5862_v34, %v5862_v34  ;;  %v1390_v4 = vmul.f32 0.03125, %v5741_v7 }
 0x3ce   : > { %8373 = vst [vmem:[#allocation56_spill] sm:$0xff] %v5862_v34  ;;  %v2093_v27 = vmul.f32 %v2075_v48, %v5182_v8  ;;  %4145 = vrsqrt.f32 %v5867_v41  ;;  %vm1458_vm0 = vweird.f32 %v5867_v41 }
 0x3cf   : > { %v2094_v48 = vmul.f32 %v2076_v11, %v5182_v8  ;;  %v5892_v11 = vadd.f32 1e-05, %v1390_v4 }
 0x3d0   : > { %2028 = vadd.xlane.f32.xlu0 %v5821_v63  ;;  %2780 = vadd.xlane.f32.xlu2 %v5812_v22 }
 0x3d1   : > { %1276 = vadd.xlane.f32.xlu1 %v5824_v5  ;;  %4147 = vrsqrt.f32 %v5892_v11  ;;  %vm1468_vm2 = vweird.f32 %v5892_v11 }
 0x3d8   : > { %2876 = vadd.xlane.f32.xlu0 %v2853_v35  ;;  %1368 = vadd.xlane.f32.xlu2 %v1341_v33  ;;  %v5856_v35 = vsub.f32 %v5409_v20, %v1288_v60  ;;  %v2011_v33 = vpop.xlane.xlu2 %2010  ;;  %v2836_v20 = vmul.f32 %v5853_v15, %v5853_v15  ;;  %v2013_v60 = vpop.xlane.xlu0 %2012 }
 0x3d9   : > { %1374 = vadd.xlane.f32.xlu1 %v1344_v52  ;;  %v2041_v52 = vmul.f32 0.03125, %v2011_v33  ;;  %v1289_v33 = vmul.f32 0.03125, %v5543_v19  ;;  %v5885_v15 = vpop.eup %4145 }
 0x3da   : > { %8372 = vst [vmem:[#allocation55_spill] sm:$0xff] %v5856_v35  ;;  %v1324_v9 = vmul.f32 %v5856_v35, %v5856_v35  ;;  %v2854_v25 = vmul.f32 %v2836_v20, %v5182_v8  ;;  %v1236_v20 = vpop.f32.mrf.mxu3  ;;  %vm1459_vm15 = vweird.f32 %v5885_v15 }
 0x3db   : > { %v5879_v32 = vsub.f32 %v5705_v17, %v2041_v52  ;;  %v5890_v52 = vadd.f32 %v1033_v59, %v5122_v13  ;;  %v5903_v19 = vadd.f32 %v1236_v20, %v5594_v47  ;;  %vm1460_vm3 = vmor %vm1458_vm0, %vm1459_vm15 }
 0x3dc   : > { %v1342_v3 = vmul.f32 %v1324_v9, %v5182_v8  ;;  %v2042_v9 = vmul.f32 0.03125, %v2013_v60 }
 0x3dd   : > { %8374 = vst [vmem:[#allocation57_spill] sm:$0xff] %v5879_v32  ;;  %v2077_v17 = vmul.f32 %v5879_v32, %v5879_v32 }
 0x3de   : > { %v5906_v60 = vsub.f32 %v5713_v16, %v2042_v9 }
 0x3df   : > { %v2095_v59 = vmul.f32 %v2077_v17, %v5182_v8  ;;  %v1391_v17 = vmul.f32 0.03125, %v5748_v39  ;;  %v1291_v39 = vmul.f32 0.03125, %v5752_v24 }
 0x3e0   : > { %2030 = vadd.xlane.f32.xlu0 %v5859_v10  ;;  %2782 = vadd.xlane.f32.xlu2 %v5849_v36  ;;  %8378 = vst [vmem:[#allocation59_spill] sm:$0xff] %v5906_v60  ;;  %v2015_v4 = vpop.xlane.xlu2 %2014  ;;  %v2078_v20 = vmul.f32 %v5906_v60, %v5906_v60 }
 0x3e1   : > { %2114 = vadd.xlane.f32.xlu1 %v2093_v27  ;;  %v2801_v27 = vmul.f32 0.03125, %v5430_v43  ;;  %v1453_v43 = vmul.f32 %v5885_v15, %v5867_v41 }
 0x3e2   : > { %v1239_v32 = vpop.f32.mrf.mxu3 }
 0x3e8   : > { %2878 = vadd.xlane.f32.xlu0 %v2854_v25  ;;  %1370 = vadd.xlane.f32.xlu2 %v1342_v3  ;;  %v8375_v25 = vld [vmem:[#allocation29_spill] sm:$0xff]  ;;  %v5898_v3 = vsub.f32 %v5417_v31, %v1289_v33  ;;  %v1454_v31 = vmul.f32 %v5885_v15, %v1453_v43  ;;  %v2043_v33 = vmul.f32 0.03125, %v2015_v4  ;;  %v2017_v4 = vpop.xlane.xlu1 %2016 }
 0x3e9   : > { %2116 = vadd.xlane.f32.xlu1 %v2094_v48  ;;  %v5895_v7 = vsub.f32 %v8375_v25, %v2801_v27  ;;  %v2044_v34 = vmul.f32 0.03125, %v2017_v4 }
 0x3ea   : > { %8377 = vst [vmem:[#allocation58_spill] sm:$0xff] %v5898_v3  ;;  %v1325_v16 = vmul.f32 %v5898_v3, %v5898_v3  ;;  %v1455_v9 = vmul.f32 0.5, %v1454_v31  ;;  %v5925_v43 = vsub.f32 %v5717_v26, %v2043_v33  ;;  %v2096_v3 = vmul.f32 %v2078_v20, %v5182_v8 }
 0x3eb   : > { %8376 = vst [vmem:[#allocation29_spill] sm:$0xff] %v5895_v7  ;;  %v2837_v27 = vmul.f32 %v5895_v7, %v5895_v7  ;;  %v2802_v31 = vmul.f32 0.03125, %v5436_v46  ;;  %v5935_v33 = vadd.f32 1e-05, %v1391_v17  ;;  %v8379_v46 = vld [vmem:[#allocation30_spill] sm:$0xff]  ;;  %v5958_v4 = vsub.f32 %v5724_v56, %v2044_v34 }
 0x3ec   : > { %v1343_v35 = vmul.f32 %v1325_v16, %v5182_v8  ;;  %v1036_v16 = vpop.f32.mrf.mxu1  ;;  %v1456_v60 = vsub.f32 1.5, %v1455_v9  ;;  %v2079_v20 = vmul.f32 %v5925_v43, %v5925_v43 }
 0x3ed   : > { %v2855_v25 = vmul.f32 %v2837_v27, %v5182_v8  ;;  %v1392_v27 = vmul.f32 0.03125, %v5750_v49  ;;  %v5943_v24 = vsub.f32 %v8379_v46, %v2802_v31  ;;  %v5946_v49 = vsub.f32 %v5472_v57, %v1291_v39 }
 0x3ee   : > { %v1457_v9 = vmul.f32 %v5885_v15, %v1456_v60  ;;  %4149 = vrsqrt.f32 %v5935_v33  ;;  %v2097_v57 = vmul.f32 %v2079_v20, %v5182_v8  ;;  %v2080_v41 = vmul.f32 %v5958_v4, %v5958_v4 }
 0x3ef   : > { %v2019_v48 = vpop.xlane.xlu0 %2018  ;;  %8380 = vst [vmem:[#allocation30_spill] sm:$0xff] %v5943_v24  ;;  %v1327_v56 = vmul.f32 %v5946_v49, %v5946_v49  ;;  %v2838_v34 = vmul.f32 %v5943_v24, %v5943_v24  ;;  %vm1478_vm6 = vweird.f32 %v5935_v33 }
 0x3f0   : > { %2032 = vadd.xlane.f32.xlu0 %v5903_v19  ;;  %2784 = vadd.xlane.f32.xlu2 %v5890_v52  ;;  %v2045_v60 = vmul.f32 0.03125, %v2019_v48  ;;  %v1393_v48 = vmul.f32 0.03125, %v5796_v44 }
 0x3f1   : > { %2118 = vadd.xlane.f32.xlu1 %v2095_v59  ;;  %v5922_v59 = vpop.eup %4147  ;;  %v1345_v20 = vmul.f32 %v1327_v56, %v5182_v8 }
 0x3f2   : > { %v1463_v26 = vmul.f32 %v5922_v59, %v5892_v11  ;;  %vm1469_vm1 = vweird.f32 %v5922_v59 }
 0x3f3   : > { %vm1470_vm4 = vmor %vm1468_vm2, %vm1469_vm1 }
 0x3f4   : > { %v1464_v17 = vmul.f32 %v5922_v59, %v1463_v26  ;;  %v5974_v39 = vpop.eup %4149 }
 0x3f5   : > { %vm1479_vm5 = vweird.f32 %v5974_v39 }
 0x3f6   : > { %vm1480_vm7 = vmor %vm1478_vm6, %vm1479_vm5 }
 0x3f7   : > { %v5927_v7 = vpop.xlane.xlu0 %2020 }
 0x3f8   : > { %2880 = vadd.xlane.f32.xlu0 %v2855_v25  ;;  %1372 = vadd.xlane.f32.xlu2 %v1343_v35  ;;  %v5940_v35 = vadd.f32 %v1036_v16, %v5122_v13  ;;  %v5955_v25 = vadd.f32 %v1239_v32, %v5594_v47  ;;  %v1461_v47 = vsel %vm1460_vm3, %v5885_v15, %v1457_v9  ;;  %v1465_v32 = vmul.f32 0.5, %v1464_v17  ;;  %v1039_v16 = vpop.f32.mrf.mxu1  ;;  %v2779_v17 = vpop.xlane.xlu2 %2778 }
 0x3f9   : > { %2120 = vadd.xlane.f32.xlu1 %v2096_v3  ;;  %v5949_v3 = vadd.f32 1e-05, %v1392_v27  ;;  %v1605_v27 = vmul.f32 %v1461_v47, %v5481_v54  ;;  %v2856_v15 = vmul.f32 %v2838_v34, %v5182_v8  ;;  %v1473_v9 = vmul.f32 %v5974_v39, %v5935_v33 }
 0x3fa   : > { %v1466_v26 = vsub.f32 1.5, %v1465_v32  ;;  %v2098_v54 = vmul.f32 %v2080_v41, %v5182_v8  ;;  %v2804_v34 = vmul.f32 0.03125, %v2779_v17  ;;  %v5997_v41 = vadd.f32 1e-05, %v1393_v48 }
 0x3fb   : > { %4151 = vrsqrt.f32 %v5949_v3  ;;  %v1624_v32 = vmul.f32 %v5573_v62, %v1605_v27  ;;  %vm1488_vm9 = vweird.f32 %v5949_v3 }
 0x3fc   : > { %v1467_v56 = vmul.f32 %v5922_v59, %v1466_v26  ;;  %v6004_v26 = vadd.f32 %v1039_v16, %v5122_v13  ;;  %v6015_v48 = vsub.f32 %v5721_v38, %v2804_v34  ;;  %4153 = vrsqrt.f32 %v5997_v41 }
 0x3fd   : > { %vm1498_vm12 = vweird.f32 %v5997_v41 }
 0x3fe   : > { %8382 = vst [vmem:[#allocation61_spill] sm:$0xff] %v6015_v48 }
 0x3ff   : > { %v5960_v31 = vpop.xlane.xlu0 %2022 }
 0x400   : > { %2786 = vadd.xlane.f32.xlu2 %v5940_v35  ;;  %2034 = vadd.xlane.f32.xlu0 %v5955_v25 }
 0x401   : > { %2122 = vadd.xlane.f32.xlu1 %v2097_v57  ;;  %v5979_v46 = vpop.eup %4151  ;;  %v5985_v57 = vsub.f32 %v5729_v40, %v2045_v60  ;;  %v1474_v60 = vmul.f32 %v5974_v39, %v1473_v9 }
 0x402   : > { %v1483_v44 = vmul.f32 %v5979_v46, %v5949_v3  ;;  %vm1489_vm8 = vweird.f32 %v5979_v46 }
 0x403   : > { %v2081_v27 = vmul.f32 %v5985_v57, %v5985_v57  ;;  %v1475_v16 = vmul.f32 0.5, %v1474_v60  ;;  %v6034_v60 = vpop.eup %4153  ;;  %vm1490_vm10 = vmor %vm1488_vm9, %vm1489_vm8 }
 0x404   : > { %v1484_v9 = vmul.f32 %v5979_v46, %v1483_v44  ;;  %vm1499_vm11 = vweird.f32 %v6034_v60 }
 0x405   : > { %v1476_v44 = vsub.f32 1.5, %v1475_v16  ;;  %vm6089_vm13 = vmor %vm1498_vm12, %vm1499_vm11 }
 0x407   : > { %v2025_v24 = vpop.xlane.xlu0 %2024 }
 0x408   : > { %v2048_v47 = vmul.f32 0.03125, %v2025_v24  ;;  %1376 = vadd.xlane.f32.xlu2 %v1345_v20  ;;  %2882 = vadd.xlane.f32.xlu0 %v2856_v15  ;;  %v2046_v24 = vmul.f32 0.03125, %v5927_v7  ;;  %v1643_v15 = vadd.f32 %v5579_v0, %v1624_v32  ;;  %v1471_v7 = vsel %vm1470_vm4, %v5922_v59, %v1467_v56 }
 0x409   : > { %2124 = vadd.xlane.f32.xlu1 %v2098_v54  ;;  %v6023_v54 = vpop.f32.mrf.mxu1  ;;  %v1485_v32 = vmul.f32 0.5, %v1484_v9  ;;  %v2840_v56 = vmul.f32 %v6015_v48, %v6015_v48  ;;  %v3229_v48 = vld [vmem:[#allocation11 + $0x8] sm:$0xff] }
 0x40a   : > { %v5994_v40 = vsub.f32 %v5745_v61, %v2048_v47  ;;  %v2905_v61 = vmul.f32 0.03125, %v5760_v45  ;;  %v6020_v17 = vsub.f32 %v5735_v30, %v2046_v24  ;;  %v2099_v45 = vmul.f32 %v2081_v27, %v5182_v8 }
 0x40b   : > { %v1661_v38 = vsub.f32 0.0, %v1643_v15  ;;  %v1606_v47 = vmul.f32 %v1471_v7, %v5493_v29  ;;  %v2047_v30 = vmul.f32 0.03125, %v5960_v31  ;;  %v2858_v29 = vmul.f32 %v2840_v56, %v5182_v8 }
 0x40c   : > { %8381 = vst [vmem:[#allocation60_spill] sm:$0xff] %v5994_v40  ;;  %v2084_v20 = vmul.f32 %v5994_v40, %v5994_v40  ;;  %v6026_v59 = vadd.f32 1e-05, %v2905_v61  ;;  %v2082_v34 = vmul.f32 %v6020_v17, %v6020_v17  ;;  %v1477_v61 = vmul.f32 %v5974_v39, %v1476_v44 }
 0x40d   : > { %8383 = vst [vmem:[#allocation62_spill] sm:$0xff] %v6020_v17  ;;  %v1682_v24 = vmul.f32 1.442695, %v1661_v38  ;;  %v1625_v27 = vmul.f32 %v5573_v62, %v1606_v47  ;;  %v6042_v15 = vsub.f32 %v5739_v12, %v2047_v30  ;;  %v1493_v7 = vmul.f32 %v6034_v60, %v5997_v41 }
 0x40e   : > { %v2102_v11 = vmul.f32 %v2084_v20, %v5182_v8  ;;  %4155 = vrsqrt.f32 %v6026_v59  ;;  %v1486_v20 = vsub.f32 1.5, %v1485_v32  ;;  %v2100_v31 = vmul.f32 %v2082_v34, %v5182_v8 }
 0x40f   : > { %8384 = vst [vmem:[#allocation63_spill] sm:$0xff] %v6042_v15  ;;  %4157 = vpow2.f32 %v1682_v24  ;;  %v2803_v38 = vmul.f32 0.03125, %v5771_v1  ;;  %v2083_v47 = vmul.f32 %v6042_v15, %v6042_v15  ;;  %v1494_v33 = vmul.f32 %v6034_v60, %v1493_v7 }
 0x410   : > { %2132 = vadd.xlane.f32.xlu2 %v2102_v11  ;;  %2788 = vadd.xlane.f32.xlu0 %v6004_v26  ;;  %v1644_v11 = vadd.f32 %v5579_v0, %v1625_v27  ;;  %v1487_v16 = vmul.f32 %v5979_v46, %v1486_v20  ;;  %v6100_v41 = vadd.f32 %v6023_v54, %v5122_v13  ;;  %vm2974_vm15 = vweird.f32 %v6026_v59 }
 0x411   : > { %2126 = vadd.xlane.f32.xlu1 %v2099_v45  ;;  %v1045_v9 = vpop.f32.mrf.mxu1  ;;  %v1481_v45 = vsel %vm1480_vm7, %v5974_v39, %v1477_v61  ;;  %v6067_v1 = vsub.f32 %v5615_v14, %v2803_v38  ;;  %v2101_v34 = vmul.f32 %v2083_v47, %v5182_v8  ;;  %v1495_v24 = vmul.f32 0.5, %v1494_v33 }
 0x412   : > { %v6060_v32 = vadd.f32 %v1045_v9, %v5122_v13  ;;  %v1662_v56 = vsub.f32 0.0, %v1644_v11  ;;  %v1607_v44 = vmul.f32 %v1481_v45, %v5502_v23  ;;  %v1491_v30 = vsel %vm1490_vm10, %v5979_v46, %v1487_v16  ;;  %v3243_v9 = vld [vmem:[#allocation11 + $0x78] sm:$0xff]  ;;  %v3242_v45 = vld [vmem:[#allocation11 + $0x70] sm:$0xff]  ;;  %8389 = vst [vmem:[#allocation66_spill] sm:$0xff] %v6100_v41  ;;  %v3237_v13 = vld [vmem:[#allocation11 + $0x48] sm:$0xff] }
 0x413   : > { %8386 = vst [vmem:[#allocation65_spill] sm:$0xff] %v6067_v1  ;;  %v1608_v27 = vmul.f32 %v1491_v30, %v5511_v51  ;;  %v2839_v14 = vmul.f32 %v6067_v1, %v6067_v1  ;;  %3245 = vmatpush.msra.mxu0 %v3243_v9  ;;  %v3228_v1 = vld [vmem:[#allocation11] sm:$0xff] }
 0x414   : > { %v6051_v12 = vpop.eup %4155  ;;  %8385 = vst [vmem:[#allocation64_spill] sm:$0xff] %v6060_v32  ;;  %v1684_v20 = vmul.f32 1.442695, %v1662_v56  ;;  %v1626_v23 = vmul.f32 %v5573_v62, %v1607_v44  ;;  %v3241_v56 = vld [vmem:[#allocation11 + $0x68] sm:$0xff] }
 0x415   : > { %v2969_v39 = vmul.f32 %v6051_v12, %v6026_v59  ;;  %v4158_v3 = vpop.eup %4157  ;;  %v1627_v11 = vmul.f32 %v5573_v62, %v1608_v27  ;;  %v2857_v47 = vmul.f32 %v2839_v14, %v5182_v8  ;;  %3246 = vmatpush.msra.mxu0 %v3242_v45  ;;  %vm2975_vm14 = vweird.f32 %v6051_v12 }
 0x416   : > { %4159 = vpow2.f32 %v1684_v20  ;;  %v1645_v51 = vadd.f32 %v5579_v0, %v1626_v23  ;;  %vm6117_vm0 = vmor %vm2974_vm15, %vm2975_vm14 }
 0x417   : > { %v2970_v46 = vmul.f32 %v6051_v12, %v2969_v39  ;;  %v1646_v44 = vadd.f32 %v5579_v0, %v1627_v11  ;;  %3247 = vmatpush.msra.mxu0 %v3241_v56  ;;  %v3240_v39 = vld [vmem:[#allocation11 + $0x60] sm:$0xff] }
 0x418   : > { %2886 = vadd.xlane.f32.xlu2 %v2858_v29  ;;  %v6074_v29 = vadd.f32 1.0, %v4158_v3  ;;  %v1663_v30 = vsub.f32 0.0, %v1645_v51  ;;  %v3238_v51 = vld [vmem:[#allocation11 + $0x50] sm:$0xff] }
 0x419   : > { %2128 = vadd.xlane.f32.xlu1 %v2100_v31  ;;  %v1496_v31 = vsub.f32 1.5, %v1495_v24  ;;  %v2971_v38 = vmul.f32 0.5, %v2970_v46  ;;  %3248 = vmatpush.msra.mxu0 %v3240_v39 }
 0x41a   : > { %4161 = vrcp.f32 %v6074_v29  ;;  %v1686_v9 = vmul.f32 1.442695, %v1663_v30  ;;  %vm1780_vm8 = vweird.f32 %v6074_v29 }
 0x41b   : > { %v1497_v33 = vmul.f32 %v6034_v60, %v1496_v31  ;;  %v1664_v31 = vsub.f32 0.0, %v1646_v44  ;;  %v3236_v44 = vld [vmem:[#allocation11 + $0x40] sm:$0xff] }
 0x41c   : > { %v4160_v20 = vpop.eup %4159 }
 0x41d   : > { %v1501_v23 = vsel %vm6089_vm13, %v6034_v60, %v1497_v33  ;;  %v6106_v60 = vadd.f32 1.0, %v4160_v20  ;;  %v1688_v54 = vmul.f32 1.442695, %v1664_v31 }
 0x41f   : > { %vm1795_vm15 = vweird.f32 %v6106_v60 }
 0x420   : > { %2792 = vadd.xlane.f32.xlu2 %v6060_v32  ;;  %v6096_v14 = vpop.eup %4161 }
 0x421   : > { %2130 = vadd.xlane.f32.xlu1 %v2101_v34  ;;  %v2972_v34 = vsub.f32 1.5, %v2971_v38  ;;  %v1609_v38 = vmul.f32 %v1501_v23, %v5621_v42  ;;  %v1776_v56 = vmul.f32 %v6096_v14, %v6074_v29  ;;  %vm1781_vm5 = vweird.f32 %v6096_v14 }
 0x422   : > { %vm6202_vm9 = vmor %vm1780_vm8, %vm1781_vm5 }
 0x423   : > { %v2109_v61 = vpop.xlane.xlu1 %2108  ;;  %v2973_v45 = vmul.f32 %v6051_v12, %v2972_v34  ;;  %v1628_v30 = vmul.f32 %v5573_v62, %v1609_v38  ;;  %v1777_v31 = vsub.f32 1.0, %v1776_v56  ;;  %v4411_v56 = vld [vmem:[#allocation13] sm:$0xff] }
 0x424   : > { %v2144_v7 = vmul.f32 0.03125, %v2109_v61  ;;  %v3239_v61 = vld [vmem:[#allocation11 + $0x58] sm:$0xff]  ;;  %v6140_v42 = vperm.slane %v4411_v56, 4 }
 0x425   : > { %3249 = vmatpush.msra.mxu0 %v3239_v61  ;;  %v2977_v59 = vsel %vm6117_vm0, %v6051_v12, %v2973_v45 }
 0x426   : > { %v6080_v16 = vadd.f32 1e-05, %v2144_v7  ;;  %v3121_v38 = vmul.f32 %v2977_v59, %v5476_v28  ;;  %v3234_v28 = vld [vmem:[#allocation11 + $0x30] sm:$0xff]  ;;  %v1778_v59 = vmul.f32 %v6096_v14, %v1777_v31  ;;  %v1786_v31 = vand.u32 2147483648, %v6074_v29 }
 0x427   : > { %3250 = vmatpush.msra.mxu0 %v3238_v51 }
 0x428   : > { %4163 = vrsqrt.f32 %v6080_v16  ;;  %vm2186_vm1 = vweird.f32 %v6080_v16 }
 0x429   : > { %2884 = vadd.xlane.f32.xlu1 %v2857_v47  ;;  %3251 = vmatpush.msra.mxu0 %v3237_v13 }
 0x42b   : > { %v2111_v24 = vpop.xlane.xlu0 %2110  ;;  %v1271_v27 = vpop.xlane.xlu1 %1270  ;;  %3252 = vmatpush.msra.mxu0 %v3236_v44 }
 0x42c   : > { %v2145_v46 = vmul.f32 0.03125, %v2111_v24  ;;  %v1292_v12 = vmul.f32 0.03125, %v1271_v27 }
 0x42e   : > { %v4164_v7 = vpop.eup %4163  ;;  %v6103_v11 = vadd.f32 1e-05, %v2145_v46  ;;  %v3235_v46 = vld [vmem:[#allocation11 + $0x38] sm:$0xff] }
 0x42f   : > { %v2181_v47 = vmul.f32 %v4164_v7, %v6080_v16  ;;  %vm2187_vm3 = vweird.f32 %v4164_v7  ;;  %3253 = vmatpush.msra.mxu0 %v3235_v46 }
 0x430   : > { %4165 = vrsqrt.f32 %v6103_v11  ;;  %vm2188_vm2 = vmor %vm2186_vm1, %vm2187_vm3  ;;  %vm2196_vm6 = vweird.f32 %v6103_v11 }
 0x431   : > { %v2182_v33 = vmul.f32 %v4164_v7, %v2181_v47  ;;  %2790 = vadd.xlane.f32.xlu1 %v6100_v41  ;;  %4167 = vpow2.f32 %v1686_v9  ;;  %v1647_v47 = vadd.f32 %v5579_v0, %v1628_v30  ;;  %3254 = vmatpush.msra.mxu0 %v3234_v28  ;;  %v4412_v30 = vld [vmem:[#allocation13 + $0x8] sm:$0xff] }
 0x432   : > { %4169 = vrcp.f32 %v6106_v60 }
 0x433   : > { %v2183_v39 = vmul.f32 0.5, %v2182_v33  ;;  %v2027_v34 = vpop.xlane.xlu0 %2026  ;;  %v2113_v3 = vpop.xlane.xlu2 %2112  ;;  %4171 = vpow2.f32 %v1688_v54 }
 0x434   : > { %v2049_v24 = vmul.f32 0.03125, %v2027_v34  ;;  %v6126_v20 = vpop.xlane.xlu1 %1272  ;;  %v2146_v23 = vmul.f32 0.03125, %v2113_v3  ;;  %v6154_v3 = vsub.f32 %v5768_v58, %v1292_v12 }
 0x435   : > { %v2184_v61 = vsub.f32 1.5, %v2183_v39  ;;  %v6150_v39 = vperm.slane %v4412_v30, 4 }
 0x436   : > { %v6128_v9 = vpop.eup %4165  ;;  %v6131_v51 = vsub.f32 %v5788_v37, %v2049_v24  ;;  %v6133_v45 = vadd.f32 1e-05, %v2146_v23  ;;  %8393 = vst [vmem:[#allocation68_spill] sm:$0xff] %v6154_v3  ;;  %v3233_v23 = vld [vmem:[#allocation11 + $0x28] sm:$0xff] }
 0x437   : > { %v2185_v13 = vmul.f32 %v4164_v7, %v2184_v61  ;;  %v2191_v54 = vmul.f32 %v6128_v9, %v6103_v11  ;;  %v4168_v33 = vpop.eup %4167  ;;  %v1665_v61 = vsub.f32 0.0, %v1647_v47  ;;  %3255 = vmatpush.msra.mxu0 %v3233_v23  ;;  %vm2197_vm4 = vweird.f32 %v6128_v9  ;;  %v3231_v23 = vld [vmem:[#allocation11 + $0x18] sm:$0xff] }
 0x438   : > { %8392 = vst [vmem:[#allocation67_spill] sm:$0xff] %v6131_v51  ;;  %4173 = vrsqrt.f32 %v6133_v45  ;;  %v2085_v37 = vmul.f32 %v6131_v51, %v6131_v51  ;;  %v6146_v27 = vpop.eup %4169  ;;  %v6161_v28 = vadd.f32 1.0, %v4168_v33  ;;  %vm6187_vm7 = vmor %vm2196_vm6, %vm2197_vm4  ;;  %vm2206_vm13 = vweird.f32 %v6133_v45 }
 0x439   : > { %v2189_v44 = vsel %vm2188_vm2, %v4164_v7, %v2185_v13  ;;  %v2192_v16 = vmul.f32 %v6128_v9, %v2191_v54  ;;  %v4172_v46 = vpop.eup %4171  ;;  %v3140_v54 = vmul.f32 %v5660_v2, %v3121_v38  ;;  %v1791_v47 = vmul.f32 %v6146_v27, %v6106_v60 }
 0x43a   : > { %v2360_v34 = vmul.f32 %v2189_v44, %v5755_v21  ;;  %v2103_v24 = vmul.f32 %v2085_v37, %v5182_v8  ;;  %v3232_v37 = vld [vmem:[#allocation11 + $0x20] sm:$0xff]  ;;  %v6173_v33 = vadd.f32 1.0, %v4172_v46  ;;  %4175 = vrcp.f32 %v6161_v28 }
 0x43b   : > { %v2193_v56 = vmul.f32 0.5, %v2192_v16  ;;  %v6157_v7 = vpop.xlane.xlu0 %2874  ;;  %v1367_v13 = vpop.xlane.xlu2 %1366  ;;  %3256 = vmatpush.msra.mxu0 %v3232_v37  ;;  %v1779_v16 = vadd.f32 %v6096_v14, %v1778_v59  ;;  %vm1796_vm12 = vweird.f32 %v6146_v27  ;;  %vm1810_vm1 = vweird.f32 %v6161_v28 }
 0x43c   : > { %v2379_v21 = vmul.f32 %v6140_v42, %v2360_v34  ;;  %v6164_v58 = vpop.xlane.xlu1 %1274  ;;  %v1394_v12 = vmul.f32 0.03125, %v1367_v13  ;;  %2134 = vadd.xlane.f32.xlu0 %v2103_v24  ;;  %v1328_v24 = vmul.f32 %v6154_v3, %v6154_v3  ;;  %vm6270_vm3 = vmor %vm1795_vm15, %vm1796_vm12  ;;  %vm1825_vm4 = vweird.f32 %v6173_v33 }
 0x43d   : > { %v2194_v44 = vsub.f32 1.5, %v2193_v56  ;;  %v1690_v56 = vmul.f32 1.442695, %v1665_v61  ;;  %3257 = vmatpush.msra.mxu0 %v3231_v23  ;;  %v1792_v61 = vsub.f32 1.0, %v1791_v47  ;;  %v1294_v41 = vmul.f32 0.03125, %v6164_v58 }
 0x43e   : > { %v6171_v38 = vpop.eup %4173  ;;  %v2398_v30 = vadd.f32 %v6150_v39, %v2379_v21  ;;  %v6176_v34 = vadd.f32 1e-05, %v1394_v12  ;;  %v3230_v12 = vld [vmem:[#allocation11 + $0x10] sm:$0xff]  ;;  %v1346_v23 = vmul.f32 %v1328_v24, %v5182_v8 }
 0x43f   : > { %v2195_v13 = vmul.f32 %v6128_v9, %v2194_v44  ;;  %v2201_v59 = vmul.f32 %v6171_v38, %v6133_v45  ;;  %3258 = vmatpush.msra.mxu0 %v3230_v12  ;;  %v1784_v44 = vand.u32 2147483647, %v6074_v29  ;;  %v1783_v29 = vsel %vm6202_vm9, %v6096_v14, %v1779_v16 }
 0x440   : > { %v2416_v46 = vsub.f32 0.0, %v2398_v30  ;;  %4177 = vrsqrt.f32 %v6176_v34  ;;  %vm2207_vm11 = vweird.f32 %v6171_v38  ;;  %v6309_v45 = vsub.f32 %v5805_v18, %v1294_v41 }
 0x441   : > { %v2199_v11 = vsel %vm6187_vm7, %v6128_v9, %v2195_v13  ;;  %v2202_v37 = vmul.f32 %v6171_v38, %v2201_v59  ;;  %4179 = vrcp.f32 %v6173_v33  ;;  %v1787_v9 = vor.u32 1.1754944e-38, %v1786_v31  ;;  %3259 = vmatpush.msra.mxu0 %v3229_v48  ;;  %vm6240_vm14 = vmor %vm2206_vm13, %vm2207_vm11 }
 0x442   : > { %v2434_v30 = vmul.f32 1.442695, %v2416_v46  ;;  %4181 = vpow2.f32 %v1690_v56  ;;  %v2361_v13 = vmul.f32 %v2199_v11, %v5763_v50  ;;  %v1793_v31 = vmul.f32 %v6146_v27, %v1792_v61  ;;  %v8398_v50 = vld [vmem:[#allocation50_spill] sm:$0xff]  ;;  %8410 = vst [vmem:[#allocation72_spill] sm:$0xff] %v6309_v45 }
 0x443   : > { %v2203_v59 = vmul.f32 0.5, %v2202_v37  ;;  %v2029_v21 = vpop.xlane.xlu0 %2028  ;;  %v2781_v12 = vpop.xlane.xlu2 %2780  ;;  %3260 = vmatpush.msra.mxu0 %v3228_v1  ;;  %vm1785_vm10 = vcmp.eq.f32.partialorder %v1784_v44, 8.507059e+37  ;;  %v3159_v11 = vadd.f32 %v8398_v50, %v3140_v54  ;;  %v1799_v48 = vand.u32 2147483647, %v6106_v60 }
 0x444   : > { %4183 = vpow2.f32 %v2434_v30  ;;  %v2050_v24 = vmul.f32 0.03125, %v2029_v21  ;;  %v2805_v46 = vmul.f32 0.03125, %v2781_v12  ;;  %v6210_v3 = vpop.xlane.xlu1 %1276  ;;  %1378 = vadd.xlane.f32.xlu0 %v1346_v23  ;;  %v6215_v37 = vpop.eup %4175  ;;  %v1788_v30 = vsel %vm1785_vm10, %v1787_v9, %v1783_v29 }
 0x445   : > { %v2204_v56 = vsub.f32 1.5, %v2203_v59  ;;  %v2380_v1 = vmul.f32 %v6140_v42, %v2361_v13  ;;  %v1293_v61 = vmul.f32 0.03125, %v6126_v20  ;;  %v1794_v47 = vadd.f32 %v6146_v27, %v1793_v31 }
 0x446   : > { %v6219_v14 = vsub.f32 %v5821_v63, %v2050_v24  ;;  %v6222_v16 = vsub.f32 %v5812_v22, %v2805_v46  ;;  %v6224_v23 = vpop.eup %4177  ;;  %vm6247_vm0 = vcmp.eq.f32.partialorder %v1799_v48, 8.507059e+37  ;;  %v1801_v59 = vand.u32 2147483648, %v6106_v60 }
 0x447   : > { %v2205_v54 = vmul.f32 %v6171_v38, %v2204_v56  ;;  %v6230_v44 = vpop.eup %4179  ;;  %v1503_v63 = vmul.f32 %v6224_v23, %v6176_v34  ;;  %v1806_v46 = vmul.f32 %v6215_v37, %v6161_v28  ;;  %v2399_v56 = vadd.f32 %v6150_v39, %v2380_v1 }
 0x448   : > { %8399 = vst [vmem:[#allocation69_spill] sm:$0xff] %v6219_v14  ;;  %v2841_v22 = vmul.f32 %v6222_v16, %v6222_v16  ;;  %v4182_v9 = vpop.eup %4181  ;;  %v2086_v13 = vmul.f32 %v6219_v14, %v6219_v14  ;;  %v6263_v48 = vsub.f32 %v5792_v53, %v1293_v61  ;;  %v1798_v53 = vsel %vm6270_vm3, %v6146_v27, %v1794_v47  ;;  %v8408_v61 = vld [vmem:[#allocation52_spill] sm:$0xff] }
 0x449   : > { %8400 = vst [vmem:[#allocation70_spill] sm:$0xff] %v6222_v16  ;;  %v2209_v12 = vsel %vm6240_vm14, %v6171_v38, %v2205_v54  ;;  %v1504_v29 = vmul.f32 %v6224_v23, %v1503_v63  ;;  %v6274_v54 = vadd.f32 1.0, %v4182_v9  ;;  %v2906_v63 = vmul.f32 0.03125, %v6157_v7 }
 0x44a   : > { %v4184_v21 = vpop.eup %4183  ;;  %v2859_v24 = vmul.f32 %v2841_v22, %v5182_v8  ;;  %8405 = vst [vmem:[#allocation71_spill] sm:$0xff] %v6263_v48  ;;  %v2104_v20 = vmul.f32 %v2086_v13, %v5182_v8  ;;  %v1821_v1 = vmul.f32 %v6230_v44, %v6173_v33  ;;  %v2362_v13 = vmul.f32 %v2209_v12, %v8408_v61 }
 0x44b   : > { %v6259_v31 = vadd.f32 1.0, %v4184_v21  ;;  %v6265_v60 = vpop.xlane.xlu0 %2876  ;;  %v1369_v16 = vpop.xlane.xlu2 %1368  ;;  %v1505_v21 = vmul.f32 0.5, %v1504_v29  ;;  %v1802_v9 = vor.u32 1.1754944e-38, %v1801_v59  ;;  %v1807_v15 = vsub.f32 1.0, %v1806_v46 }
 0x44c   : > { %v1375_v22 = vpop.xlane.xlu1 %1374  ;;  %2888 = vadd.xlane.f32.xlu0 %v2859_v24  ;;  %v1395_v14 = vmul.f32 0.03125, %v1369_v16  ;;  %2136 = vadd.xlane.f32.xlu1 %v2104_v20  ;;  %v1816_v7 = vand.u32 2147483648, %v6161_v28  ;;  %v2417_v24 = vsub.f32 0.0, %v2399_v56  ;;  %v1329_v27 = vmul.f32 %v6263_v48, %v6263_v48 }
 0x44d   : > { %v1398_v51 = vmul.f32 0.03125, %v1375_v22  ;;  %4185 = vrcp.f32 %v6259_v31  ;;  %v6292_v12 = vmul.f32 %v3159_v11, %v1788_v30  ;;  %v6296_v16 = vsel %vm6247_vm0, %v1802_v9, %v1798_v53 }
 0x44e   : > { %v6286_v38 = vadd.f32 1e-05, %v1395_v14  ;;  %8409 = vst [vmem:[#allocation52_spill] sm:$0xff] %v6296_v16  ;;  %v1822_v59 = vsub.f32 1.0, %v1821_v1  ;;  %4187 = vrcp.f32 %v6274_v54  ;;  %v2381_v29 = vmul.f32 %v6140_v42, %v2362_v13 }
 0x44f   : > { %v6290_v47 = vadd.f32 1e-05, %v1398_v51  ;;  %v6300_v46 = vadd.f32 1e-05, %v2906_v63  ;;  %v1506_v58 = vsub.f32 1.5, %v1505_v21  ;;  %v1808_v14 = vmul.f32 %v6215_v37, %v1807_v15 }
 0x450   : > { %vm1811_vm2 = vweird.f32 %v6215_v37  ;;  %v6306_v11 = vor.u32 1.1754944e-38, %v1816_v7  ;;  %v2436_v30 = vmul.f32 1.442695, %v2417_v24  ;;  %4189 = vrsqrt.f32 %v6286_v38 }
 0x451   : > { %v1347_v63 = vmul.f32 %v1329_v27, %v5182_v8  ;;  %4191 = vrsqrt.f32 %v6290_v47  ;;  %v1823_v61 = vmul.f32 %v6230_v44, %v1822_v59  ;;  %v2400_v18 = vadd.f32 %v6150_v39, %v2381_v29  ;;  %vm6375_vm9 = vmor %vm1810_vm1, %vm1811_vm2 }
 0x452   : > { %4193 = vrsqrt.f32 %v6300_v46  ;;  %v1507_v41 = vmul.f32 %v6224_v23, %v1506_v58  ;;  %vm1509_vm5 = vweird.f32 %v6224_v23  ;;  %vm1508_vm6 = vweird.f32 %v6176_v34  ;;  %v8418_v34 = vld [vmem:[#allocation53_spill] sm:$0xff] }
 0x453   : > { %v2031_v56 = vpop.xlane.xlu0 %2030  ;;  %v2783_v20 = vpop.xlane.xlu2 %2782  ;;  %4195 = vpow2.f32 %v2436_v30  ;;  %v1295_v24 = vmul.f32 0.03125, %v6210_v3  ;;  %v1330_v27 = vmul.f32 %v6309_v45, %v6309_v45  ;;  %vm6336_vm7 = vmor %vm1508_vm6, %vm1509_vm5  ;;  %v6345_v29 = vadd.f32 %v6215_v37, %v1808_v14 }
 0x454   : > { %v6314_v15 = vpop.eup %4185  ;;  %v2051_v22 = vmul.f32 0.03125, %v2031_v56  ;;  %v2806_v53 = vmul.f32 0.03125, %v2783_v20  ;;  %v2115_v1 = vpop.xlane.xlu1 %2114  ;;  %1380 = vadd.xlane.f32.xlu1 %v1347_v63  ;;  %v1831_v3 = vand.u32 2147483648, %v6173_v33  ;;  %v2418_v30 = vsub.f32 0.0, %v2400_v18 }
 0x455   : > { %v2147_v9 = vmul.f32 0.03125, %v2115_v1  ;;  %v6329_v7 = vpop.eup %4187  ;;  %v2489_v59 = vmul.f32 %v6314_v15, %v6259_v31  ;;  %v1511_v56 = vsel %vm6336_vm7, %v6224_v23, %v1507_v41  ;;  %v6354_v20 = vadd.f32 %v6230_v44, %v1823_v61 }
 0x456   : > { %v6324_v13 = vsub.f32 %v5859_v10, %v2051_v22  ;;  %v6327_v21 = vsub.f32 %v5849_v36, %v2806_v53  ;;  %v6348_v58 = vpop.eup %4189  ;;  %vm1826_vm8 = vweird.f32 %v6230_v44  ;;  %v2907_v22 = vmul.f32 0.03125, %v6265_v60 }
 0x457   : > { %v6357_v63 = vpop.eup %4191  ;;  %v6360_v14 = vadd.f32 1e-05, %v2147_v9  ;;  %v1836_v1 = vmul.f32 %v6329_v7, %v6274_v54  ;;  %v6368_v23 = vsub.f32 %v5824_v5, %v1295_v24  ;;  %v1348_v61 = vmul.f32 %v1330_v27, %v5182_v8  ;;  %vm6390_vm10 = vmor %vm1825_vm4, %vm1826_vm8 }
 0x458   : > { %8411 = vst [vmem:[#allocation73_spill] sm:$0xff] %v6324_v13  ;;  %v2087_v36 = vmul.f32 %v6324_v13, %v6324_v13  ;;  %v2842_v10 = vmul.f32 %v6327_v21, %v6327_v21  ;;  %v6365_v18 = vpop.eup %4193  ;;  %v2490_v41 = vsub.f32 1.0, %v2489_v59  ;;  %v1829_v9 = vand.u32 2147483647, %v6173_v33 }
 0x459   : > { %8412 = vst [vmem:[#allocation74_spill] sm:$0xff] %v6327_v21  ;;  %v6394_v59 = vor.u32 1.1754944e-38, %v1831_v3  ;;  %v6404_v24 = vadd.f32 1e-05, %v2907_v22  ;;  %4197 = vrsqrt.f32 %v6360_v14  ;;  %v2979_v45 = vmul.f32 %v6365_v18, %v6300_v46 }
 0x45a   : > { %v2105_v53 = vmul.f32 %v2087_v36, %v5182_v8  ;;  %8415 = vst [vmem:[#allocation75_spill] sm:$0xff] %v6368_v23  ;;  %v1610_v36 = vmul.f32 %v1511_v56, %v8418_v34  ;;  %v2860_v5 = vmul.f32 %v2842_v10, %v5182_v8  ;;  %v4196_v56 = vpop.eup %4195  ;;  %v2438_v34 = vmul.f32 1.442695, %v2418_v30 }
 0x45b   : > { %v1513_v10 = vmul.f32 %v6348_v58, %v6286_v38  ;;  %v1371_v3 = vpop.xlane.xlu2 %1370  ;;  %v1837_v30 = vsub.f32 1.0, %v1836_v1  ;;  %v2491_v13 = vmul.f32 %v6314_v15, %v2490_v41  ;;  %v1331_v48 = vmul.f32 %v6368_v23, %v6368_v23 }
 0x45c   : > { %v2117_v51 = vpop.xlane.xlu1 %2116  ;;  %2138 = vadd.xlane.f32.xlu2 %v2105_v53  ;;  %v1543_v53 = vmul.f32 %v6357_v63, %v6290_v47  ;;  %1382 = vadd.xlane.f32.xlu1 %v1348_v61  ;;  %v2499_v61 = vand.u32 2147483648, %v6259_v31  ;;  %v8421_v33 = vand.u32 2147483647, %v6161_v28  ;;  %v6419_v40 = vadd.f32 1.0, %v4196_v56 }
 0x45d   : > { %v2148_v21 = vmul.f32 0.03125, %v2117_v51  ;;  %2890 = vadd.xlane.f32.xlu0 %v2860_v5  ;;  %v1629_v51 = vmul.f32 %v5573_v62, %v1610_v36  ;;  %vm2494_vm12 = vweird.f32 %v6314_v15  ;;  %v2497_v1 = vand.u32 2147483647, %v6259_v31 }
 0x45e   : > { %vm6415_vm11 = vcmp.eq.f32.partialorder %v8421_v33, 8.507059e+37  ;;  %4199 = vpow2.f32 %v2438_v34  ;;  %v1514_v41 = vmul.f32 %v6348_v58, %v1513_v10  ;;  %v1544_v5 = vmul.f32 %v6357_v63, %v1543_v53 }
 0x45f   : > { %v1396_v23 = vmul.f32 0.03125, %v1371_v3  ;;  %vm6426_vm13 = vcmp.eq.f32.partialorder %v1829_v9, 8.507059e+37  ;;  %4201 = vrsqrt.f32 %v6404_v24  ;;  %v6431_v56 = vadd.f32 1e-05, %v2148_v21  ;;  %v6438_v9 = vpop.eup %4197 }
 0x460   : > { %v2492_v36 = vadd.f32 %v6314_v15, %v2491_v13  ;;  %vm2493_vm14 = vweird.f32 %v6259_v31  ;;  %v2980_v33 = vmul.f32 %v6365_v18, %v2979_v45  ;;  %v2500_v34 = vor.u32 1.1754944e-38, %v2499_v61  ;;  %v2879_v31 = vpop.xlane.xlu0 %2878 }
 0x461   : > { %vm2495_vm15 = vmor %vm2493_vm14, %vm2494_vm12  ;;  %v1349_v10 = vmul.f32 %v1331_v48, %v5182_v8  ;;  %v1838_v53 = vmul.f32 %v6329_v7, %v1837_v30  ;;  %4203 = vrcp.f32 %v6419_v40  ;;  %v1648_v3 = vadd.f32 %v5579_v0, %v1629_v51  ;;  %v8426_v48 = vld [vmem:[#allocation31_spill] sm:$0xff] }
 0x462   : > { %v2496_v21 = vsel %vm2495_vm15, %v6314_v15, %v2492_v36  ;;  %vm2498_vm0 = vcmp.eq.f32.partialorder %v2497_v1, 8.507059e+37  ;;  %v1515_v13 = vmul.f32 0.5, %v1514_v41  ;;  %v1545_v16 = vmul.f32 0.5, %v1544_v5  ;;  %v8427_v5 = vld [vmem:[#allocation26_spill] sm:$0xff] }
 0x463   : > { %v6443_v17 = vadd.f32 1e-05, %v1396_v23  ;;  %v2501_v45 = vsel %vm2498_vm0, %v2500_v34, %v2496_v21  ;;  %4205 = vrsqrt.f32 %v6431_v56  ;;  %v1844_v50 = vand.u32 2147483647, %v6274_v54  ;;  %v2785_v34 = vpop.xlane.xlu2 %2784 }
 0x464   : > { %v2119_v61 = vpop.xlane.xlu1 %2118  ;;  %1384 = vadd.xlane.f32.xlu1 %v1349_v10  ;;  %v3174_v30 = vmul.f32 %v2501_v45, %v8426_v48  ;;  %v1846_v2 = vand.u32 2147483648, %v6274_v54  ;;  %v4200_v51 = vpop.eup %4199  ;;  %v2981_v32 = vmul.f32 0.5, %v2980_v33  ;;  %v2211_v15 = vmul.f32 %v6438_v9, %v6360_v14 }
 0x465   : > { %v1839_v1 = vadd.f32 %v6329_v7, %v1838_v53  ;;  %vm1841_vm3 = vweird.f32 %v6329_v7  ;;  %v6453_v23 = vpop.eup %4201  ;;  %v1666_v41 = vsub.f32 0.0, %v1648_v3  ;;  %v2149_v10 = vmul.f32 0.03125, %v2119_v61 }
 0x466   : > { %v3210_v36 = vadd.f32 %v8427_v5, %v3174_v30  ;;  %v8428_v21 = vsel %vm6375_vm9, %v6215_v37, %v6345_v29  ;;  %v1516_v53 = vsub.f32 1.5, %v1515_v13  ;;  %v1546_v45 = vsub.f32 1.5, %v1545_v16 }
 0x467   : > { %v6464_v33 = vsel %vm6415_vm11, %v6306_v11, %v8428_v21  ;;  %4207 = vrsqrt.f32 %v6443_v17  ;;  %vm1840_vm1 = vweird.f32 %v6274_v54  ;;  %v6468_v3 = vpop.eup %4203  ;;  %v6470_v48 = vadd.f32 1.0, %v4200_v51 }
 0x468   : > { %3261 = vmatmul.f32.vlgmr.msra.gmra.mxu0 %v3210_v36  ;;  %v8429_v37 = vsel %vm6390_vm10, %v6230_v44, %v6354_v20  ;;  %vm6484_vm2 = vmor %vm1840_vm1, %vm1841_vm3  ;;  %vm6488_vm4 = vcmp.eq.f32.partialorder %v1844_v50, 8.507059e+37  ;;  %v1847_v29 = vor.u32 1.1754944e-38, %v1846_v2  ;;  %v2982_v60 = vsub.f32 1.5, %v2981_v32 }
 0x469   : > { %v6480_v11 = vsel %vm6426_vm13, %v6394_v59, %v8429_v37  ;;  %v2989_v44 = vmul.f32 %v6453_v23, %v6404_v24  ;;  %v2212_v20 = vmul.f32 %v6438_v9, %v2211_v15  ;;  %v1843_v27 = vsel %vm6484_vm2, %v6329_v7, %v1839_v1  ;;  %v6498_v59 = vpop.eup %4205  ;;  %v2033_v15 = vpop.xlane.xlu0 %2032 }
 0x46a   : > { %v1692_v22 = vmul.f32 1.442695, %v1666_v41  ;;  %vm1519_vm5 = vweird.f32 %v6348_v58  ;;  %v2908_v50 = vmul.f32 0.03125, %v2879_v31  ;;  %v6501_v28 = vadd.f32 1e-05, %v2149_v10 }
 0x46b   : > { %v1517_v2 = vmul.f32 %v6348_v58, %v1516_v53  ;;  %v1547_v32 = vmul.f32 %v6357_v63, %v1546_v45  ;;  %vm1549_vm6 = vweird.f32 %v6357_v63  ;;  %v2504_v13 = vmul.f32 %v6468_v3, %v6419_v40 }
 0x46c   : > { %4209 = vrcp.f32 %v6470_v48  ;;  %vm1518_vm7 = vweird.f32 %v6286_v38  ;;  %vm1548_vm8 = vweird.f32 %v6290_v47  ;;  %v6513_v7 = vsel %vm6488_vm4, %v1847_v29, %v1843_v27  ;;  %v2121_v1 = vpop.xlane.xlu1 %2120  ;;  %v1373_v29 = vpop.xlane.xlu2 %1372 }
 0x46d   : > { %v6515_v31 = vpop.eup %4207  ;;  %vm6517_vm9 = vmor %vm1518_vm7, %vm1519_vm5  ;;  %v2213_v30 = vmul.f32 0.5, %v2212_v20  ;;  %v2221_v51 = vmul.f32 %v6498_v59, %v6431_v56  ;;  %4211 = vrsqrt.f32 %v6501_v28  ;;  %v2505_v38 = vsub.f32 1.0, %v2504_v13 }
 0x46e   : > { %v6525_v47 = vmul.f32 %v6365_v18, %v2982_v60  ;;  %4213 = vpow2.f32 %v1692_v22  ;;  %v2990_v41 = vmul.f32 %v6453_v23, %v2989_v44  ;;  %vm6530_vm10 = vmor %vm1548_vm8, %vm1549_vm6  ;;  %v6534_v36 = vadd.f32 1e-05, %v2908_v50 }
 0x46f   : > { %v1521_v10 = vsel %vm6517_vm9, %v6348_v58, %v1517_v2  ;;  %v1551_v21 = vsel %vm6530_vm10, %v6357_v63, %v1547_v32  ;;  %v2506_v53 = vmul.f32 %v6468_v3, %v2505_v38  ;;  %vm2509_vm11 = vweird.f32 %v6468_v3  ;;  %v8438_v2 = vld [vmem:[#allocation54_spill] sm:$0xff] }
 0x470   : > { %v1523_v45 = vmul.f32 %v6515_v31, %v6443_v17  ;;  %v2052_v37 = vmul.f32 0.03125, %v2033_v15  ;;  %v2512_v16 = vand.u32 2147483647, %v6419_v40  ;;  %v2514_v54 = vand.u32 2147483648, %v6419_v40 }
 0x471   : > { %v2214_v60 = vsub.f32 1.5, %v2213_v30  ;;  %v2222_v58 = vmul.f32 %v6498_v59, %v2221_v51  ;;  %v2507_v44 = vadd.f32 %v6468_v3, %v2506_v53  ;;  %vm2508_vm12 = vweird.f32 %v6419_v40 }
 0x472   : > { %v6551_v63 = vpop.eup %4209  ;;  %v6553_v20 = vmul.f32 0.5, %v2990_v41  ;;  %v1611_v27 = vmul.f32 %v1521_v10, %v5818_v55  ;;  %4215 = vrsqrt.f32 %v6534_v36  ;;  %v2807_v22 = vmul.f32 0.03125, %v2785_v34  ;;  %vm2510_vm13 = vmor %vm2508_vm12, %vm2509_vm11 }
 0x473   : > { %v6559_v50 = vpop.eup %4211  ;;  %v1614_v32 = vmul.f32 %v1551_v21, %v8438_v2  ;;  %v2511_v13 = vsel %vm2510_vm13, %v6468_v3, %v2507_v44  ;;  %v2515_v61 = vor.u32 1.1754944e-38, %v2514_v54  ;;  %v1397_v40 = vmul.f32 0.03125, %v1373_v29  ;;  %v8441_v21 = vld [vmem:[#allocation32_spill] sm:$0xff] }
 0x474   : > { %v4214_v30 = vpop.eup %4213  ;;  %vm2217_vm14 = vweird.f32 %v6438_v9  ;;  %v1524_v51 = vmul.f32 %v6515_v31, %v1523_v45  ;;  %v2231_v55 = vmul.f32 %v6559_v50, %v6501_v28  ;;  %vm2513_vm15 = vcmp.eq.f32.partialorder %v2512_v16, 8.507059e+37 }
 0x475   : > { %v2215_v34 = vmul.f32 %v6438_v9, %v2214_v60  ;;  %v2223_v15 = vmul.f32 0.5, %v2222_v58  ;;  %v6569_v38 = vsub.f32 %v5903_v19, %v2052_v37  ;;  %v2516_v41 = vsel %vm2513_vm15, %v2515_v61, %v2511_v13  ;;  %v6582_v19 = vpop.xlane.xlu1 %2122  ;;  %v8444_v58 = vld [vmem:[#allocation51_spill] sm:$0xff] }
 0x476   : > { %v1630_v3 = vmul.f32 %v5573_v62, %v1611_v27  ;;  %v6573_v5 = vsub.f32 %v5890_v52, %v2807_v22  ;;  %v2232_v10 = vmul.f32 %v6559_v50, %v2231_v55  ;;  %v3175_v53 = vmul.f32 %v2516_v41, %v8441_v21  ;;  %v6593_v27 = vpop.xlane.xlu0 %2880 }
 0x477   : > { %8439 = vst [vmem:[#allocation53_spill] sm:$0xff] %v6569_v38  ;;  %v2992_v45 = vsub.f32 1.5, %v6553_v20  ;;  %v1633_v16 = vmul.f32 %v5573_v62, %v1614_v32  ;;  %vm2216_vm0 = vweird.f32 %v6360_v14  ;;  %v6580_v54 = vadd.f32 1e-05, %v1397_v40 }
 0x478   : > { %8440 = vst [vmem:[#allocation31_spill] sm:$0xff] %v6573_v5  ;;  %v6584_v37 = vpop.eup %4215  ;;  %vm6588_vm3 = vmor %vm2216_vm0, %vm2217_vm14  ;;  %v1525_v29 = vmul.f32 0.5, %v1524_v51  ;;  %v2233_v60 = vmul.f32 0.5, %v2232_v10  ;;  %v3211_v44 = vadd.f32 %v8444_v58, %v3175_v53  ;;  %v2150_v22 = vmul.f32 0.03125, %v2121_v1 }
 0x479   : > { %v2219_v14 = vsel %vm6588_vm3, %v6438_v9, %v2215_v34  ;;  %v2224_v2 = vsub.f32 1.5, %v2223_v15  ;;  %4217 = vrsqrt.f32 %v6580_v54  ;;  %v2088_v32 = vmul.f32 %v6569_v38, %v6569_v38  ;;  %v2787_v34 = vpop.xlane.xlu2 %2786 }
 0x47a   : > { %v1649_v13 = vadd.f32 %v5579_v0, %v1630_v3  ;;  %vm1528_vm1 = vweird.f32 %v6443_v17  ;;  %vm2226_vm2 = vweird.f32 %v6431_v56  ;;  %3264 = vmatmul.f32.gmra.mxu0 %v3211_v44  ;;  %v6604_v61 = vadd.f32 1e-05, %v2150_v22  ;;  %v8451_v17 = vld [vmem:[#allocation56_spill] sm:$0xff] }
 0x47b   : > { %v2843_v1 = vmul.f32 %v6573_v5, %v6573_v5  ;;  %v6608_v40 = vadd.f32 1.0, %v4214_v30  ;;  %v2234_v9 = vsub.f32 1.5, %v2233_v60  ;;  %v2106_v51 = vmul.f32 %v2088_v32, %v5182_v8 }
 0x47c   : > { %v2519_v55 = vmul.f32 %v6551_v63, %v6470_v48  ;;  %v2363_v15 = vmul.f32 %v2219_v14, %v5841_v6  ;;  %v2999_v41 = vmul.f32 %v6584_v37, %v6534_v36  ;;  %v1526_v3 = vsub.f32 1.5, %v1525_v29 }
 0x47d   : > { %v2861_v10 = vmul.f32 %v2843_v1, %v5182_v8  ;;  %v6618_v21 = vadd.f32 %v5579_v0, %v1633_v16  ;;  %v2225_v30 = vmul.f32 %v6498_v59, %v2224_v2  ;;  %vm2227_vm4 = vweird.f32 %v6498_v59  ;;  %2140 = vadd.xlane.f32.xlu2 %v2106_v51  ;;  %v2125_v2 = vpop.xlane.xlu1 %2124 }
 0x47e   : > { %v2520_v53 = vsub.f32 1.0, %v2519_v55  ;;  %v1667_v52 = vsub.f32 0.0, %v1649_v13  ;;  %vm1529_vm5 = vweird.f32 %v6515_v31  ;;  %vm2237_vm6 = vweird.f32 %v6559_v50  ;;  %vm6637_vm8 = vmor %vm2226_vm2, %vm2227_vm4  ;;  %v2035_v51 = vpop.xlane.xlu0 %2034 }
 0x47f   : > { %4219 = vrsqrt.f32 %v6604_v61  ;;  %2892 = vadd.xlane.f32.xlu0 %v2861_v10  ;;  %v6625_v6 = vpop.eup %4217  ;;  %v2235_v29 = vmul.f32 %v6559_v50, %v2234_v9  ;;  %vm2524_vm7 = vweird.f32 %v6551_v63  ;;  %v2527_v60 = vand.u32 2147483647, %v6470_v48  ;;  %vm6666_vm14 = vmor %vm1528_vm1, %vm1529_vm5 }
 0x480   : > { %v2521_v16 = vmul.f32 %v6551_v63, %v2520_v53  ;;  %v2382_v58 = vmul.f32 %v6140_v42, %v2363_v15  ;;  %v1527_v44 = vmul.f32 %v6515_v31, %v1526_v3  ;;  %vm2236_vm9 = vweird.f32 %v6501_v28 }
 0x481   : > { %v2529_v14 = vand.u32 2147483648, %v6470_v48  ;;  %v2229_v32 = vsel %vm6637_vm8, %v6498_v59, %v2225_v30  ;;  %vm6648_vm10 = vmor %vm2236_vm9, %vm2237_vm6  ;;  %v1533_v56 = vmul.f32 %v6625_v6, %v6580_v54  ;;  %vm2523_vm11 = vweird.f32 %v6470_v48  ;;  %v8456_v48 = vld [vmem:[#allocation28_spill] sm:$0xff] }
 0x482   : > { %v2522_v1 = vadd.f32 %v6551_v63, %v2521_v16  ;;  %4221 = vrcp.f32 %v6608_v40  ;;  %v3000_v28 = vmul.f32 %v6584_v37, %v2999_v41  ;;  %vm2525_vm12 = vmor %vm2523_vm11, %vm2524_vm7  ;;  %v2808_v9 = vmul.f32 0.03125, %v2787_v34 }
 0x483   : > { %v2530_v59 = vor.u32 1.1754944e-38, %v2529_v14  ;;  %vm2985_vm13 = vweird.f32 %v6365_v18  ;;  %v1670_v55 = vsub.f32 0.0, %v6618_v21  ;;  %v2239_v15 = vsel %vm6648_vm10, %v6559_v50, %v2235_v29  ;;  %v1377_v29 = vpop.xlane.xlu2 %1376  ;;  %v8453_v14 = vld [vmem:[#allocation33_spill] sm:$0xff] }
 0x484   : > { %v2526_v41 = vsel %vm2525_vm12, %v6551_v63, %v2522_v1  ;;  %vm2528_vm15 = vcmp.eq.f32.partialorder %v2527_v60, 8.507059e+37  ;;  %v2401_v3 = vadd.f32 %v6150_v39, %v2382_v58  ;;  %v1531_v10 = vsel %vm6666_vm14, %v6515_v31, %v1527_v44  ;;  %v8452_v58 = vld [vmem:[#allocation57_spill] sm:$0xff]  ;;  %v8455_v44 = vld [vmem:[#allocation55_spill] sm:$0xff] }
 0x485   : > { %v6674_v34 = vpop.eup %4219  ;;  %v2364_v21 = vmul.f32 %v2229_v32, %v8451_v17  ;;  %v2531_v30 = vsel %vm2528_vm15, %v2530_v59, %v2526_v41  ;;  %vm2984_vm0 = vweird.f32 %v6300_v46  ;;  %v1694_v53 = vmul.f32 1.442695, %v1667_v52 }
 0x486   : > { %v1534_v16 = vmul.f32 %v6625_v6, %v1533_v56  ;;  %v2241_v63 = vmul.f32 %v6674_v34, %v6604_v61  ;;  %v2053_v50 = vmul.f32 0.03125, %v2035_v51  ;;  %v6685_v60 = vmul.f32 0.5, %v3000_v28  ;;  %vm6727_vm1 = vmor %vm2984_vm0, %vm2985_vm13 }
 0x487   : > { %v2365_v22 = vmul.f32 %v2239_v15, %v8452_v58  ;;  %v3176_v13 = vmul.f32 %v2531_v30, %v8453_v14  ;;  %v6690_v31 = vsub.f32 %v5940_v35, %v2808_v9  ;;  %v1612_v32 = vmul.f32 %v1531_v10, %v8455_v44 }
 0x488   : > { %v2909_v52 = vmul.f32 0.03125, %v6593_v27  ;;  %v2242_v56 = vmul.f32 %v6674_v34, %v2241_v63  ;;  %v2151_v1 = vmul.f32 0.03125, %v6582_v19  ;;  %v6696_v59 = vpop.eup %4221  ;;  %v2419_v51 = vsub.f32 0.0, %v2401_v3 }
 0x489   : > { %8454 = vst [vmem:[#allocation26_spill] sm:$0xff] %v6690_v31  ;;  %v2383_v28 = vmul.f32 %v6140_v42, %v2364_v21  ;;  %v3212_v15 = vadd.f32 %v8456_v48, %v3176_v13  ;;  %v1399_v41 = vmul.f32 0.03125, %v1377_v29  ;;  %v1535_v17 = vmul.f32 0.5, %v1534_v16  ;;  %v2127_v21 = vpop.xlane.xlu1 %2126  ;;  %v8489_v13 = vld [vmem:[#allocation49_spill] sm:$0xff] }
 0x48a   : > { %v2243_v30 = vmul.f32 0.5, %v2242_v56  ;;  %v6701_v35 = vsub.f32 %v5955_v25, %v2053_v50  ;;  %v6703_v9 = vadd.f32 1e-05, %v2151_v1  ;;  %v2384_v27 = vmul.f32 %v6140_v42, %v2365_v22 }
 0x48b   : > { %3267 = vmatmul.f32.gmra.mxu0 %v3212_v15  ;;  %v6706_v10 = vadd.f32 1e-05, %v1399_v41  ;;  %v2152_v19 = vmul.f32 0.03125, %v2125_v2  ;;  %v2844_v3 = vmul.f32 %v6690_v31, %v6690_v31  ;;  %v1631_v63 = vmul.f32 %v5573_v62, %v1612_v32 }
 0x48c   : > { %8457 = vst [vmem:[#allocation54_spill] sm:$0xff] %v6701_v35  ;;  %v6711_v29 = vadd.f32 1e-05, %v2909_v52  ;;  %v2244_v16 = vsub.f32 1.5, %v2243_v30  ;;  %4223 = vrsqrt.f32 %v6703_v9  ;;  %v2402_v25 = vadd.f32 %v6150_v39, %v2383_v28  ;;  %v8462_v30 = vld [vmem:[#allocation59_spill] sm:$0xff] }
 0x48d   : > { %vm2247_vm3 = vweird.f32 %v6674_v34  ;;  %4225 = vrsqrt.f32 %v6706_v10  ;;  %v6717_v50 = vadd.f32 1e-05, %v2152_v19  ;;  %v1536_v2 = vsub.f32 1.5, %v1535_v17 }
 0x48e   : > { %v2245_v58 = vmul.f32 %v6674_v34, %v2244_v16  ;;  %v2862_v22 = vmul.f32 %v2844_v3, %v5182_v8  ;;  %v2089_v14 = vmul.f32 %v6701_v35, %v6701_v35  ;;  %4227 = vpow2.f32 %v1694_v53 }
 0x48f   : > { %v2440_v44 = vmul.f32 1.442695, %v2419_v51  ;;  %v2403_v32 = vadd.f32 %v6150_v39, %v2384_v27  ;;  %vm2246_vm2 = vweird.f32 %v6604_v61  ;;  %v6740_v56 = vmul.f32 %v6453_v23, %v2992_v45  ;;  %v2133_v61 = vpop.xlane.xlu2 %2132  ;;  %v2883_v45 = vpop.xlane.xlu0 %2882 }
 0x490   : > { %vm6742_vm4 = vmor %vm2246_vm2, %vm2247_vm3  ;;  %4229 = vrsqrt.f32 %v6717_v50  ;;  %2894 = vadd.xlane.f32.xlu0 %v2862_v22  ;;  %v2107_v53 = vmul.f32 %v2089_v14, %v5182_v8  ;;  %v1700_v1 = vmul.f32 1.442695, %v1670_v55  ;;  %v3002_v51 = vsub.f32 1.5, %v6685_v60 }
 0x491   : > { %4231 = vrsqrt.f32 %v6711_v29  ;;  %v2249_v20 = vsel %vm6742_vm4, %v6674_v34, %v2245_v58  ;;  %vm2995_vm5 = vweird.f32 %v6453_v23  ;;  %v1650_v48 = vadd.f32 %v5579_v0, %v1631_v63 }
 0x492   : > { %v6753_v28 = vpop.eup %4223  ;;  %v2420_v15 = vsub.f32 0.0, %v2402_v25  ;;  %v1537_v41 = vmul.f32 %v6625_v6, %v1536_v2  ;;  %vm1539_vm6 = vweird.f32 %v6625_v6  ;;  %2142 = vadd.xlane.f32.xlu2 %v2107_v53  ;;  %4233 = vpow2.f32 %v2440_v44  ;;  %v2129_v2 = vpop.xlane.xlu1 %2128 }
 0x493   : > { %v6759_v55 = vpop.eup %4225  ;;  %v2421_v60 = vsub.f32 0.0, %v2403_v32  ;;  %v2251_v34 = vmul.f32 %v6753_v28, %v6703_v9  ;;  %v2156_v17 = vmul.f32 0.03125, %v2133_v61  ;;  %vm2994_vm7 = vweird.f32 %v6404_v24 }
 0x494   : > { %vm1538_vm8 = vweird.f32 %v6580_v54  ;;  %v2366_v27 = vmul.f32 %v2249_v20, %v8462_v30  ;;  %v1553_v19 = vmul.f32 %v6759_v55, %v6706_v10  ;;  %v2153_v3 = vmul.f32 0.03125, %v2127_v21  ;;  %v4228_v63 = vpop.eup %4227  ;;  %v8465_v30 = vld [vmem:[#allocation58_spill] sm:$0xff]  ;;  %vm6817_vm15 = vmor %vm2994_vm7, %vm2995_vm5 }
 0x495   : > { %4235 = vpow2.f32 %v1700_v1  ;;  %v6769_v16 = vmul.f32 %v6584_v37, %v3002_v51  ;;  %vm3004_vm9 = vweird.f32 %v6534_v36  ;;  %vm3005_vm10 = vweird.f32 %v6584_v37  ;;  %vm6775_vm11 = vmor %vm1538_vm8, %vm1539_vm6 }
 0x496   : > { %v2252_v54 = vmul.f32 %v6753_v28, %v2251_v34  ;;  %v6780_v58 = vpop.eup %4229  ;;  %v1668_v21 = vsub.f32 0.0, %v1650_v48  ;;  %v2442_v22 = vmul.f32 1.442695, %v2420_v15  ;;  %v1541_v14 = vsel %vm6775_vm11, %v6625_v6, %v1537_v41  ;;  %vm6831_vm0 = vmor %vm3004_vm9, %vm3005_vm10 }
 0x497   : > { %v2910_v44 = vmul.f32 0.03125, %v2883_v45  ;;  %v6785_v32 = vpop.eup %4231  ;;  %v2444_v46 = vmul.f32 1.442695, %v2421_v60  ;;  %v2261_v61 = vmul.f32 %v6780_v58, %v6717_v50  ;;  %v6789_v1 = vadd.f32 1e-05, %v2156_v17 }
 0x498   : > { %v2253_v53 = vmul.f32 0.5, %v2252_v54  ;;  %v2385_v51 = vmul.f32 %v6140_v42, %v2366_v27  ;;  %v1554_v20 = vmul.f32 %v6759_v55, %v1553_v19  ;;  %v6793_v48 = vadd.f32 1e-05, %v2153_v3  ;;  %v4234_v34 = vpop.eup %4233  ;;  %v2789_v54 = vpop.xlane.xlu0 %2788 }
 0x499   : > { %v2154_v15 = vmul.f32 0.03125, %v2129_v2  ;;  %v1613_v6 = vmul.f32 %v1541_v14, %v8465_v30  ;;  %vm2257_vm12 = vweird.f32 %v6753_v28  ;;  %v2262_v41 = vmul.f32 %v6780_v58, %v2261_v61 }
 0x49a   : > { %v2254_v45 = vsub.f32 1.5, %v2253_v53  ;;  %v1696_v60 = vmul.f32 1.442695, %v1668_v21  ;;  %v3009_v17 = vmul.f32 %v6785_v32, %v6711_v29  ;;  %v6800_v25 = vadd.f32 1e-05, %v2910_v44 }
 0x49b   : > { %4237 = vrsqrt.f32 %v6793_v48  ;;  %v4236_v27 = vpop.eup %4235  ;;  %vm2256_vm13 = vweird.f32 %v6703_v9  ;;  %v2263_v3 = vmul.f32 0.5, %v2262_v41  ;;  %v2404_v2 = vadd.f32 %v6150_v39, %v2385_v51  ;;  %v2887_v41 = vpop.xlane.xlu2 %2886 }
 0x49c   : > { %v2255_v19 = vmul.f32 %v6753_v28, %v2254_v45  ;;  %4239 = vrsqrt.f32 %v6789_v1  ;;  %vm6807_vm14 = vmor %vm2256_vm13, %vm2257_vm12  ;;  %v1555_v14 = vmul.f32 0.5, %v1554_v20  ;;  %v6811_v44 = vadd.f32 1e-05, %v2154_v15 }
 0x49d   : > { %4241 = vpow2.f32 %v2442_v22  ;;  %v6821_v53 = vadd.f32 1.0, %v4234_v34  ;;  %v1632_v22 = vmul.f32 %v5573_v62, %v1613_v6  ;;  %v3010_v24 = vmul.f32 %v6785_v32, %v3009_v17 }
 0x49e   : > { %4243 = vpow2.f32 %v2444_v46  ;;  %v2259_v61 = vsel %vm6807_vm14, %v6753_v28, %v2255_v19  ;;  %v2264_v20 = vsub.f32 1.5, %v2263_v3  ;;  %v2809_v46 = vmul.f32 0.03125, %v2789_v54 }
 0x49f   : > { %4245 = vrsqrt.f32 %v6800_v25  ;;  %v6841_v28 = vadd.f32 1.0, %v4228_v63  ;;  %v2422_v30 = vsub.f32 0.0, %v2404_v2  ;;  %v2367_v6 = vmul.f32 %v2259_v61, %v5925_v43 }
 0x4a0   : > { %4247 = vpow2.f32 %v1696_v60  ;;  %v1556_v45 = vsub.f32 1.5, %v1555_v14  ;;  %v6853_v19 = vadd.f32 1.0, %v4236_v27  ;;  %v1651_v63 = vadd.f32 %v5579_v0, %v1632_v22 }
 0x4a1   : > { %v6847_v34 = vpop.eup %4237  ;;  %4249 = vrsqrt.f32 %v6811_v44  ;;  %v3011_v54 = vmul.f32 0.5, %v3010_v24  ;;  %v2265_v2 = vmul.f32 %v6780_v58, %v2264_v20  ;;  %vm2267_vm3 = vweird.f32 %v6780_v58 }
 0x4a2   : > { %v6851_v17 = vpop.eup %4239  ;;  %8472 = vst [vmem:[#allocation32_spill] sm:$0xff] %v6853_v19  ;;  %4251 = vrcp.f32 %v6821_v53  ;;  %v2271_v60 = vmul.f32 %v6847_v34, %v6793_v48  ;;  %v6862_v43 = vsub.f32 %v6004_v26, %v2809_v46  ;;  %vm1559_vm2 = vweird.f32 %v6759_v55 }
 0x4a3   : > { %v4242_v3 = vpop.eup %4241  ;;  %4253 = vrcp.f32 %v6841_v28  ;;  %vm2266_vm4 = vweird.f32 %v6717_v50  ;;  %v2912_v27 = vmul.f32 0.03125, %v2887_v41  ;;  %v2446_v22 = vmul.f32 1.442695, %v2422_v30 }
 0x4a4   : > { %8473 = vst [vmem:[#allocation51_spill] sm:$0xff] %v6862_v43  ;;  %v4244_v21 = vpop.eup %4243  ;;  %v2386_v61 = vmul.f32 %v6140_v42, %v2367_v6  ;;  %v1557_v24 = vmul.f32 %v6759_v55, %v1556_v45  ;;  %v2301_v20 = vmul.f32 %v6851_v17, %v6789_v1  ;;  %4255 = vrcp.f32 %v6853_v19  ;;  %vm6878_vm5 = vmor %vm2266_vm4, %vm2267_vm3 }
 0x4a5   : > { %v6867_v14 = vpop.eup %4245  ;;  %v6874_v46 = vadd.f32 1.0, %v4242_v3  ;;  %v1669_v36 = vsub.f32 0.0, %v1651_v63  ;;  %v2272_v30 = vmul.f32 %v6847_v34, %v2271_v60  ;;  %v3012_v45 = vsub.f32 1.5, %v3011_v54 }
 0x4a6   : > { %v4248_v26 = vpop.eup %4247  ;;  %vm1558_vm6 = vweird.f32 %v6706_v10  ;;  %v2269_v41 = vsel %vm6878_vm5, %v6780_v58, %v2265_v2  ;;  %v2845_v63 = vmul.f32 %v6862_v43, %v6862_v43  ;;  %v6893_v15 = vadd.f32 1.0, %v4244_v21 }
 0x4a7   : > { %v6883_v6 = vpop.eup %4249  ;;  %vm6897_vm7 = vmor %vm1558_vm6, %vm1559_vm2  ;;  %v3019_v10 = vmul.f32 %v6867_v14, %v6800_v25  ;;  %v6903_v54 = vadd.f32 1e-05, %v2912_v27  ;;  %4257 = vpow2.f32 %v2446_v22  ;;  %v2405_v2 = vadd.f32 %v6150_v39, %v2386_v61 }
 0x4a8   : > { %v6891_v3 = vpop.eup %4251  ;;  %v2281_v58 = vmul.f32 %v6883_v6, %v6811_v44  ;;  %v1561_v21 = vsel %vm6897_vm7, %v6759_v55, %v1557_v24  ;;  %v2302_v50 = vmul.f32 %v6851_v17, %v2301_v20  ;;  %v1698_v43 = vmul.f32 1.442695, %v1669_v36 }
 0x4a9   : > { %v6912_v52 = vpop.eup %4253  ;;  %v2368_v31 = vmul.f32 %v2269_v41, %v5958_v4  ;;  %v2273_v35 = vmul.f32 0.5, %v2272_v30  ;;  %v6916_v5 = vadd.f32 1.0, %v4248_v26  ;;  %4259 = vrcp.f32 %v6874_v46 }
 0x4aa   : > { %v2282_v27 = vmul.f32 %v6883_v6, %v2281_v58  ;;  %v2863_v22 = vmul.f32 %v2845_v63, %v5182_v8  ;;  %v2534_v61 = vmul.f32 %v6891_v3, %v6821_v53  ;;  %v6922_v55 = vpop.eup %4255  ;;  %4261 = vrcp.f32 %v6893_v15 }
 0x4ab   : > { %8478 = vst [vmem:[#allocation56_spill] sm:$0xff] %v6922_v55  ;;  %v6926_v36 = vmul.f32 %v6785_v32, %v3012_v45  ;;  %v1615_v4 = vmul.f32 %v1561_v21, %v5946_v49  ;;  %v3020_v24 = vmul.f32 %v6867_v14, %v3019_v10  ;;  %v2423_v20 = vsub.f32 0.0, %v2405_v2 }
 0x4ac   : > { %v2303_v26 = vmul.f32 0.5, %v2302_v50  ;;  %4263 = vrsqrt.f32 %v6903_v54  ;;  %2896 = vadd.xlane.f32.xlu1 %v2863_v22  ;;  %v2535_v30 = vsub.f32 1.0, %v2534_v61  ;;  %v2387_v41 = vmul.f32 %v6140_v42, %v2368_v31  ;;  %v2131_v50 = vpop.xlane.xlu1 %2130 }
 0x4ad   : > { %4265 = vpow2.f32 %v1698_v43  ;;  %v2274_v63 = vsub.f32 1.5, %v2273_v35  ;;  %v2283_v60 = vmul.f32 0.5, %v2282_v27  ;;  %v4258_v58 = vpop.eup %4257  ;;  %vm2539_vm8 = vweird.f32 %v6891_v3 }
 0x4ae   : > { %v2536_v38 = vmul.f32 %v6891_v3, %v2535_v30  ;;  %v2542_v49 = vand.u32 2147483647, %v6821_v53  ;;  %v2544_v45 = vand.u32 2147483648, %v6821_v53  ;;  %v1634_v10 = vmul.f32 %v5573_v62, %v1615_v4 }
 0x4af   : > { %v6937_v2 = vmul.f32 0.5, %v3020_v24  ;;  %vm2306_vm9 = vweird.f32 %v6789_v1  ;;  %vm2307_vm10 = vweird.f32 %v6851_v17  ;;  %vm2276_vm11 = vweird.f32 %v6793_v48  ;;  %v6942_v31 = vpop.eup %4259  ;;  %v2793_v24 = vpop.xlane.xlu2 %2792 }
 0x4b0   : > { %v2448_v35 = vmul.f32 1.442695, %v2423_v20  ;;  %v2304_v43 = vsub.f32 1.5, %v2303_v26  ;;  %vm2286_vm12 = vweird.f32 %v6811_v44  ;;  %v2537_v21 = vadd.f32 %v6891_v3, %v2536_v38  ;;  %v6947_v27 = vpop.eup %4261  ;;  %vm6994_vm7 = vmor %vm2306_vm9, %vm2307_vm10  ;;  %v8490_v44 = vld [vmem:[#allocation25_spill] sm:$0xff] }
 0x4b1   : > { %vm2538_vm13 = vweird.f32 %v6821_v53  ;;  %v6949_v22 = vadd.f32 1.0, %v4258_v58  ;;  %v2275_v61 = vmul.f32 %v6847_v34, %v2274_v63  ;;  %vm2277_vm14 = vweird.f32 %v6847_v34 }
 0x4b2   : > { %vm2540_vm3 = vmor %vm2538_vm13, %vm2539_vm8  ;;  %v2545_v4 = vor.u32 1.1754944e-38, %v2544_v45  ;;  %v6955_v20 = vpop.eup %4263  ;;  %v2406_v38 = vadd.f32 %v6150_v39, %v2387_v41  ;;  %v2284_v26 = vsub.f32 1.5, %v2283_v60  ;;  %vm2543_vm2 = vcmp.eq.f32.partialorder %v2542_v49, 8.507059e+37  ;;  %v8481_v41 = vld [vmem:[#allocation34_spill] sm:$0xff] }
 0x4b3   : > { %v2541_v53 = vsel %vm2540_vm3, %v6891_v3, %v2537_v21  ;;  %v6959_v30 = vpop.eup %4265  ;;  %v6962_v58 = vadd.f32 %v5579_v0, %v1634_v10  ;;  %v2155_v55 = vmul.f32 0.03125, %v2131_v50  ;;  %v2549_v19 = vmul.f32 %v6942_v31, %v6874_v46  ;;  %vm6971_vm4 = vmor %vm2276_vm11, %vm2277_vm14 }
 0x4b4   : > { %v2546_v63 = vsel %vm2543_vm2, %v2545_v4, %v2541_v53  ;;  %4267 = vpow2.f32 %v2448_v35  ;;  %v2305_v45 = vmul.f32 %v6851_v17, %v2304_v43  ;;  %v2811_v49 = vmul.f32 0.03125, %v2793_v24 }
 0x4b5   : > { %v3177_v60 = vmul.f32 %v2546_v63, %v8481_v41  ;;  %v2279_v10 = vsel %vm6971_vm4, %v6847_v34, %v2275_v61  ;;  %v3039_v35 = vmul.f32 %v6955_v20, %v6903_v54  ;;  %v6981_v21 = vadd.f32 1e-05, %v2155_v55 }
 0x4b6   : > { %v2550_v43 = vsub.f32 1.0, %v2549_v19  ;;  %v2424_v50 = vsub.f32 0.0, %v2406_v38  ;;  %v2285_v48 = vmul.f32 %v6883_v6, %v2284_v26  ;;  %vm2287_vm5 = vweird.f32 %v6883_v6  ;;  %v8485_v26 = vld [vmem:[#allocation24_spill] sm:$0xff] }
 0x4b7   : > { %v3213_v4 = vadd.f32 %v6292_v12, %v3177_v60  ;;  %4269 = vrsqrt.f32 %v6981_v21  ;;  %vm2554_vm6 = vweird.f32 %v6942_v31  ;;  %v2557_v34 = vand.u32 2147483647, %v6874_v46  ;;  %v8484_v12 = vld [vmem:[#allocation64_spill] sm:$0xff]  ;;  %vm7013_vm8 = vmor %vm2286_vm12, %vm2287_vm5 }
 0x4b8   : > { %v2551_v24 = vmul.f32 %v6942_v31, %v2550_v43  ;;  %v2369_v55 = vmul.f32 %v2279_v10, %v5985_v57  ;;  %v7000_v61 = vsub.f32 %v8484_v12, %v2811_v49  ;;  %v2559_v38 = vand.u32 2147483648, %v6874_v46  ;;  %v2885_v12 = vpop.xlane.xlu1 %2884 }
 0x4b9   : > { %3270 = vmatmul.f32.gmra.mxu0 %v3213_v4  ;;  %v8486_v53 = vsel %vm6727_vm1, %v6365_v18, %v6525_v47  ;;  %4271 = vrcp.f32 %v6949_v22  ;;  %v1671_v1 = vsub.f32 0.0, %v6962_v58  ;;  %vm2553_vm9 = vweird.f32 %v6874_v46 }
 0x4ba   : > { %v3122_v63 = vmul.f32 %v8486_v53, %v8485_v26  ;;  %v2552_v3 = vadd.f32 %v6942_v31, %v2551_v24  ;;  %v4268_v41 = vpop.eup %4267  ;;  %v2309_v18 = vsel %vm6994_vm7, %v6851_v17, %v2305_v45  ;;  %vm2555_vm1 = vmor %vm2553_vm9, %vm2554_vm6  ;;  %v2560_v47 = vor.u32 1.1754944e-38, %v2559_v38  ;;  %v8492_v24 = vld [vmem:[#allocation50_spill] sm:$0xff] }
 0x4bb   : > { %v8491_v49 = vsel %vm6817_vm15, %v6453_v23, %v6740_v56  ;;  %v2450_v43 = vmul.f32 1.442695, %v2424_v50  ;;  %v2289_v46 = vsel %vm7013_vm8, %v6883_v6, %v2285_v48  ;;  %vm2558_vm10 = vcmp.eq.f32.partialorder %v2557_v34, 8.507059e+37  ;;  %v8493_v6 = vld [vmem:[#allocation35_spill] sm:$0xff]  ;;  %v8494_v48 = vld [vmem:[#allocation62_spill] sm:$0xff] }
 0x4bc   : > { %v3141_v60 = vmul.f32 %v8489_v13, %v3122_v63  ;;  %v3123_v10 = vmul.f32 %v8491_v49, %v8490_v44  ;;  %v2556_v17 = vsel %vm2555_vm1, %v6942_v31, %v2552_v3  ;;  %v2388_v45 = vmul.f32 %v6140_v42, %v2369_v55  ;;  %v8495_v55 = vld [vmem:[#allocation52_spill] sm:$0xff] }
 0x4bd   : > { %v2561_v4 = vsel %vm2558_vm10, %v2560_v47, %v2556_v17  ;;  %v2847_v9 = vmul.f32 %v7000_v61, %v7000_v61  ;;  %v7039_v38 = vpop.eup %4269  ;;  %v7041_v23 = vadd.f32 1.0, %v4268_v41  ;;  %v7044_v56 = vmul.f32 %v6955_v20, %v3039_v35  ;;  %v8496_v3 = vld [vmem:[#allocation60_spill] sm:$0xff] }
 0x4be   : > { %v3160_v19 = vadd.f32 %v8492_v24, %v3141_v60  ;;  %v3178_v50 = vmul.f32 %v2561_v4, %v8493_v6  ;;  %v2564_v31 = vmul.f32 %v6947_v27, %v6893_v15  ;;  %v2370_v34 = vmul.f32 %v2289_v46, %v8494_v48  ;;  %v8497_v60 = vld [vmem:[#allocation27_spill] sm:$0xff] }
 0x4bf   : > { %v2865_v53 = vmul.f32 %v2847_v9, %v5182_v8  ;;  %v3142_v63 = vmul.f32 %v8489_v13, %v3123_v10  ;;  %v7053_v57 = vpop.eup %4271  ;;  %v2372_v41 = vmul.f32 %v2309_v18, %v8496_v3  ;;  %v2911_v47 = vmul.f32 0.03125, %v2885_v12 }
 0x4c0   : > { %v3196_v26 = vmul.f32 %v3160_v19, %v8495_v55  ;;  %v2565_v35 = vsub.f32 1.0, %v2564_v31  ;;  %v8498_v44 = vsel %vm6831_vm0, %v6584_v37, %v6769_v16  ;;  %4273 = vpow2.f32 %v2450_v43  ;;  %v2791_v31 = vpop.xlane.xlu1 %2790 }
 0x4c1   : > { %v3124_v49 = vmul.f32 %v8498_v44, %v8497_v60  ;;  %v2407_v46 = vadd.f32 %v6150_v39, %v2388_v45  ;;  %v2291_v17 = vmul.f32 %v7039_v38, %v6981_v21  ;;  %2900 = vadd.xlane.f32.xlu0 %v2865_v53  ;;  %vm2569_vm15 = vweird.f32 %v6947_v27  ;;  %v8500_v44 = vld [vmem:[#allocation66_spill] sm:$0xff] }
 0x4c2   : > { %v3214_v10 = vadd.f32 %v3196_v26, %v3178_v50  ;;  %v2566_v4 = vmul.f32 %v6947_v27, %v2565_v35  ;;  %v2572_v18 = vand.u32 2147483647, %v6893_v15  ;;  %v2574_v51 = vand.u32 2147483648, %v6893_v15 }
 0x4c3   : > { %vm3015_vm11 = vweird.f32 %v6785_v32  ;;  %4275 = vrcp.f32 %v7041_v23  ;;  %v2389_v37 = vmul.f32 %v6140_v42, %v2370_v34  ;;  %v3161_v16 = vadd.f32 %v8492_v24, %v3142_v63 }
 0x4c4   : > { %3273 = vmatmul.f32.gmra.mxu0 %v3214_v10  ;;  %v2579_v43 = vmul.f32 %v7053_v57, %v6949_v22  ;;  %v7075_v45 = vadd.f32 1e-05, %v2911_v47  ;;  %v2567_v19 = vadd.f32 %v6947_v27, %v2566_v4  ;;  %vm2568_vm0 = vweird.f32 %v6893_v15 }
 0x4c5   : > { %v3143_v12 = vmul.f32 %v8489_v13, %v3124_v49  ;;  %v2292_v9 = vmul.f32 %v7039_v38, %v2291_v17  ;;  %vm2570_vm12 = vmor %vm2568_vm0, %vm2569_vm15  ;;  %v2575_v6 = vor.u32 1.1754944e-38, %v2574_v51  ;;  %v3197_v50 = vmul.f32 %v3161_v16, %v6464_v33  ;;  %v8499_v33 = vld [vmem:[#allocation36_spill] sm:$0xff] }
 0x4c6   : > { %v2580_v48 = vsub.f32 1.0, %v2579_v43  ;;  %v2571_v34 = vsel %vm2570_vm12, %v6947_v27, %v2567_v19  ;;  %vm2573_vm13 = vcmp.eq.f32.partialorder %v2572_v18, 8.507059e+37  ;;  %v2810_v55 = vmul.f32 0.03125, %v2791_v31  ;;  %v4274_v26 = vpop.eup %4273  ;;  %v2135_v27 = vpop.xlane.xlu0 %2134 }
 0x4c7   : > { %vm2584_vm14 = vweird.f32 %v7053_v57  ;;  %v2576_v53 = vsel %vm2573_vm13, %v2575_v6, %v2571_v34  ;;  %v2587_v63 = vand.u32 2147483647, %v6949_v22  ;;  %v2589_v3 = vand.u32 2147483648, %v6949_v22 }
 0x4c8   : > { %v2581_v15 = vmul.f32 %v7053_v57, %v2580_v48  ;;  %v2425_v47 = vsub.f32 0.0, %v2407_v46  ;;  %v2408_v35 = vadd.f32 %v6150_v39, %v2389_v37  ;;  %v3179_v60 = vmul.f32 %v2576_v53, %v8499_v33 }
 0x4c9   : > { %v7090_v49 = vsub.f32 %v8500_v44, %v2810_v55  ;;  %v7092_v17 = vpop.eup %4275  ;;  %v2391_v10 = vmul.f32 %v6140_v42, %v2372_v41  ;;  %4277 = vrsqrt.f32 %v7075_v45  ;;  %vm2583_vm3 = vweird.f32 %v6949_v22 }
 0x4ca   : > { %v2582_v4 = vadd.f32 %v7053_v57, %v2581_v15  ;;  %v2293_v18 = vmul.f32 0.5, %v2292_v9  ;;  %v3215_v46 = vadd.f32 %v3197_v50, %v3179_v60  ;;  %vm2585_vm2 = vmor %vm2583_vm3, %vm2584_vm14  ;;  %v2590_v51 = vor.u32 1.1754944e-38, %v2589_v3  ;;  %v8501_v50 = vld [vmem:[#allocation37_spill] sm:$0xff] }
 0x4cb   : > { %v3162_v37 = vadd.f32 %v8492_v24, %v3143_v12  ;;  %vm2588_vm4 = vcmp.eq.f32.partialorder %v2587_v63, 8.507059e+37  ;;  %v2846_v41 = vmul.f32 %v7090_v49, %v7090_v49  ;;  %v2157_v43 = vmul.f32 0.03125, %v2135_v27 }
 0x4cc   : > { %v2586_v16 = vsel %vm2585_vm2, %v7053_v57, %v2582_v4  ;;  %vm3014_vm5 = vweird.f32 %v6711_v29  ;;  %v2452_v19 = vmul.f32 1.442695, %v2425_v47  ;;  %v2426_v6 = vsub.f32 0.0, %v2408_v35  ;;  %3276 = vmatmul.f32.gmra.mxu0 %v3215_v46 }
 0x4cd   : > { %v2591_v22 = vsel %vm2588_vm4, %v2590_v51, %v2586_v16  ;;  %v3041_v9 = vmul.f32 0.5, %v7044_v56  ;;  %v2864_v48 = vmul.f32 %v2846_v41, %v5182_v8  ;;  %v7108_v12 = vadd.f32 1e-05, %v2157_v43  ;;  %vm7113_vm6 = vmor %vm3014_vm5, %vm3015_vm11 }
 0x4ce   : > { %v3180_v31 = vmul.f32 %v2591_v22, %v8501_v50  ;;  %4279 = vrcp.f32 %v6916_v5  ;;  %v3022_v29 = vsub.f32 1.5, %v6937_v2  ;;  %v2294_v34 = vsub.f32 1.5, %v2293_v18  ;;  %v1379_v44 = vpop.xlane.xlu0 %1378 }
 0x4cf   : > { %v3198_v55 = vmul.f32 %v3162_v37, %v6480_v11  ;;  %v7119_v56 = vpop.eup %4277  ;;  %v3017_v53 = vsel %vm7113_vm6, %v6785_v32, %v6926_v36  ;;  %v1702_v15 = vmul.f32 1.442695, %v1671_v1  ;;  %v2410_v63 = vadd.f32 %v6150_v39, %v2391_v10  ;;  %2898 = vadd.xlane.f32.xlu2 %v2864_v48  ;;  %v8504_v1 = vld [vmem:[#allocation29_spill] sm:$0xff] }
 0x4d0   : > { %4281 = vrsqrt.f32 %v7108_v12  ;;  %vm3024_vm7 = vweird.f32 %v6800_v25  ;;  %v2454_v2 = vmul.f32 1.442695, %v2426_v6  ;;  %v7131_v3 = vadd.f32 1.0, %v6959_v30  ;;  %v8509_v25 = vld [vmem:[#allocation63_spill] sm:$0xff] }
 0x4d1   : > { %4283 = vpow2.f32 %v2452_v19  ;;  %v3216_v11 = vadd.f32 %v3198_v55, %v3180_v31  ;;  %vm3025_vm8 = vweird.f32 %v6867_v14  ;;  %v7134_v47 = vadd.f32 1.0, %v4274_v26 }
 0x4d2   : > { %v3042_v32 = vsub.f32 1.5, %v3041_v9  ;;  %v7137_v36 = vmul.f32 %v6867_v14, %v3022_v29  ;;  %v2295_v58 = vmul.f32 %v7039_v38, %v2294_v34  ;;  %vm2297_vm9 = vweird.f32 %v7039_v38  ;;  %vm7179_vm0 = vmor %vm3024_vm7, %vm3025_vm8 }
 0x4d3   : > { %v3125_v35 = vmul.f32 %v3017_v53, %v8504_v1  ;;  %4285 = vpow2.f32 %v1702_v15  ;;  %v2428_v33 = vsub.f32 0.0, %v2410_v63  ;;  %vm3044_vm1 = vweird.f32 %v6903_v54 }
 0x4d4   : > { %v3029_v30 = vmul.f32 %v7119_v56, %v7075_v45  ;;  %v7145_v60 = vpop.eup %4279  ;;  %4287 = vpow2.f32 %v2454_v2  ;;  %vm2296_vm10 = vweird.f32 %v6981_v21  ;;  %3279 = vmatmul.f32.gmra.mxu0 %v3216_v11  ;;  %v2594_v26 = vmul.f32 %v7092_v17, %v7041_v23 }
 0x4d5   : > { %v1851_v27 = vmul.f32 %v6696_v59, %v6608_v40  ;;  %4289 = vrcp.f32 %v7134_v47  ;;  %v7156_v4 = vmul.f32 %v6955_v20, %v3042_v32  ;;  %vm3045_vm15 = vweird.f32 %v6955_v20  ;;  %vm7161_vm11 = vmor %vm2296_vm10, %vm2297_vm9 }
 0x4d6   : > { %v7152_v10 = vpop.eup %4281  ;;  %v1400_v18 = vmul.f32 0.03125, %v1379_v44  ;;  %v2299_v51 = vsel %vm7161_vm11, %v7039_v38, %v2295_v58  ;;  %v2595_v16 = vsub.f32 1.0, %v2594_v26  ;;  %v3144_v41 = vmul.f32 %v8489_v13, %v3125_v35  ;;  %vm7200_vm13 = vmor %vm3044_vm1, %vm3045_vm15 }
 0x4d7   : > { %v4284_v46 = vpop.eup %4283  ;;  %v2311_v37 = vmul.f32 %v7152_v10, %v7108_v12  ;;  %v2458_v43 = vmul.f32 1.442695, %v2428_v33  ;;  %v3030_v19 = vmul.f32 %v7119_v56, %v3029_v30  ;;  %v2604_v6 = vand.u32 2147483648, %v7041_v23  ;;  %v8512_v30 = vld [vmem:[#allocation38_spill] sm:$0xff] }
 0x4d8   : > { %v7173_v22 = vadd.f32 1e-05, %v1400_v18  ;;  %v2596_v38 = vmul.f32 %v7092_v17, %v2595_v16  ;;  %vm2599_vm12 = vweird.f32 %v7092_v17  ;;  %v2602_v50 = vand.u32 2147483647, %v7041_v23  ;;  %v8513_v18 = vld [vmem:[#allocation30_spill] sm:$0xff] }
 0x4d9   : > { %v1852_v31 = vsub.f32 1.0, %v1851_v27  ;;  %v7186_v48 = vpop.eup %4285  ;;  %v3027_v57 = vsel %vm7179_vm0, %v6867_v14, %v7137_v36  ;;  %v7192_v29 = vadd.f32 1.0, %v4284_v46  ;;  %v2371_v34 = vmul.f32 %v2299_v51, %v8509_v25  ;;  %v2137_v51 = vpop.xlane.xlu1 %2136 }
 0x4da   : > { %4291 = vrsqrt.f32 %v7173_v22  ;;  %v4288_v55 = vpop.eup %4287  ;;  %v2312_v15 = vmul.f32 %v7152_v10, %v2311_v37  ;;  %v2597_v63 = vadd.f32 %v7092_v17, %v2596_v38  ;;  %vm2598_vm14 = vweird.f32 %v7041_v23 }
 0x4db   : > { %v3163_v14 = vadd.f32 %v8492_v24, %v3144_v41  ;;  %v7208_v2 = vpop.eup %4289  ;;  %4293 = vpow2.f32 %v2458_v43  ;;  %v3047_v54 = vsel %vm7200_vm13, %v6955_v20, %v7156_v4  ;;  %v3031_v11 = vmul.f32 0.5, %v3030_v19  ;;  %vm2600_vm3 = vmor %vm2598_vm14, %vm2599_vm12  ;;  %v2139_v4 = vpop.xlane.xlu2 %2138 }
 0x4dc   : > { %v2605_v32 = vor.u32 1.1754944e-38, %v2604_v6  ;;  %v2601_v36 = vsel %vm2600_vm3, %v7092_v17, %v2597_v63  ;;  %vm2603_vm2 = vcmp.eq.f32.partialorder %v2602_v50, 8.507059e+37  ;;  %v1853_v23 = vmul.f32 %v6696_v59, %v1852_v31 }
 0x4dd   : > { %vm1855_vm4 = vweird.f32 %v6608_v40  ;;  %4295 = vrcp.f32 %v7192_v29  ;;  %v7220_v58 = vadd.f32 1.0, %v4288_v55  ;;  %v2390_v1 = vmul.f32 %v6140_v42, %v2371_v34 }
 0x4de   : > { %v2606_v35 = vsel %vm2603_vm2, %v2605_v32, %v2601_v36  ;;  %v2313_v33 = vmul.f32 0.5, %v2312_v15  ;;  %v3199_v44 = vmul.f32 %v3163_v14, %v6513_v7  ;;  %v2609_v17 = vmul.f32 %v7208_v2, %v7134_v47 }
 0x4df   : > { %v3181_v26 = vmul.f32 %v2606_v35, %v8512_v30  ;;  %v3032_v21 = vsub.f32 1.5, %v3031_v11  ;;  %vm3035_vm5 = vweird.f32 %v7119_v56  ;;  %vm1856_vm6 = vweird.f32 %v6696_v59 }
 0x4e0   : > { %v7227_v27 = vpop.eup %4291  ;;  %v3126_v46 = vmul.f32 %v3027_v57, %v8513_v18  ;;  %v1854_v41 = vadd.f32 %v6696_v59, %v1853_v23  ;;  %v1866_v7 = vmul.f32 %v6912_v52, %v6841_v28  ;;  %v7240_v19 = vadd.f32 %v6150_v39, %v2390_v1  ;;  %vm7253_vm7 = vmor %vm1855_vm4, %vm1856_vm6  ;;  %v8518_v18 = vld [vmem:[#allocation39_spill] sm:$0xff] }
 0x4e1   : > { %v3217_v37 = vadd.f32 %v3199_v44, %v3181_v26  ;;  %v1563_v16 = vmul.f32 %v7227_v27, %v7173_v22  ;;  %v7237_v43 = vpop.eup %4293  ;;  %v1859_v6 = vand.u32 2147483647, %v6608_v40  ;;  %v1861_v9 = vand.u32 2147483648, %v6608_v40 }
 0x4e2   : > { %v2610_v38 = vsub.f32 1.0, %v2609_v17  ;;  %v2314_v50 = vsub.f32 1.5, %v2313_v33  ;;  %v2619_v31 = vand.u32 2147483648, %v7134_v47  ;;  %v3145_v57 = vmul.f32 %v8489_v13, %v3126_v46 }
 0x4e3   : > { %3282 = vmatmul.f32.gmra.mxu0 %v3217_v37  ;;  %v2158_v25 = vmul.f32 0.03125, %v2137_v51  ;;  %v7246_v34 = vpop.eup %4295  ;;  %v1564_v55 = vmul.f32 %v7227_v27, %v1563_v16  ;;  %vm2614_vm8 = vweird.f32 %v7208_v2  ;;  %v2617_v14 = vand.u32 2147483647, %v7134_v47 }
 0x4e4   : > { %v2611_v63 = vmul.f32 %v7208_v2, %v2610_v38  ;;  %v3033_v11 = vmul.f32 %v7119_v56, %v3032_v21  ;;  %v1858_v32 = vsel %vm7253_vm7, %v6696_v59, %v1854_v41  ;;  %v1867_v23 = vsub.f32 1.0, %v1866_v7 }
 0x4e5   : > { %v7264_v36 = vadd.f32 1e-05, %v2158_v25  ;;  %vm1860_vm9 = vcmp.eq.f32.partialorder %v1859_v6, 8.507059e+37  ;;  %vm2613_vm1 = vweird.f32 %v7134_v47  ;;  %v3164_v1 = vadd.f32 %v8492_v24, %v3145_v57  ;;  %v2889_v6 = vpop.xlane.xlu0 %2888  ;;  %v1381_v57 = vpop.xlane.xlu1 %1380 }
 0x4e6   : > { %v2612_v40 = vadd.f32 %v7208_v2, %v2611_v63  ;;  %v2315_v35 = vmul.f32 %v7152_v10, %v2314_v50  ;;  %vm2317_vm10 = vweird.f32 %v7152_v10  ;;  %v1862_v33 = vor.u32 1.1754944e-38, %v1861_v9  ;;  %vm2615_vm15 = vmor %vm2613_vm1, %vm2614_vm8 }
 0x4e7   : > { %v2620_v30 = vor.u32 1.1754944e-38, %v2619_v31  ;;  %v1565_v26 = vmul.f32 0.5, %v1564_v55  ;;  %vm2618_vm11 = vcmp.eq.f32.partialorder %v2617_v14, 8.507059e+37  ;;  %4297 = vrsqrt.f32 %v7264_v36 }
 0x4e8   : > { %v2616_v59 = vsel %vm2615_vm15, %v7208_v2, %v2612_v40  ;;  %vm2316_vm0 = vweird.f32 %v7108_v12  ;;  %v1863_v44 = vsel %vm1860_vm9, %v1862_v33, %v1858_v32  ;;  %v1868_v47 = vmul.f32 %v6912_v52, %v1867_v23  ;;  %v8524_v32 = vld [vmem:[#allocation65_spill] sm:$0xff] }
 0x4e9   : > { %v2621_v17 = vsel %vm2618_vm11, %v2620_v30, %v2616_v59  ;;  %vm3034_vm12 = vweird.f32 %v7075_v45  ;;  %vm7276_vm14 = vmor %vm2316_vm0, %vm2317_vm10  ;;  %v3200_v51 = vmul.f32 %v3164_v1, %v1863_v44  ;;  %v1874_v2 = vand.u32 2147483647, %v6841_v28 }
 0x4ea   : > { %v3182_v46 = vmul.f32 %v2621_v17, %v8518_v18  ;;  %v7283_v37 = vadd.f32 1.0, %v7186_v48  ;;  %4299 = vrcp.f32 %v7220_v58  ;;  %v2427_v12 = vsub.f32 0.0, %v7240_v19  ;;  %vm7289_vm3 = vmor %vm3034_vm12, %vm3035_vm5 }
 0x4eb   : > { %v2319_v16 = vsel %vm7276_vm14, %v7152_v10, %v2315_v35  ;;  %v3037_v41 = vsel %vm7289_vm3, %v7119_v56, %v3033_v11  ;;  %v1566_v48 = vsub.f32 1.5, %v1565_v26  ;;  %vm1870_vm2 = vweird.f32 %v6841_v28  ;;  %v8521_v10 = vld [vmem:[#allocation67_spill] sm:$0xff] }
 0x4ec   : > { %v3218_v7 = vadd.f32 %v3200_v51, %v3182_v46  ;;  %v1869_v19 = vadd.f32 %v6912_v52, %v1868_v47  ;;  %vm1871_vm4 = vweird.f32 %v6912_v52  ;;  %v1876_v9 = vand.u32 2147483648, %v6841_v28 }
 0x4ed   : > { %v2624_v38 = vmul.f32 %v7246_v34, %v7192_v29  ;;  %v7305_v50 = vpop.eup %4297  ;;  %v2373_v31 = vmul.f32 %v2319_v16, %v8521_v10  ;;  %vm1568_vm5 = vweird.f32 %v7173_v22  ;;  %vm7309_vm6 = vcmp.eq.f32.partialorder %v1874_v2, 8.507059e+37  ;;  %vm7329_vm9 = vmor %vm1870_vm2, %vm1871_vm4 }
 0x4ee   : > { %3285 = vmatmul.f32.gmra.mxu0 %v3218_v7  ;;  %v1881_v25 = vmul.f32 %v7145_v60, %v6916_v5  ;;  %vm1569_vm7 = vweird.f32 %v7227_v27  ;;  %v2913_v55 = vmul.f32 0.03125, %v2889_v6  ;;  %v2321_v15 = vmul.f32 %v7305_v50, %v7264_v36  ;;  %v8529_v6 = vld [vmem:[#allocation68_spill] sm:$0xff] }
 0x4ef   : > { %v2625_v63 = vsub.f32 1.0, %v2624_v38  ;;  %v1567_v14 = vmul.f32 %v7227_v27, %v1566_v48  ;;  %vm2629_vm8 = vweird.f32 %v7246_v34  ;;  %v2634_v11 = vand.u32 2147483648, %v7192_v29  ;;  %vm7344_vm1 = vmor %vm1568_vm5, %vm1569_vm7 }
 0x4f0   : > { %v3127_v23 = vmul.f32 %v3037_v41, %v8524_v32  ;;  %v7322_v40 = vpop.eup %4299  ;;  %v2322_v1 = vmul.f32 %v7305_v50, %v2321_v15  ;;  %v2632_v30 = vand.u32 2147483647, %v7192_v29  ;;  %v1401_v26 = vmul.f32 0.03125, %v1381_v57  ;;  %v8531_v57 = vld [vmem:[#allocation61_spill] sm:$0xff]  ;;  %v8538_v15 = vld [vmem:[#allocation32_spill] sm:$0xff] }
 0x4f1   : > { %v2626_v33 = vmul.f32 %v7246_v34, %v2625_v63  ;;  %v2392_v59 = vmul.f32 %v6140_v42, %v2373_v31  ;;  %v1873_v44 = vsel %vm7329_vm9, %v6912_v52, %v1869_v19  ;;  %v1877_v17 = vor.u32 1.1754944e-38, %v1876_v9  ;;  %v8530_v9 = vld [vmem:[#allocation40_spill] sm:$0xff] }
 0x4f2   : > { %v3146_v47 = vmul.f32 %v8489_v13, %v3127_v23  ;;  %v2323_v21 = vmul.f32 0.5, %v2322_v1  ;;  %vm2628_vm10 = vweird.f32 %v7192_v29  ;;  %v7350_v46 = vadd.f32 1e-05, %v1401_v26  ;;  %v8534_v26 = vld [vmem:[#allocation69_spill] sm:$0xff] }
 0x4f3   : > { %v2627_v18 = vadd.f32 %v7246_v34, %v2626_v33  ;;  %v1571_v52 = vsel %vm7344_vm1, %v7227_v27, %v1567_v14  ;;  %v7355_v51 = vadd.f32 1e-05, %v2913_v55  ;;  %vm2630_vm15 = vmor %vm2628_vm10, %vm2629_vm8  ;;  %v2635_v22 = vor.u32 1.1754944e-38, %v2634_v11 }
 0x4f4   : > { %v3165_v2 = vadd.f32 %v8492_v24, %v3146_v47  ;;  %v2324_v45 = vsub.f32 1.5, %v2323_v21  ;;  %vm2633_vm11 = vcmp.eq.f32.partialorder %v2632_v30, 8.507059e+37  ;;  %v1882_v41 = vsub.f32 1.0, %v1881_v25 }
 0x4f5   : > { %v2631_v16 = vsel %vm2630_vm15, %v7246_v34, %v2627_v18  ;;  %v2456_v29 = vmul.f32 1.442695, %v2427_v12  ;;  %v2411_v48 = vadd.f32 %v6150_v39, %v2392_v59  ;;  %v1878_v7 = vsel %vm7309_vm6, %v1877_v17, %v1873_v44 }
 0x4f6   : > { %v2636_v27 = vsel %vm2633_vm11, %v2635_v22, %v2631_v16  ;;  %v1616_v19 = vmul.f32 %v1571_v52, %v8529_v6  ;;  %v3201_v10 = vmul.f32 %v3165_v2, %v1878_v7  ;;  %4301 = vrsqrt.f32 %v7350_v46 }
 0x4f7   : > { %v3183_v38 = vmul.f32 %v2636_v27, %v8530_v9  ;;  %4303 = vrsqrt.f32 %v7355_v51  ;;  %v2325_v34 = vmul.f32 %v7305_v50, %v2324_v45  ;;  %vm2327_vm0 = vweird.f32 %v7305_v50 }
 0x4f8   : > { %4305 = vrcp.f32 %v7131_v3  ;;  %v1883_v31 = vmul.f32 %v7145_v60, %v1882_v41  ;;  %v2429_v56 = vsub.f32 0.0, %v2411_v48  ;;  %vm2326_vm12 = vweird.f32 %v7264_v36 }
 0x4f9   : > { %v3219_v12 = vadd.f32 %v3201_v10, %v3183_v38  ;;  %4307 = vrcp.f32 %v7283_v37  ;;  %v3128_v25 = vmul.f32 %v3047_v54, %v8531_v57  ;;  %v1635_v55 = vmul.f32 %v5573_v62, %v1616_v19  ;;  %vm7381_vm14 = vmor %vm2326_vm12, %vm2327_vm0  ;;  %v8537_v10 = vld [vmem:[#allocation41_spill] sm:$0xff] }
 0x4fa   : > { %4309 = vpow2.f32 %v2456_v29  ;;  %v2329_v63 = vsel %vm7381_vm14, %v7305_v50, %v2325_v34  ;;  %vm1885_vm3 = vweird.f32 %v6916_v5  ;;  %vm1886_vm2 = vweird.f32 %v7145_v60 }
 0x4fb   : > { %3288 = vmatmul.f32.gmra.mxu0 %v3219_v12  ;;  %v2639_v20 = vmul.f32 %v7322_v40, %v7220_v58  ;;  %v1884_v54 = vadd.f32 %v7145_v60, %v1883_v31  ;;  %v1889_v36 = vand.u32 2147483647, %v6916_v5  ;;  %v1891_v14 = vand.u32 2147483648, %v6916_v5  ;;  %vm7416_vm13 = vmor %vm1885_vm3, %vm1886_vm2  ;;  %v2891_v31 = vpop.xlane.xlu0 %2890 }
 0x4fc   : > { %v7392_v53 = vpop.eup %4301  ;;  %v2159_v11 = vmul.f32 0.03125, %v2139_v4  ;;  %v2460_v50 = vmul.f32 1.442695, %v2429_v56  ;;  %v3147_v35 = vmul.f32 %v8489_v13, %v3128_v25  ;;  %v1654_v30 = vadd.f32 %v5579_v0, %v1635_v55  ;;  %v1383_v56 = vpop.xlane.xlu1 %1382 }
 0x4fd   : > { %v7397_v32 = vpop.eup %4303  ;;  %v1573_v23 = vmul.f32 %v7392_v53, %v7350_v46  ;;  %v2640_v1 = vsub.f32 1.0, %v2639_v20  ;;  %v2374_v59 = vmul.f32 %v2329_v63, %v8534_v26  ;;  %v2649_v44 = vand.u32 2147483648, %v7220_v58  ;;  %v8539_v63 = vld [vmem:[#allocation56_spill] sm:$0xff] }
 0x4fe   : > { %v7402_v33 = vpop.eup %4305  ;;  %v7407_v17 = vadd.f32 1e-05, %v2159_v11  ;;  %vm2644_vm4 = vweird.f32 %v7322_v40  ;;  %v2647_v52 = vand.u32 2147483647, %v7220_v58  ;;  %v7424_v2 = vadd.f32 1.0, %v7237_v43 }
 0x4ff   : > { %v7409_v47 = vpop.eup %4307  ;;  %v1574_v28 = vmul.f32 %v7392_v53, %v1573_v23  ;;  %v2641_v18 = vmul.f32 %v7322_v40, %v2640_v1  ;;  %v3049_v45 = vmul.f32 %v7397_v32, %v7355_v51  ;;  %v1888_v5 = vsel %vm7416_vm13, %v7145_v60, %v1884_v54 }
 0x500   : > { %v4310_v22 = vpop.eup %4309  ;;  %4311 = vrsqrt.f32 %v7407_v17  ;;  %vm2643_vm5 = vweird.f32 %v7220_v58  ;;  %v3166_v29 = vadd.f32 %v8492_v24, %v3147_v35  ;;  %vm1890_vm6 = vcmp.eq.f32.partialorder %v1889_v36, 8.507059e+37 }
 0x501   : > { %v1575_v16 = vmul.f32 0.5, %v1574_v28  ;;  %v2642_v41 = vadd.f32 %v7322_v40, %v2641_v18  ;;  %4313 = vpow2.f32 %v2460_v50  ;;  %v1892_v43 = vor.u32 1.1754944e-38, %v1891_v14  ;;  %vm2645_vm7 = vmor %vm2643_vm5, %vm2644_vm4 }
 0x502   : > { %v2650_v48 = vor.u32 1.1754944e-38, %v2649_v44  ;;  %v1672_v7 = vsub.f32 0.0, %v1654_v30  ;;  %v2393_v27 = vmul.f32 %v6140_v42, %v2374_v59  ;;  %vm2648_vm8 = vcmp.eq.f32.partialorder %v2647_v52, 8.507059e+37  ;;  %v4413_v59 = vld [vmem:[#allocation13] sm:$0xff] }
 0x503   : > { %v2646_v6 = vsel %vm2645_vm7, %v7322_v40, %v2642_v41  ;;  %v7437_v60 = vadd.f32 1.0, %v4310_v22  ;;  %v1576_v19 = vsub.f32 1.5, %v1575_v16  ;;  %v1893_v9 = vsel %vm1890_vm6, %v1892_v43, %v1888_v5 }
 0x504   : > { %v2651_v38 = vsel %vm2648_vm8, %v2650_v48, %v2646_v6  ;;  %v3050_v58 = vmul.f32 %v7397_v32, %v3049_v45  ;;  %v3202_v12 = vmul.f32 %v3166_v29, %v1893_v9  ;;  %v1896_v57 = vmul.f32 %v7402_v33, %v7131_v3  ;;  %v8542_v48 = vld [vmem:[#allocation71_spill] sm:$0xff]  ;;  %v1385_v9 = vpop.xlane.xlu1 %1384 }
 0x505   : > { %v3184_v34 = vmul.f32 %v2651_v38, %v8537_v10  ;;  %4315 = vrcp.f32 %v7424_v2  ;;  %v2914_v40 = vmul.f32 0.03125, %v2891_v31  ;;  %v1402_v55 = vmul.f32 0.03125, %v1383_v56  ;;  %v8543_v56 = vld [vmem:[#allocation73_spill] sm:$0xff] }
 0x506   : > { %v4312_v25 = vpop.eup %4311  ;;  %v1911_v20 = vmul.f32 %v8539_v63, %v8538_v15  ;;  %v1704_v4 = vmul.f32 1.442695, %v1672_v7  ;;  %v2412_v54 = vadd.f32 %v6150_v39, %v2393_v27  ;;  %v1577_v50 = vmul.f32 %v7392_v53, %v1576_v19 }
 0x507   : > { %v3220_v36 = vadd.f32 %v3202_v12, %v3184_v34  ;;  %v2331_v14 = vmul.f32 %v4312_v25, %v7407_v17  ;;  %v4314_v11 = vpop.eup %4313  ;;  %vm1579_vm9 = vweird.f32 %v7392_v53  ;;  %v7450_v23 = vadd.f32 1e-05, %v2914_v40 }
 0x508   : > { %v7452_v1 = vadd.f32 1e-05, %v1402_v55  ;;  %4317 = vrcp.f32 %v7437_v60  ;;  %v3051_v35 = vmul.f32 0.5, %v3050_v58  ;;  %v1897_v26 = vsub.f32 1.0, %v1896_v57 }
 0x509   : > { %3291 = vmatmul.f32.gmra.mxu0 %v3220_v36  ;;  %v2332_v30 = vmul.f32 %v4312_v25, %v2331_v14  ;;  %vm1578_vm1 = vweird.f32 %v7350_v46  ;;  %4319 = vrsqrt.f32 %v7450_v23  ;;  %v7457_v44 = vperm.slane %v4413_v59, 3 }
 0x50a   : > { %vm7459_vm10 = vmor %vm1578_vm1, %vm1579_vm9  ;;  %4321 = vrsqrt.f32 %v7452_v1  ;;  %v1912_v18 = vsub.f32 1.0, %v1911_v20  ;;  %v7466_v22 = vadd.f32 1.0, %v4314_v11  ;;  %v2430_v45 = vsub.f32 0.0, %v2412_v54 }
 0x50b   : > { %v2333_v21 = vmul.f32 0.5, %v2332_v30  ;;  %v7464_v52 = vpop.eup %4315  ;;  %4323 = vpow2.f32 %v1704_v4  ;;  %v1581_v46 = vsel %vm7459_vm10, %v7392_v53, %v1577_v50  ;;  %v3052_v5 = vsub.f32 1.5, %v3051_v35 }
 0x50c   : > { %vm2337_vm15 = vweird.f32 %v4312_v25  ;;  %v1898_v41 = vmul.f32 %v7402_v33, %v1897_v26  ;;  %vm3054_vm11 = vweird.f32 %v7355_v51  ;;  %vm1900_vm0 = vweird.f32 %v7131_v3 }
 0x50d   : > { %v2334_v16 = vsub.f32 1.5, %v2333_v21  ;;  %vm1901_vm12 = vweird.f32 %v7402_v33  ;;  %v1904_v29 = vand.u32 2147483647, %v7131_v3  ;;  %v1617_v7 = vmul.f32 %v1581_v46, %v8542_v48 }
 0x50e   : > { %v7476_v43 = vpop.eup %4317  ;;  %vm2336_vm14 = vweird.f32 %v7407_v17  ;;  %v1913_v53 = vmul.f32 %v8539_v63, %v1912_v18  ;;  %4325 = vrcp.f32 %v7466_v22  ;;  %vm3055_vm3 = vweird.f32 %v7397_v32  ;;  %vm7507_vm5 = vmor %vm1900_vm0, %vm1901_vm12 }
 0x50f   : > { %v2335_v27 = vmul.f32 %v4312_v25, %v2334_v16  ;;  %v7481_v6 = vpop.eup %4319  ;;  %v2462_v19 = vmul.f32 1.442695, %v2430_v45  ;;  %vm2338_vm2 = vmor %vm2336_vm14, %vm2337_vm15  ;;  %v1906_v38 = vand.u32 2147483648, %v7131_v3  ;;  %v7488_v10 = vmul.f32 %v7397_v32, %v3052_v5 }
 0x510   : > { %v4322_v58 = vpop.eup %4321  ;;  %v1403_v17 = vmul.f32 0.03125, %v1385_v9  ;;  %v1899_v12 = vadd.f32 %v7402_v33, %v1898_v41  ;;  %v2654_v55 = vmul.f32 %v7476_v43, %v7437_v60  ;;  %vm1915_vm13 = vweird.f32 %v8538_v15  ;;  %vm7518_vm6 = vmor %vm3054_vm11, %vm3055_vm3 }
 0x511   : > { %v2339_v34 = vsel %vm2338_vm2, %v4312_v25, %v2335_v27  ;;  %v4324_v31 = vpop.eup %4323  ;;  %v1583_v40 = vmul.f32 %v4322_v58, %v7452_v1  ;;  %v1636_v20 = vmul.f32 %v5573_v62, %v1617_v7  ;;  %v1914_v54 = vadd.f32 %v8539_v63, %v1913_v53  ;;  %v2141_v27 = vpop.xlane.xlu2 %2140 }
 0x512   : > { %v2375_v57 = vmul.f32 %v2339_v34, %v8543_v56  ;;  %v7497_v4 = vadd.f32 1e-05, %v1403_v17  ;;  %vm1916_vm4 = vweird.f32 %v8539_v63  ;;  %4327 = vpow2.f32 %v2462_v19 }
 0x513   : > { %v3059_v25 = vmul.f32 %v7481_v6, %v7450_v23  ;;  %v1584_v36 = vmul.f32 %v4322_v58, %v1583_v40  ;;  %v1921_v11 = vand.u32 2147483648, %v8538_v15  ;;  %v7512_v50 = vadd.f32 1.0, %v4324_v31  ;;  %vm7538_vm7 = vmor %vm1915_vm13, %vm1916_vm4  ;;  %v8550_v40 = vld [vmem:[#allocation72_spill] sm:$0xff] }
 0x514   : > { %v2394_v30 = vmul.f32 %v6140_v42, %v2375_v57  ;;  %4329 = vrsqrt.f32 %v7497_v4  ;;  %v1919_v3 = vand.u32 2147483647, %v8538_v15  ;;  %v7525_v26 = vpop.eup %4325  ;;  %v3057_v59 = vsel %vm7518_vm6, %v7397_v32, %v7488_v10 }
 0x515   : > { %v1585_v28 = vmul.f32 0.5, %v1584_v36  ;;  %v1903_v51 = vsel %vm7507_vm5, %v7402_v33, %v1899_v12  ;;  %v2655_v21 = vsub.f32 1.0, %v2654_v55  ;;  %v1655_v45 = vadd.f32 %v5579_v0, %v1636_v20 }
 0x516   : > { %vm1905_vm8 = vcmp.eq.f32.partialorder %v1904_v29, 8.507059e+37  ;;  %v1907_v46 = vor.u32 1.1754944e-38, %v1906_v38  ;;  %v1918_v32 = vsel %vm7538_vm7, %v8539_v63, %v1914_v54  ;;  %v3060_v5 = vmul.f32 %v7481_v6, %v3059_v25  ;;  %v3262_v29 = vpop.f32.mrf.mxu0 }
 0x517   : > { %v1586_v33 = vsub.f32 1.5, %v1585_v28  ;;  %vm1589_vm9 = vweird.f32 %v4322_v58  ;;  %v1922_v16 = vor.u32 1.1754944e-38, %v1921_v11  ;;  %4331 = vrcp.f32 %v7512_v50 }
 0x518   : > { %v2413_v15 = vadd.f32 %v6150_v39, %v2394_v30  ;;  %v7549_v41 = vsel %vm1905_vm8, %v1907_v46, %v1903_v51  ;;  %vm1920_vm1 = vcmp.eq.f32.partialorder %v1919_v3, 8.507059e+37  ;;  %v4328_v48 = vpop.eup %4327  ;;  %vm1588_vm10 = vweird.f32 %v7452_v1 }
 0x519   : > { %v1587_v7 = vmul.f32 %v4322_v58, %v1586_v33  ;;  %v2656_v63 = vmul.f32 %v7476_v43, %v2655_v21  ;;  %v7553_v53 = vsel %vm1920_vm1, %v1922_v16, %v1918_v32  ;;  %v1673_v9 = vsub.f32 0.0, %v1655_v45  ;;  %vm1590_vm15 = vmor %vm1588_vm10, %vm1589_vm9  ;;  %v8555_v32 = vld [vmem:[#allocation70_spill] sm:$0xff] }
 0x51a   : > { %v7555_v19 = vpop.eup %4329  ;;  %v7559_v38 = vadd.f32 %v3262_v29, %v7457_v44  ;;  %v2160_v10 = vmul.f32 0.03125, %v2141_v27  ;;  %v2662_v34 = vand.u32 2147483647, %v7437_v60  ;;  %v3061_v17 = vmul.f32 0.5, %v3060_v5 }
 0x51b   : > { %v1591_v12 = vsel %vm1590_vm15, %v4322_v58, %v1587_v7  ;;  %v1593_v1 = vmul.f32 %v7555_v19, %v7497_v4  ;;  %v2664_v31 = vand.u32 2147483648, %v7437_v60  ;;  %v7565_v56 = vadd.f32 1.0, %v4328_v48  ;;  %v2893_v7 = vpop.xlane.xlu0 %2892 }
 0x51c   : > { %v2431_v57 = vsub.f32 0.0, %v2413_v15  ;;  %v1618_v55 = vmul.f32 %v1591_v12, %v8550_v40  ;;  %v7568_v20 = vadd.f32 1e-05, %v2160_v10  ;;  %3316 = vadd.xlane.f32.xlu1 %v7559_v38  ;;  %v2657_v25 = vadd.f32 %v7476_v43, %v2656_v63 }
 0x51d   : > { %v1594_v54 = vmul.f32 %v7555_v19, %v1593_v1  ;;  %vm2658_vm11 = vweird.f32 %v7437_v60  ;;  %vm2659_vm0 = vweird.f32 %v7476_v43  ;;  %v7575_v58 = vpop.eup %4331  ;;  %v1706_v36 = vmul.f32 1.442695, %v1673_v9 }
 0x51e   : > { %vm3064_vm12 = vweird.f32 %v7450_v23  ;;  %4333 = vrsqrt.f32 %v7568_v20  ;;  %v2669_v14 = vmul.f32 %v7464_v52, %v7424_v2  ;;  %v1926_v11 = vmul.f32 %v7409_v47, %v7283_v37  ;;  %vm7589_vm3 = vmor %vm2658_vm11, %vm2659_vm0  ;;  %v3265_v27 = vpop.f32.mrf.mxu0 }
 0x51f   : > { %v3062_v35 = vsub.f32 1.5, %v3061_v17  ;;  %v1637_v30 = vmul.f32 %v5573_v62, %v1618_v55  ;;  %v1595_v3 = vmul.f32 0.5, %v1594_v54  ;;  %vm7584_vm14 = vcmp.eq.f32.partialorder %v2662_v34, 8.507059e+37  ;;  %v2143_v34 = vpop.xlane.xlu2 %2142 }
 0x520   : > { %4335 = vrcp.f32 %v7565_v56  ;;  %v2464_v28 = vmul.f32 1.442695, %v2431_v57  ;;  %v2665_v21 = vor.u32 1.1754944e-38, %v2664_v31  ;;  %v1936_v18 = vand.u32 2147483648, %v7283_v37 }
 0x521   : > { %vm3065_vm2 = vweird.f32 %v7481_v6  ;;  %v1596_v45 = vsub.f32 1.5, %v1595_v3  ;;  %v2661_v46 = vsel %vm7589_vm3, %v7476_v43, %v2657_v25  ;;  %v3129_v5 = vmul.f32 %v3057_v59, %v8555_v32 }
 0x522   : > { %4337 = vpow2.f32 %v1706_v36  ;;  %vm1598_vm13 = vweird.f32 %v7497_v4  ;;  %v2670_v33 = vsub.f32 1.0, %v2669_v14  ;;  %v1927_v16 = vsub.f32 1.0, %v1926_v11  ;;  %vm7628_vm6 = vmor %vm3064_vm12, %vm3065_vm2  ;;  %v8558_v11 = vld [vmem:[#allocation42_spill] sm:$0xff] }
 0x523   : > { %v3063_v15 = vmul.f32 %v7481_v6, %v3062_v35  ;;  %v1656_v48 = vadd.f32 %v5579_v0, %v1637_v30  ;;  %v3148_v29 = vmul.f32 %v8489_v13, %v3129_v5  ;;  %v2677_v63 = vand.u32 2147483647, %v7424_v2 }
 0x524   : > { %vm1930_vm4 = vweird.f32 %v7283_v37  ;;  %v7605_v43 = vpop.eup %4333  ;;  %4339 = vpow2.f32 %v2464_v28  ;;  %v2915_v59 = vmul.f32 0.03125, %v2893_v7  ;;  %v2666_v9 = vsel %vm7584_vm14, %v2665_v21, %v2661_v46 }
 0x525   : > { %v7610_v10 = vadd.f32 %v3265_v27, %v7457_v44  ;;  %v1597_v17 = vmul.f32 %v7555_v19, %v1596_v45  ;;  %vm1599_vm5 = vweird.f32 %v7555_v19  ;;  %v2341_v12 = vmul.f32 %v7605_v43, %v7568_v20 }
 0x526   : > { %v3167_v1 = vadd.f32 %v8492_v24, %v3148_v29  ;;  %v7617_v31 = vpop.eup %4335  ;;  %v7619_v57 = vadd.f32 1e-05, %v2915_v59  ;;  %v2161_v40 = vmul.f32 0.03125, %v2143_v34  ;;  %v2671_v55 = vmul.f32 %v7464_v52, %v2670_v33  ;;  %vm7639_vm7 = vmor %vm1598_vm13, %vm1599_vm5 }
 0x527   : > { %3318 = vadd.xlane.f32.xlu2 %v7610_v10  ;;  %v1928_v54 = vmul.f32 %v7409_v47, %v1927_v16  ;;  %v1674_v36 = vsub.f32 0.0, %v1656_v48  ;;  %v2342_v14 = vmul.f32 %v7605_v43, %v2341_v12  ;;  %v3185_v35 = vmul.f32 %v2666_v9, %v8558_v11  ;;  %v8561_v16 = vld [vmem:[#allocation74_spill] sm:$0xff]  ;;  %v8562_v48 = vld [vmem:[#allocation75_spill] sm:$0xff] }
 0x528   : > { %v3203_v30 = vmul.f32 %v3167_v1, %v7549_v41  ;;  %v4338_v3 = vpop.eup %4337  ;;  %4341 = vrsqrt.f32 %v7619_v57  ;;  %v7644_v23 = vadd.f32 1e-05, %v2161_v40  ;;  %v2679_v28 = vand.u32 2147483648, %v7424_v2 }
 0x529   : > { %vm1931_vm8 = vweird.f32 %v7409_v47  ;;  %v3067_v41 = vsel %vm7628_vm6, %v7481_v6, %v3063_v15  ;;  %v1601_v4 = vsel %vm7639_vm7, %v7555_v19, %v1597_v17  ;;  %v2343_v51 = vmul.f32 0.5, %v2342_v14  ;;  %v3268_v6 = vpop.f32.mrf.mxu0 }
 0x52a   : > { %v3221_v21 = vadd.f32 %v3203_v30, %v3185_v35  ;;  %v4340_v45 = vpop.eup %4339  ;;  %4343 = vrsqrt.f32 %v7644_v23  ;;  %v2672_v46 = vadd.f32 %v7464_v52, %v2671_v55  ;;  %vm2674_vm9 = vweird.f32 %v7464_v52  ;;  %vm7672_vm15 = vmor %vm1930_vm4, %vm1931_vm8  ;;  %v2895_v55 = vpop.xlane.xlu0 %2894 }
 0x52b   : > { %v7658_v32 = vadd.f32 %v7409_v47, %v1928_v54  ;;  %v1708_v5 = vmul.f32 1.442695, %v1674_v36  ;;  %v2344_v33 = vsub.f32 1.5, %v2343_v51  ;;  %vm2347_vm1 = vweird.f32 %v7605_v43  ;;  %v2897_v54 = vpop.xlane.xlu1 %2896  ;;  %v8569_v36 = vld [vmem:[#allocation53_spill] sm:$0xff] }
 0x52c   : > { %3294 = vmatmul.f32.gmra.mxu0 %v3221_v21  ;;  %v1934_v19 = vand.u32 2147483647, %v7283_v37  ;;  %v3130_v15 = vmul.f32 %v3067_v41, %v8561_v16  ;;  %v1619_v7 = vmul.f32 %v1601_v4, %v8562_v48  ;;  %v7665_v29 = vadd.f32 %v3268_v6, %v7457_v44 }
 0x52d   : > { %vm2673_vm10 = vweird.f32 %v7424_v2  ;;  %v2345_v59 = vmul.f32 %v7605_v43, %v2344_v33  ;;  %vm2346_vm11 = vweird.f32 %v7568_v20  ;;  %vm7684_vm12 = vcmp.eq.f32.partialorder %v2677_v63, 8.507059e+37 }
 0x52e   : > { %vm7680_vm0 = vmor %vm2673_vm10, %vm2674_vm9  ;;  %v7690_v34 = vor.u32 1.1754944e-38, %v1936_v18  ;;  %v4342_v17 = vpop.eup %4341  ;;  %v7692_v12 = vadd.f32 1.0, %v4338_v3  ;;  %v2680_v1 = vor.u32 1.1754944e-38, %v2679_v28  ;;  %3320 = vadd.xlane.f32.xlu0 %v7665_v29  ;;  %v1933_v37 = vsel %vm7672_vm15, %v7409_v47, %v7658_v32  ;;  %v8572_v32 = vld [vmem:[#allocation43_spill] sm:$0xff] }
 0x52f   : > { %vm2348_vm14 = vmor %vm2346_vm11, %vm2347_vm1  ;;  %v2676_v20 = vsel %vm7680_vm0, %v7464_v52, %v2672_v46  ;;  %v7704_v18 = vadd.f32 1.0, %v4340_v45  ;;  %4345 = vpow2.f32 %v1708_v5  ;;  %v3069_v40 = vmul.f32 %v4342_v17, %v7619_v57 }
 0x530   : > { %v2349_v63 = vsel %vm2348_vm14, %v7605_v43, %v2345_v59  ;;  %v4344_v25 = vpop.eup %4343  ;;  %v1638_v52 = vmul.f32 %v5573_v62, %v1619_v7  ;;  %v2916_v11 = vmul.f32 0.03125, %v2895_v55  ;;  %v3149_v35 = vmul.f32 %v8489_v13, %v3130_v15 }
 0x531   : > { %v2376_v14 = vmul.f32 %v2349_v63, %v8569_v36  ;;  %v3070_v30 = vmul.f32 %v4342_v17, %v3069_v40  ;;  %v2351_v47 = vmul.f32 %v4344_v25, %v7644_v23  ;;  %v2681_v3 = vsel %vm7684_vm12, %v2680_v1, %v2676_v20  ;;  %v8573_v36 = vld [vmem:[#allocation31_spill] sm:$0xff] }
 0x532   : > { %v2917_v60 = vmul.f32 0.03125, %v2897_v54  ;;  %vm7714_vm3 = vcmp.eq.f32.partialorder %v1934_v19, 8.507059e+37  ;;  %v7719_v41 = vadd.f32 1e-05, %v2916_v11  ;;  %v3168_v62 = vadd.f32 %v8492_v24, %v3149_v35 }
 0x533   : > { %v2395_v28 = vmul.f32 %v6140_v42, %v2376_v14  ;;  %v2684_v4 = vmul.f32 %v7525_v26, %v7466_v22  ;;  %v3071_v51 = vmul.f32 0.5, %v3070_v30  ;;  %vm3074_vm2 = vweird.f32 %v7619_v57 }
 0x534   : > { %v2352_v21 = vmul.f32 %v4344_v25, %v2351_v47  ;;  %v7725_v45 = vadd.f32 1e-05, %v2917_v60  ;;  %4347 = vrsqrt.f32 %v7719_v41  ;;  %v3186_v5 = vmul.f32 %v2681_v3, %v8572_v32  ;;  %v2901_v20 = vpop.xlane.xlu0 %2900 }
 0x535   : > { %v2414_v46 = vadd.f32 %v6150_v39, %v2395_v28  ;;  %v3204_v33 = vmul.f32 %v3168_v62, %v7553_v53  ;;  %v4346_v6 = vpop.eup %4345  ;;  %v3072_v19 = vsub.f32 1.5, %v3071_v51  ;;  %vm3075_vm13 = vweird.f32 %v4342_v17 }
 0x536   : > { %v2353_v16 = vmul.f32 0.5, %v2352_v21  ;;  %4349 = vrsqrt.f32 %v7725_v45  ;;  %v3271_v15 = vpop.f32.mrf.mxu0  ;;  %v1657_v48 = vadd.f32 %v5579_v0, %v1638_v52  ;;  %v2685_v59 = vsub.f32 1.0, %v2684_v4  ;;  %vm3076_vm6 = vmor %vm3074_vm2, %vm3075_vm13 }
 0x537   : > { %v2432_v7 = vsub.f32 0.0, %v2414_v46  ;;  %v3222_v27 = vadd.f32 %v3204_v33, %v3186_v5  ;;  %v3073_v9 = vmul.f32 %v4342_v17, %v3072_v19  ;;  %vm2356_vm4 = vweird.f32 %v7644_v23  ;;  %v8574_v23 = vld [vmem:[#allocation54_spill] sm:$0xff] }
 0x538   : > { %v2354_v2 = vsub.f32 1.5, %v2353_v16  ;;  %vm2357_vm5 = vweird.f32 %v4344_v25  ;;  %v2686_v53 = vmul.f32 %v7525_v26, %v2685_v59  ;;  %vm2689_vm7 = vweird.f32 %v7525_v26  ;;  %v8575_v16 = vld [vmem:[#allocation44_spill] sm:$0xff] }
 0x539   : > { %3297 = vmatmul.f32.gmra.mxu0 %v3222_v27  ;;  %v2694_v1 = vand.u32 2147483648, %v7466_v22  ;;  %v2919_v0 = vmul.f32 0.03125, %v2901_v20  ;;  %v2466_v63 = vmul.f32 1.442695, %v2432_v7  ;;  %v3077_v40 = vsel %vm3076_vm6, %v4342_v17, %v3073_v9  ;;  %vm2358_vm8 = vmor %vm2356_vm4, %vm2357_vm5 }
 0x53a   : > { %v2355_v55 = vmul.f32 %v4344_v25, %v2354_v2  ;;  %v2692_v54 = vand.u32 2147483647, %v7466_v22  ;;  %v4348_v52 = vpop.eup %4347  ;;  %v3131_v14 = vmul.f32 %v3077_v40, %v8573_v36  ;;  %v1938_v57 = vsel %vm7714_vm3, %v7690_v34, %v1933_v37 }
 0x53b   : > { %v2687_v11 = vadd.f32 %v7525_v26, %v2686_v53  ;;  %vm2688_vm9 = vweird.f32 %v7466_v22  ;;  %v1675_v17 = vsub.f32 0.0, %v1657_v48  ;;  %v3079_v47 = vmul.f32 %v4348_v52, %v7719_v41 }
 0x53c   : > { %v7748_v35 = vpop.eup %4349  ;;  %v2359_v30 = vsel %vm2358_vm8, %v4344_v25, %v2355_v55  ;;  %vm2690_vm1 = vmor %vm2688_vm9, %vm2689_vm7  ;;  %v7753_v3 = vadd.f32 1e-05, %v2919_v0  ;;  %v2695_v43 = vor.u32 1.1754944e-38, %v2694_v1  ;;  %4351 = vpow2.f32 %v2466_v63  ;;  %v8576_v63 = vld [vmem:[#allocation26_spill] sm:$0xff] }
 0x53d   : > { %v2377_v60 = vmul.f32 %v2359_v30, %v8574_v23  ;;  %v3089_v34 = vmul.f32 %v7748_v35, %v7725_v45  ;;  %v2691_v37 = vsel %vm2690_vm1, %v7525_v26, %v2687_v11  ;;  %v3080_v22 = vmul.f32 %v4348_v52, %v3079_v47 }
 0x53e   : > { %vm2693_vm10 = vcmp.eq.f32.partialorder %v2692_v54, 8.507059e+37  ;;  %v3150_v25 = vmul.f32 %v8489_v13, %v3131_v14  ;;  %4353 = vrsqrt.f32 %v7753_v3  ;;  %v7765_v46 = vadd.f32 %v3271_v15, %v7457_v44 }
 0x53f   : > { %v2396_v28 = vmul.f32 %v6140_v42, %v2377_v60  ;;  %v3090_v62 = vmul.f32 %v7748_v35, %v3089_v34  ;;  %v2696_v4 = vsel %vm2693_vm10, %v2695_v43, %v2691_v37  ;;  %v3081_v51 = vmul.f32 0.5, %v3080_v22 }
 0x540   : > { %v3169_v21 = vadd.f32 %v8492_v24, %v3150_v25  ;;  %v1941_v26 = vmul.f32 %v7575_v58, %v7512_v50  ;;  %v7769_v5 = vadd.f32 1.0, %v4346_v6  ;;  %vm3085_vm15 = vweird.f32 %v4348_v52  ;;  %3322 = vadd.xlane.f32.xlu1 %v7765_v46 }
 0x541   : > { %v3274_v32 = vpop.f32.mrf.mxu0  ;;  %v2415_v33 = vadd.f32 %v6150_v39, %v2396_v28  ;;  %v3091_v42 = vmul.f32 0.5, %v3090_v62  ;;  %v3082_v19 = vsub.f32 1.5, %v3081_v51  ;;  %v3187_v48 = vmul.f32 %v2696_v4, %v8575_v16  ;;  %v8581_v16 = vld [vmem:[#allocation51_spill] sm:$0xff] }
 0x542   : > { %v3205_v7 = vmul.f32 %v3169_v21, %v1938_v57  ;;  %v1942_v27 = vsub.f32 1.0, %v1941_v26  ;;  %4355 = vrcp.f32 %v7692_v12  ;;  %v1710_v15 = vmul.f32 1.442695, %v1675_v17  ;;  %v4352_v9 = vpop.eup %4351  ;;  %v2899_v14 = vpop.xlane.xlu2 %2898 }
 0x543   : > { %v3092_v59 = vsub.f32 1.5, %v3091_v42  ;;  %v3083_v2 = vmul.f32 %v4348_v52, %v3082_v19  ;;  %vm3084_vm11 = vweird.f32 %v7719_v41  ;;  %4357 = vrcp.f32 %v7704_v18 }
 0x544   : > { %v3223_v6 = vadd.f32 %v3205_v7, %v3187_v48  ;;  %v1943_v39 = vmul.f32 %v7575_v58, %v1942_v27  ;;  %v7777_v20 = vpop.eup %4353  ;;  %v2433_v53 = vsub.f32 0.0, %v2415_v33  ;;  %vm3086_vm0 = vmor %vm3084_vm11, %vm3085_vm15  ;;  %vm3095_vm12 = vweird.f32 %v7748_v35 }
 0x545   : > { %v3093_v1 = vmul.f32 %v7748_v35, %v3092_v59  ;;  %4359 = vrcp.f32 %v7769_v5  ;;  %v3087_v0 = vsel %vm3086_vm0, %v4348_v52, %v3083_v2  ;;  %vm1946_vm14 = vweird.f32 %v7575_v58 }
 0x546   : > { %3300 = vmatmul.f32.gmra.mxu0 %v3223_v6  ;;  %v1944_v41 = vadd.f32 %v7575_v58, %v1943_v39  ;;  %4361 = vpow2.f32 %v1710_v15  ;;  %v3132_v40 = vmul.f32 %v3087_v0, %v8576_v63  ;;  %vm3094_vm3 = vweird.f32 %v7725_v45  ;;  %v8582_v39 = vld [vmem:[#allocation45_spill] sm:$0xff] }
 0x547   : > { %v7788_v55 = vadd.f32 1.0, %v4352_v9  ;;  %vm7790_vm2 = vmor %vm3094_vm3, %vm3095_vm12  ;;  %vm1945_vm13 = vweird.f32 %v7512_v50  ;;  %v1949_v52 = vand.u32 2147483647, %v7512_v50  ;;  %v2699_v36 = vmul.f32 %v7617_v31, %v7565_v56 }
 0x548   : > { %v7798_v57 = vpop.eup %4355  ;;  %v2468_v11 = vmul.f32 1.442695, %v2433_v53  ;;  %v3097_v45 = vsel %vm7790_vm2, %v7748_v35, %v3093_v1  ;;  %v3109_v17 = vmul.f32 %v7777_v20, %v7753_v3  ;;  %vm7805_vm4 = vmor %vm1945_vm13, %vm1946_vm14  ;;  %v1951_v47 = vand.u32 2147483648, %v7512_v50 }
 0x549   : > { %v3277_v23 = vpop.f32.mrf.mxu0  ;;  %v1948_v60 = vsel %vm7805_vm4, %v7575_v58, %v1944_v41  ;;  %v2700_v34 = vsub.f32 1.0, %v2699_v36  ;;  %v3151_v37 = vmul.f32 %v8489_v13, %v3132_v40  ;;  %v7815_v43 = vadd.f32 %v3274_v32, %v7457_v44  ;;  %v7817_v35 = vpop.eup %4357 }
 0x54a   : > { %vm2704_vm5 = vweird.f32 %v7617_v31  ;;  %v2709_v22 = vand.u32 2147483648, %v7565_v56  ;;  %v7822_v25 = vadd.f32 %v3277_v23, %v7457_v44  ;;  %v2918_v50 = vmul.f32 0.03125, %v2899_v14 }
 0x54b   : > { %v7824_v28 = vpop.eup %4359  ;;  %v2701_v58 = vmul.f32 %v7617_v31, %v2700_v34  ;;  %v2707_v62 = vand.u32 2147483647, %v7565_v56  ;;  %v3170_v4 = vadd.f32 %v8492_v24, %v3151_v37  ;;  %3324 = vadd.xlane.f32.xlu2 %v7815_v43  ;;  %v1956_v51 = vmul.f32 %v7798_v57, %v7692_v12 }
 0x54c   : > { %v4362_v21 = vpop.eup %4361  ;;  %4363 = vpow2.f32 %v2468_v11  ;;  %vm1950_vm6 = vcmp.eq.f32.partialorder %v1949_v52, 8.507059e+37  ;;  %v1952_v26 = vor.u32 1.1754944e-38, %v1951_v47  ;;  %v7832_v32 = vadd.f32 1e-05, %v2918_v50  ;;  %3326 = vadd.xlane.f32.xlu0 %v7822_v25 }
 0x54d   : > { %v3110_v33 = vmul.f32 %v7777_v20, %v3109_v17  ;;  %v2702_v42 = vadd.f32 %v7617_v31, %v2701_v58  ;;  %vm2703_vm7 = vweird.f32 %v7565_v56  ;;  %v1957_v19 = vsub.f32 1.0, %v1956_v51 }
 0x54e   : > { %v3133_v48 = vmul.f32 %v3097_v45, %v8581_v16  ;;  %v1953_v7 = vsel %vm1950_vm6, %v1952_v26, %v1948_v60  ;;  %vm2705_vm8 = vmor %vm2703_vm7, %vm2704_vm5  ;;  %v2710_v27 = vor.u32 1.1754944e-38, %v2709_v22  ;;  %4365 = vrsqrt.f32 %v7832_v32  ;;  %v8585_v16 = vld [vmem:[#allocation46_spill] sm:$0xff] }
 0x54f   : > { %v2706_v15 = vsel %vm2705_vm8, %v7617_v31, %v2702_v42  ;;  %vm2708_vm9 = vcmp.eq.f32.partialorder %v2707_v62, 8.507059e+37  ;;  %v3206_v59 = vmul.f32 %v3170_v4, %v1953_v7  ;;  %v1958_v9 = vmul.f32 %v7798_v57, %v1957_v19 }
 0x550   : > { %4367 = vrcp.f32 %v7788_v55  ;;  %v2711_v2 = vsel %vm2708_vm9, %v2710_v27, %v2706_v15  ;;  %vm1961_vm1 = vweird.f32 %v7798_v57  ;;  %v2714_v56 = vmul.f32 %v7817_v35, %v7704_v18 }
 0x551   : > { %v3280_v6 = vpop.f32.mrf.mxu0  ;;  %v3188_v53 = vmul.f32 %v2711_v2, %v8582_v39  ;;  %v1959_v1 = vadd.f32 %v7798_v57, %v1958_v9  ;;  %v1966_v0 = vand.u32 2147483648, %v7692_v12  ;;  %v3111_v41 = vmul.f32 0.5, %v3110_v33 }
 0x552   : > { %v4364_v31 = vpop.eup %4363  ;;  %vm1960_vm10 = vweird.f32 %v7692_v12  ;;  %v1964_v63 = vand.u32 2147483647, %v7692_v12  ;;  %v2715_v40 = vsub.f32 1.0, %v2714_v56  ;;  %v2724_v36 = vand.u32 2147483648, %v7704_v18 }
 0x553   : > { %v3224_v54 = vadd.f32 %v3206_v59, %v3188_v53  ;;  %vm7853_vm15 = vmor %vm1960_vm10, %vm1961_vm1  ;;  %v3152_v14 = vmul.f32 %v8489_v13, %v3133_v48  ;;  %v7860_v11 = vadd.f32 %v3280_v6, %v7457_v44  ;;  %vm2719_vm11 = vweird.f32 %v7817_v35 }
 0x554   : > { %v4366_v45 = vpop.eup %4365  ;;  %v1963_v17 = vsel %vm7853_vm15, %v7798_v57, %v1959_v1  ;;  %v2716_v12 = vmul.f32 %v7817_v35, %v2715_v40  ;;  %v2722_v30 = vand.u32 2147483647, %v7704_v18  ;;  %v7868_v47 = vadd.f32 1.0, %v4362_v21 }
 0x555   : > { %3303 = vmatmul.f32.gmra.mxu0 %v3224_v54  ;;  %v3099_v23 = vmul.f32 %v4366_v45, %v7832_v32  ;;  %v1967_v60 = vor.u32 1.1754944e-38, %v1966_v0  ;;  %v3171_v34 = vadd.f32 %v8492_v24, %v3152_v14  ;;  %3328 = vadd.xlane.f32.xlu1 %v7860_v11  ;;  %v3112_v22 = vsub.f32 1.5, %v3111_v41 }
 0x556   : > { %v7873_v37 = vpop.eup %4367  ;;  %vm1965_vm0 = vcmp.eq.f32.partialorder %v1964_v63, 8.507059e+37  ;;  %v2717_v57 = vadd.f32 %v7817_v35, %v2716_v12  ;;  %vm2718_vm12 = vweird.f32 %v7704_v18  ;;  %v2725_v62 = vor.u32 1.1754944e-38, %v2724_v36 }
 0x557   : > { %v3100_v50 = vmul.f32 %v4366_v45, %v3099_v23  ;;  %v1968_v58 = vsel %vm1965_vm0, %v1967_v60, %v1963_v17  ;;  %vm2720_vm14 = vmor %vm2718_vm12, %vm2719_vm11  ;;  %v1971_v4 = vmul.f32 %v7824_v28, %v7769_v5  ;;  %v7881_v51 = vadd.f32 1.0, %v4364_v31 }
 0x558   : > { %v2721_v21 = vsel %vm2720_vm14, %v7817_v35, %v2717_v57  ;;  %vm2723_vm3 = vcmp.eq.f32.partialorder %v2722_v30, 8.507059e+37  ;;  %v3207_v26 = vmul.f32 %v3171_v34, %v1968_v58  ;;  %v2729_v18 = vmul.f32 %v7873_v37, %v7788_v55  ;;  %v8586_v30 = vld [vmem:[#allocation47_spill] sm:$0xff] }
 0x559   : > { %v3101_v33 = vmul.f32 0.5, %v3100_v50  ;;  %v2726_v42 = vsel %vm2723_vm3, %v2725_v62, %v2721_v21  ;;  %v1972_v19 = vsub.f32 1.0, %v1971_v4  ;;  %4369 = vrcp.f32 %v7868_v47 }
 0x55a   : > { %vm3115_vm2 = vweird.f32 %v7777_v20  ;;  %v3189_v48 = vmul.f32 %v2726_v42, %v8585_v16  ;;  %vm3105_vm13 = vweird.f32 %v4366_v45  ;;  %v2730_v15 = vsub.f32 1.0, %v2729_v18 }
 0x55b   : > { %v3102_v7 = vsub.f32 1.5, %v3101_v33  ;;  %v1973_v27 = vmul.f32 %v7824_v28, %v1972_v19  ;;  %4371 = vrcp.f32 %v7881_v51  ;;  %v3113_v35 = vmul.f32 %v7777_v20, %v3112_v22 }
 0x55c   : > { %vm3104_vm4 = vweird.f32 %v7832_v32  ;;  %v3225_v59 = vadd.f32 %v3207_v26, %v3189_v48  ;;  %v2731_v2 = vmul.f32 %v7873_v37, %v2730_v15  ;;  %vm2734_vm5 = vweird.f32 %v7873_v37 }
 0x55d   : > { %v3103_v9 = vmul.f32 %v4366_v45, %v3102_v7  ;;  %v2739_v56 = vand.u32 2147483648, %v7788_v55  ;;  %vm3106_vm6 = vmor %vm3104_vm4, %vm3105_vm13  ;;  %v1974_v39 = vadd.f32 %v7824_v28, %v1973_v27  ;;  %vm1976_vm7 = vweird.f32 %v7824_v28 }
 0x55e   : > { %3306 = vmatmul.f32.gmra.mxu0 %v3225_v59  ;;  %v1981_v53 = vand.u32 2147483648, %v7769_v5  ;;  %v2737_v1 = vand.u32 2147483647, %v7788_v55  ;;  %v2732_v31 = vadd.f32 %v7873_v37, %v2731_v2  ;;  %vm2733_vm8 = vweird.f32 %v7788_v55  ;;  %v8587_v59 = vld [vmem:[#allocation48_spill] sm:$0xff] }
 0x55f   : > { %v3107_v32 = vsel %vm3106_vm6, %v4366_v45, %v3103_v9  ;;  %v4370_v41 = vpop.eup %4369  ;;  %vm1975_vm9 = vweird.f32 %v7769_v5  ;;  %v1979_v40 = vand.u32 2147483647, %v7769_v5  ;;  %vm2735_vm1 = vmor %vm2733_vm8, %vm2734_vm5  ;;  %vm3114_vm10 = vweird.f32 %v7753_v3 }
 0x560   : > { %v3283_v6 = vpop.f32.mrf.mxu0  ;;  %v3134_v63 = vmul.f32 %v3107_v32, %v7090_v49  ;;  %vm1977_vm15 = vmor %vm1975_vm9, %vm1976_vm7  ;;  %v2736_v54 = vsel %vm2735_vm1, %v7873_v37, %v2732_v31  ;;  %v2740_v52 = vor.u32 1.1754944e-38, %v2739_v56  ;;  %vm2738_vm0 = vcmp.eq.f32.partialorder %v2737_v1, 8.507059e+37 }
 0x561   : > { %v7901_v0 = vadd.f32 %v3283_v6, %v7457_v44  ;;  %v4372_v36 = vpop.eup %4371  ;;  %vm3116_vm11 = vmor %vm3114_vm10, %vm3115_vm2  ;;  %v1978_v49 = vsel %vm1977_vm15, %v7824_v28, %v1974_v39  ;;  %v1982_v14 = vor.u32 1.1754944e-38, %v1981_v53  ;;  %vm1980_vm12 = vcmp.eq.f32.partialorder %v1979_v40, 8.507059e+37 }
 0x562   : > { %v3153_v5 = vmul.f32 %v8489_v13, %v3134_v63  ;;  %v3117_v55 = vsel %vm3116_vm11, %v7777_v20, %v3113_v35  ;;  %v2741_v45 = vsel %vm2738_vm0, %v2740_v52, %v2736_v54  ;;  %v1986_v34 = vmul.f32 %v4370_v41, %v7868_v47 }
 0x563   : > { %3330 = vadd.xlane.f32.xlu2 %v7901_v0  ;;  %v1983_v17 = vsel %vm1980_vm12, %v1982_v14, %v1978_v49  ;;  %v3135_v12 = vmul.f32 %v3117_v55, %v7000_v61  ;;  %v3190_v23 = vmul.f32 %v2741_v45, %v8586_v30  ;;  %v2744_v28 = vmul.f32 %v4372_v36, %v7881_v51 }
 0x564   : > { %v3172_v3 = vadd.f32 %v8492_v24, %v3153_v5  ;;  %v1987_v22 = vsub.f32 1.0, %v1986_v34  ;;  %vm1991_vm14 = vweird.f32 %v4370_v41  ;;  %v1994_v20 = vand.u32 2147483647, %v7868_v47 }
 0x565   : > { %v1996_v50 = vand.u32 2147483648, %v7868_v47  ;;  %v2745_v58 = vsub.f32 1.0, %v2744_v28  ;;  %v2754_v4 = vand.u32 2147483648, %v7881_v51  ;;  %v3154_v21 = vmul.f32 %v8489_v13, %v3135_v12 }
 0x566   : > { %v3208_v60 = vmul.f32 %v3172_v3, %v1983_v17  ;;  %v1988_v61 = vmul.f32 %v4370_v41, %v1987_v22  ;;  %vm2749_vm3 = vweird.f32 %v4372_v36  ;;  %v2752_v33 = vand.u32 2147483647, %v7881_v51 }
 0x567   : > { %v2746_v26 = vmul.f32 %v4372_v36, %v2745_v58  ;;  %vm1990_vm2 = vweird.f32 %v7868_v47  ;;  %v3173_v19 = vadd.f32 %v8492_v24, %v3154_v21  ;;  %v1997_v18 = vor.u32 1.1754944e-38, %v1996_v50 }
 0x568   : > { %v3226_v37 = vadd.f32 %v3208_v60, %v3190_v23  ;;  %v1989_v42 = vadd.f32 %v4370_v41, %v1988_v61  ;;  %vm1992_vm13 = vmor %vm1990_vm2, %vm1991_vm14  ;;  %vm2748_vm4 = vweird.f32 %v7881_v51  ;;  %vm1995_vm5 = vcmp.eq.f32.partialorder %v1994_v20, 8.507059e+37 }
 0x569   : > { %v2747_v16 = vadd.f32 %v4372_v36, %v2746_v26  ;;  %vm2750_vm6 = vmor %vm2748_vm4, %vm2749_vm3  ;;  %v2755_v13 = vor.u32 1.1754944e-38, %v2754_v4  ;;  %vm2753_vm7 = vcmp.eq.f32.partialorder %v2752_v33, 8.507059e+37 }
 0x56a   : > { %3309 = vmatmul.f32.gmra.mxu0 %v3226_v37  ;;  %v1993_v48 = vsel %vm1992_vm13, %v4370_v41, %v1989_v42 }
 0x56b   : > { %v3286_v57 = vpop.f32.mrf.mxu0  ;;  %v1998_v7 = vsel %vm1995_vm5, %v1997_v18, %v1993_v48  ;;  %v2751_v27 = vsel %vm2750_vm6, %v4372_v36, %v2747_v16 }
 0x56c   : > { %v7926_v62 = vadd.f32 %v3286_v57, %v7457_v44  ;;  %v2756_v15 = vsel %vm2753_vm7, %v2755_v13, %v2751_v27  ;;  %v3209_v35 = vmul.f32 %v3173_v19, %v1998_v7 }
 0x56d   : > { %v3191_v9 = vmul.f32 %v2756_v15, %v8587_v59 }
 0x56e   : > { %3332 = vadd.xlane.f32.xlu0 %v7926_v62 }
 0x56f   : > { %v3227_v47 = vadd.f32 %v3209_v35, %v3191_v9 }
 0x572   : > { %3312 = vmatmul.f32.gmra.mxu0 %v3227_v47 }
 0x578   : > { %v3289_v24 = vpop.f32.mrf.mxu0 }
 0x579   : > { %v3290_v2 = vadd.f32 %v3289_v24, %v7457_v44 }
 0x57b   : > { %3334 = vadd.xlane.f32.xlu1 %v3290_v2 }
 0x586   : > { %v3292_v56 = vpop.f32.mrf.mxu0 }
 0x587   : > { %v7939_v51 = vadd.f32 %v3292_v56, %v7457_v44 }
 0x589   : > { %3336 = vadd.xlane.f32.xlu2 %v7939_v51 }
 0x58f   : > { %v3317_v40 = vpop.xlane.xlu1 %3316 }
 0x590   : > { %v3352_v54 = vmul.f32 0.03125, %v3317_v40 }
 0x592   : > { %v7959_v36 = vsub.f32 %v7559_v38, %v3352_v54 }
 0x594   : > { %v3388_v14 = vmul.f32 %v7959_v36, %v7959_v36 }
 0x596   : > { %v3406_v12 = vmul.f32 %v3388_v14, %v5182_v8 }
 0x59a   : > { %v3319_v45 = vpop.xlane.xlu2 %3318 }
 0x59b   : > { %v3353_v3 = vmul.f32 0.03125, %v3319_v45 }
 0x59d   : > { %v7972_v23 = vsub.f32 %v7610_v10, %v3353_v3 }
 0x59f   : > { %v3389_v10 = vmul.f32 %v7972_v23, %v7972_v23 }
 0x5a1   : > { %v3407_v26 = vmul.f32 %v3389_v10, %v5182_v8 }
 0x5a9   : > { %v3295_v6 = vpop.f32.mrf.mxu0 }
 0x5aa   : > { %v7943_v39 = vadd.f32 %v3295_v6, %v7457_v44 }
 0x5ac   : > { %3338 = vadd.xlane.f32.xlu0 %v7943_v39 }
 0x5b3   : > { %v3323_v5 = vpop.xlane.xlu1 %3322 }
 0x5b4   : > { %v3355_v55 = vmul.f32 0.03125, %v3323_v5 }
 0x5b6   : > { %v3298_v53 = vpop.f32.mrf.mxu0  ;;  %v7968_v17 = vsub.f32 %v7765_v46, %v3355_v55  ;;  %v3321_v46 = vpop.xlane.xlu0 %3320 }
 0x5b7   : > { %v7947_v1 = vadd.f32 %v3298_v53, %v7457_v44  ;;  %v3354_v58 = vmul.f32 0.03125, %v3321_v46 }
 0x5b8   : > { %v3391_v34 = vmul.f32 %v7968_v17, %v7968_v17 }
 0x5b9   : > { %3340 = vadd.xlane.f32.xlu1 %v7947_v1 }
 0x5ba   : > { %v3409_v20 = vmul.f32 %v3391_v34, %v5182_v8 }
 0x5be   : > { %v3325_v37 = vpop.xlane.xlu2 %3324 }
 0x5bf   : > { %v3356_v22 = vmul.f32 0.03125, %v3325_v37  ;;  %v3327_v19 = vpop.xlane.xlu0 %3326 }
 0x5c0   : > { %v3357_v7 = vmul.f32 0.03125, %v3327_v19 }
 0x5c1   : > { %v7987_v61 = vsub.f32 %v7815_v43, %v3356_v22 }
 0x5c2   : > { %v8012_v47 = vsub.f32 %v7822_v25, %v3357_v7 }
 0x5c3   : > { %v3301_v32 = vpop.f32.mrf.mxu0  ;;  %v3392_v48 = vmul.f32 %v7987_v61, %v7987_v61 }
 0x5c4   : > { %v7951_v31 = vadd.f32 %v3301_v32, %v7457_v44  ;;  %v3393_v6 = vmul.f32 %v8012_v47, %v8012_v47 }
 0x5c6   : > { %3342 = vadd.xlane.f32.xlu2 %v7951_v31  ;;  %v3411_v25 = vmul.f32 %v3393_v6, %v5182_v8 }
 0x5c8   : > { %v3329_v30 = vpop.xlane.xlu1 %3328 }
 0x5c9   : > { %v3358_v60 = vmul.f32 0.03125, %v3329_v30 }
 0x5cb   : > { %v7981_v57 = vsub.f32 %v7860_v11, %v3358_v60  ;;  %v7993_v11 = vsub.f32 %v7665_v29, %v3354_v58 }
 0x5cd   : > { %v3394_v21 = vmul.f32 %v7981_v57, %v7981_v57  ;;  %v3390_v13 = vmul.f32 %v7993_v11, %v7993_v11 }
 0x5cf   : > { %v3412_v43 = vmul.f32 %v3394_v21, %v5182_v8  ;;  %v3408_v15 = vmul.f32 %v3390_v13, %v5182_v8 }
 0x5d2   : > { %v3304_v41 = vpop.f32.mrf.mxu0 }
 0x5d3   : > { %v7955_v63 = vadd.f32 %v3304_v41, %v7457_v44 }
 0x5d5   : > { %3344 = vadd.xlane.f32.xlu0 %v7955_v63 }
 0x5d6   : > { %v3331_v18 = vpop.xlane.xlu2 %3330 }
 0x5d7   : > { %v3359_v27 = vmul.f32 0.03125, %v3331_v18 }
 0x5d9   : > { %v8015_v24 = vsub.f32 %v7901_v0, %v3359_v27 }
 0x5db   : > { %v3307_v52 = vpop.f32.mrf.mxu0  ;;  %v3395_v53 = vmul.f32 %v8015_v24, %v8015_v24 }
 0x5dc   : > { %v7962_v49 = vadd.f32 %v3307_v52, %v7457_v44 }
 0x5dd   : > { %v3413_v0 = vmul.f32 %v3395_v53, %v5182_v8 }
 0x5de   : > { %3346 = vadd.xlane.f32.xlu1 %v7962_v49 }
 0x5e1   : > { %v3333_v35 = vpop.xlane.xlu0 %3332 }
 0x5e6   : > { %3424 = vadd.xlane.f32.xlu1 %v3406_v12 }
 0x5e7   : > { %v3310_v38 = vpop.f32.mrf.mxu0 }
 0x5e8   : > { %v7977_v28 = vadd.f32 %v3310_v38, %v7457_v44 }
 0x5ea   : > { %3348 = vadd.xlane.f32.xlu2 %v7977_v28 }
 0x5ee   : > { %v3335_v50 = vpop.xlane.xlu1 %3334  ;;  %3430 = vadd.xlane.f32.xlu1 %v3409_v20 }
 0x5ef   : > { %v3361_v4 = vmul.f32 0.03125, %v3335_v50  ;;  %v3313_v33 = vpop.f32.mrf.mxu0 }
 0x5f0   : > { %v7996_v42 = vadd.f32 %v3313_v33, %v7457_v44  ;;  %v3410_v44 = vmul.f32 %v3392_v48, %v5182_v8 }
 0x5f1   : > { %v7998_v16 = vsub.f32 %v3290_v2, %v3361_v4  ;;  %v3360_v2 = vmul.f32 0.03125, %v3333_v35 }
 0x5f2   : > { %3426 = vadd.xlane.f32.xlu2 %v3407_v26  ;;  %3350 = vadd.xlane.f32.xlu0 %v7996_v42 }
 0x5f3   : > { %v3397_v29 = vmul.f32 %v7998_v16, %v7998_v16  ;;  %v8022_v32 = vsub.f32 %v7926_v62, %v3360_v2 }
 0x5f5   : > { %v3415_v9 = vmul.f32 %v3397_v29, %v5182_v8  ;;  %v3396_v40 = vmul.f32 %v8022_v32, %v8022_v32 }
 0x5f6   : > { %3436 = vadd.xlane.f32.xlu1 %v3412_v43 }
 0x5f7   : > { %v3414_v52 = vmul.f32 %v3396_v40, %v5182_v8 }
 0x5fa   : > { %3432 = vadd.xlane.f32.xlu2 %v3410_v44  ;;  %3428 = vadd.xlane.f32.xlu0 %v3408_v15 }
 0x5fc   : > { %v3337_v59 = vpop.xlane.xlu2 %3336 }
 0x5fd   : > { %v3362_v56 = vmul.f32 0.03125, %v3337_v59 }
 0x5fe   : > { %3442 = vadd.xlane.f32.xlu1 %v3415_v9 }
 0x5ff   : > { %v8025_v41 = vsub.f32 %v7939_v51, %v3362_v56 }
 0x601   : > { %v3398_v54 = vmul.f32 %v8025_v41, %v8025_v41 }
 0x602   : > { %3434 = vadd.xlane.f32.xlu0 %v3411_v25  ;;  %3438 = vadd.xlane.f32.xlu2 %v3413_v0  ;;  %v8070_v0 = vld [vmem:[#allocation13 + $0x10] ss:$0 sm:$0xff] }
 0x603   : > { %v3416_v62 = vmul.f32 %v3398_v54, %v5182_v8 }
 0x60a   : > { %3440 = vadd.xlane.f32.xlu0 %v3414_v52  ;;  %3444 = vadd.xlane.f32.xlu2 %v3416_v62  ;;  %v8073_v52 = vld [vmem:[#allocation13 + $0x18] ss:$0 sm:$0xff] }
 0x61f   : > { %v3339_v51 = vpop.xlane.xlu0 %3338 }
 0x620   : > { %v3363_v5 = vmul.f32 0.03125, %v3339_v51 }
 0x622   : > { %v8036_v55 = vsub.f32 %v7943_v39, %v3363_v5 }
 0x624   : > { %v3399_v14 = vmul.f32 %v8036_v55, %v8036_v55 }
 0x626   : > { %v3417_v45 = vmul.f32 %v3399_v14, %v5182_v8 }
 0x628   : > { %3446 = vadd.xlane.f32.xlu0 %v3417_v45 }
 0x62c   : > { %v3341_v3 = vpop.xlane.xlu1 %3340 }
 0x62d   : > { %v3364_v12 = vmul.f32 0.03125, %v3341_v3 }
 0x62f   : > { %v8042_v30 = vsub.f32 %v7947_v1, %v3364_v12 }
 0x631   : > { %v3400_v38 = vmul.f32 %v8042_v30, %v8042_v30 }
 0x633   : > { %v3418_v60 = vmul.f32 %v3400_v38, %v5182_v8 }
 0x635   : > { %3448 = vadd.xlane.f32.xlu1 %v3418_v60 }
 0x639   : > { %v3343_v34 = vpop.xlane.xlu2 %3342 }
 0x63a   : > { %v3365_v39 = vmul.f32 0.03125, %v3343_v34 }
 0x63c   : > { %v8048_v37 = vsub.f32 %v7951_v31, %v3365_v39 }
 0x63e   : > { %v3401_v46 = vmul.f32 %v8048_v37, %v8048_v37 }
 0x640   : > { %v3419_v22 = vmul.f32 %v3401_v46, %v5182_v8 }
 0x642   : > { %3450 = vadd.xlane.f32.xlu2 %v3419_v22 }
 0x648   : > { %v3345_v20 = vpop.xlane.xlu0 %3344 }
 0x649   : > { %v3366_v1 = vmul.f32 0.03125, %v3345_v20 }
 0x64b   : > { %v8054_v10 = vsub.f32 %v7955_v63, %v3366_v1 }
 0x64d   : > { %v3402_v50 = vmul.f32 %v8054_v10, %v8054_v10 }
 0x64f   : > { %v3420_v58 = vmul.f32 %v3402_v50, %v5182_v8 }
 0x651   : > { %3452 = vadd.xlane.f32.xlu0 %v3420_v58  ;;  %v3347_v4 = vpop.xlane.xlu1 %3346 }
 0x652   : > { %v3367_v31 = vmul.f32 0.03125, %v3347_v4 }
 0x654   : > { %v8060_v21 = vsub.f32 %v7962_v49, %v3367_v31 }
 0x656   : > { %v3403_v26 = vmul.f32 %v8060_v21, %v8060_v21 }
 0x658   : > { %v3421_v18 = vmul.f32 %v3403_v26, %v5182_v8 }
 0x659   : > { %v3425_v33 = vpop.xlane.xlu1 %3424 }
 0x65a   : > { %v3460_v19 = vmul.f32 0.03125, %v3425_v33  ;;  %3454 = vadd.xlane.f32.xlu1 %v3421_v18 }
 0x65c   : > { %v3478_v63 = vadd.f32 1e-05, %v3460_v19 }
 0x65d   : > { %v3349_v27 = vpop.xlane.xlu2 %3348 }
 0x65e   : > { %4373 = vrsqrt.f32 %v3478_v63  ;;  %v3368_v35 = vmul.f32 0.03125, %v3349_v27  ;;  %vm3502_vm9 = vweird.f32 %v3478_v63 }
 0x660   : > { %v8068_v25 = vsub.f32 %v7977_v28, %v3368_v35 }
 0x661   : > { %v3431_v43 = vpop.xlane.xlu1 %3430 }
 0x662   : > { %v3463_v48 = vmul.f32 0.03125, %v3431_v43  ;;  %v3404_v28 = vmul.f32 %v8068_v25, %v8068_v25 }
 0x664   : > { %v4374_v13 = vpop.eup %4373  ;;  %v3481_v29 = vadd.f32 1e-05, %v3463_v48 }
 0x665   : > { %v3497_v44 = vmul.f32 %v4374_v13, %v3478_v63  ;;  %vm3503_vm8 = vweird.f32 %v4374_v13  ;;  %v3351_v51 = vpop.xlane.xlu0 %3350  ;;  %v3427_v5 = vpop.xlane.xlu2 %3426 }
 0x666   : > { %4375 = vrsqrt.f32 %v3481_v29  ;;  %vm3504_vm1 = vmor %vm3502_vm9, %vm3503_vm8  ;;  %v3369_v3 = vmul.f32 0.03125, %v3351_v51  ;;  %v3461_v12 = vmul.f32 0.03125, %v3427_v5  ;;  %vm3532_vm15 = vweird.f32 %v3481_v29 }
 0x667   : > { %v3498_v7 = vmul.f32 %v4374_v13, %v3497_v44 }
 0x668   : > { %v8080_v39 = vsub.f32 %v7996_v42, %v3369_v3  ;;  %v8082_v46 = vadd.f32 1e-05, %v3461_v12 }
 0x669   : > { %v3499_v49 = vmul.f32 0.5, %v3498_v7  ;;  %v3437_v15 = vpop.xlane.xlu1 %3436 }
 0x66a   : > { %v3466_v59 = vmul.f32 0.03125, %v3437_v15  ;;  %v3405_v4 = vmul.f32 %v8080_v39, %v8080_v39  ;;  %vm3512_vm4 = vweird.f32 %v8082_v46 }
 0x66b   : > { %v3500_v9 = vsub.f32 1.5, %v3499_v49 }
 0x66c   : > { %v4376_v2 = vpop.eup %4375  ;;  %v8065_v56 = vadd.f32 1e-05, %v3466_v59 }
 0x66d   : > { %v3501_v6 = vmul.f32 %v4374_v13, %v3500_v9  ;;  %v3527_v53 = vmul.f32 %v4376_v2, %v3481_v29  ;;  %vm3533_vm10 = vweird.f32 %v4376_v2  ;;  %v3429_v19 = vpop.xlane.xlu0 %3428  ;;  %v3433_v18 = vpop.xlane.xlu2 %3432 }
 0x66e   : > { %4377 = vrsqrt.f32 %v8065_v56  ;;  %vm3534_vm11 = vmor %vm3532_vm15, %vm3533_vm10  ;;  %v3462_v43 = vmul.f32 0.03125, %v3429_v19  ;;  %v3464_v48 = vmul.f32 0.03125, %v3433_v18  ;;  %vm3562_vm12 = vweird.f32 %v8065_v56 }
 0x66f   : > { %v3505_v40 = vsel %vm3504_vm1, %v4374_v13, %v3501_v6  ;;  %v3528_v54 = vmul.f32 %v4376_v2, %v3527_v53  ;;  %v3423_v13 = vmul.f32 %v3405_v4, %v5182_v8 }
 0x670   : > { %v3676_v62 = vmul.f32 %v3505_v40, %v7959_v36  ;;  %v3422_v36 = vmul.f32 %v3404_v28, %v5182_v8  ;;  %v8102_v7 = vadd.f32 1e-05, %v3462_v43  ;;  %v8104_v27 = vadd.f32 1e-05, %v3464_v48 }
 0x671   : > { %v3529_v14 = vmul.f32 0.5, %v3528_v54  ;;  %v3443_v45 = vpop.xlane.xlu1 %3442  ;;  %3458 = vadd.xlane.f32.xlu0 %v3423_v13 }
 0x672   : > { %v3695_v38 = vmul.f32 %v8070_v0, %v3676_v62  ;;  %v3469_v60 = vmul.f32 0.03125, %v3443_v45  ;;  %3456 = vadd.xlane.f32.xlu2 %v3422_v36  ;;  %vm3522_vm7 = vweird.f32 %v8102_v7  ;;  %vm3542_vm10 = vweird.f32 %v8104_v27 }
 0x673   : > { %v3530_v34 = vsub.f32 1.5, %v3529_v14 }
 0x674   : > { %v4378_v22 = vpop.eup %4377  ;;  %v3714_v20 = vadd.f32 %v8073_v52, %v3695_v38  ;;  %v8086_v1 = vadd.f32 1e-05, %v3469_v60 }
 0x675   : > { %v3531_v50 = vmul.f32 %v4376_v2, %v3530_v34  ;;  %v3557_v58 = vmul.f32 %v4378_v22, %v8065_v56  ;;  %vm3563_vm0 = vweird.f32 %v4378_v22  ;;  %v3435_v54 = vpop.xlane.xlu0 %3434  ;;  %v3439_v62 = vpop.xlane.xlu2 %3438 }
 0x676   : > { %v3732_v42 = vmax.f32 %v3714_v20, 0.0  ;;  %4379 = vrsqrt.f32 %v8086_v1  ;;  %vm3564_vm14 = vmor %vm3562_vm12, %vm3563_vm0  ;;  %v3465_v56 = vmul.f32 0.03125, %v3435_v54  ;;  %v3467_v5 = vmul.f32 0.03125, %v3439_v62 }
 0x677   : > { %v3535_v31 = vsel %vm3534_vm11, %v4376_v2, %v3531_v50  ;;  %v3558_v26 = vmul.f32 %v4378_v22, %v3557_v58  ;;  %4381 = vrsqrt.f32 %v8082_v46  ;;  %vm3592_vm13 = vweird.f32 %v8086_v1 }
 0x678   : > { %3750 = vst [vmem:[%s8096_s15] sm:$0xff] %v3732_v42  ;;  %v3679_v33 = vmul.f32 %v3535_v31, %v7968_v17  ;;  %4383 = vrsqrt.f32 %v8102_v7  ;;  %v8115_v28 = vadd.f32 1e-05, %v3465_v56  ;;  %v8117_v38 = vadd.f32 1e-05, %v3467_v5 }
 0x679   : > { %v3559_v63 = vmul.f32 0.5, %v3558_v26  ;;  %4385 = vrsqrt.f32 %v8104_v27 }
 0x67a   : > { %v3698_v29 = vmul.f32 %v8070_v0, %v3679_v33  ;;  %4387 = vrsqrt.f32 %v8115_v28  ;;  %vm3552_vm0 = vweird.f32 %v8115_v28 }
 0x67b   : > { %v3560_v44 = vsub.f32 1.5, %v3559_v63  ;;  %4389 = vrsqrt.f32 %v8117_v38 }
 0x67c   : > { %v4380_v49 = vpop.eup %4379  ;;  %v3717_v17 = vadd.f32 %v8073_v52, %v3698_v29 }
 0x67d   : > { %v4382_v15 = vpop.eup %4381  ;;  %v3561_v35 = vmul.f32 %v4378_v22, %v3560_v44  ;;  %v3587_v59 = vmul.f32 %v4380_v49, %v8086_v1  ;;  %vm3593_vm3 = vweird.f32 %v4380_v49  ;;  %v3441_v19 = vpop.xlane.xlu0 %3440 }
 0x67e   : > { %v3735_v8 = vmax.f32 %v3717_v17, 0.0  ;;  %v3507_v9 = vmul.f32 %v4382_v15, %v8082_v46  ;;  %v4384_v3 = vpop.eup %4383  ;;  %vm3513_vm2 = vweird.f32 %v4382_v15  ;;  %vm3594_vm5 = vmor %vm3592_vm13, %vm3593_vm3  ;;  %v3445_v46 = vpop.xlane.xlu2 %3444  ;;  %v3468_v63 = vmul.f32 0.03125, %v3441_v19 }
 0x67f   : > { %v3565_v2 = vsel %vm3564_vm14, %v4378_v22, %v3561_v35  ;;  %v3588_v6 = vmul.f32 %v4380_v49, %v3587_v59  ;;  %v4386_v36 = vpop.eup %4385  ;;  %vm3514_vm6 = vmor %vm3512_vm4, %vm3513_vm2  ;;  %v3470_v43 = vmul.f32 0.03125, %v3445_v46  ;;  %vm3523_vm8 = vweird.f32 %v4384_v3 }
 0x680   : > { %3753 = vst [vmem:[%s8096_s15 + $0x18] sm:$0xff] %v3735_v8  ;;  %v3682_v53 = vmul.f32 %v3565_v2, %v7981_v57  ;;  %v3508_v40 = vmul.f32 %v4382_v15, %v3507_v9  ;;  %v3517_v57 = vmul.f32 %v4384_v3, %v8102_v7  ;;  %v3537_v4 = vmul.f32 %v4386_v36, %v8104_v27  ;;  %v4388_v44 = vpop.eup %4387  ;;  %vm3524_vm1 = vmor %vm3522_vm7, %vm3523_vm8 }
 0x681   : > { %v3589_v51 = vmul.f32 0.5, %v3588_v6  ;;  %vm3543_vm9 = vweird.f32 %v4386_v36  ;;  %v8134_v17 = vadd.f32 1e-05, %v3470_v43  ;;  %v3547_v59 = vmul.f32 %v4388_v44, %v8115_v28  ;;  %v4390_v8 = vpop.eup %4389 }
 0x682   : > { %v3701_v14 = vmul.f32 %v8070_v0, %v3682_v53  ;;  %v3509_v45 = vmul.f32 0.5, %v3508_v40  ;;  %v3518_v58 = vmul.f32 %v4384_v3, %v3517_v57  ;;  %v3538_v1 = vmul.f32 %v4386_v36, %v3537_v4  ;;  %vm3544_vm15 = vmor %vm3542_vm10, %vm3543_vm9 }
 0x683   : > { %v3590_v12 = vsub.f32 1.5, %v3589_v51  ;;  %v3548_v40 = vmul.f32 %v4388_v44, %v3547_v59  ;;  %v3567_v51 = vmul.f32 %v4390_v8, %v8117_v38  ;;  %vm3553_vm11 = vweird.f32 %v4388_v44 }
 0x684   : > { %v3720_v60 = vadd.f32 %v8073_v52, %v3701_v14  ;;  %v3510_v34 = vsub.f32 1.5, %v3509_v45  ;;  %v3519_v33 = vmul.f32 0.5, %v3518_v58  ;;  %v3539_v29 = vmul.f32 0.5, %v3538_v1  ;;  %vm3554_vm12 = vmor %vm3552_vm0, %vm3553_vm11 }
 0x685   : > { %v3591_v22 = vmul.f32 %v4380_v49, %v3590_v12  ;;  %v3549_v7 = vmul.f32 0.5, %v3548_v40  ;;  %v3568_v14 = vmul.f32 %v4390_v8, %v3567_v51  ;;  %vm3573_vm14 = vweird.f32 %v4390_v8 }
 0x686   : > { %v3738_v20 = vmax.f32 %v3720_v60, 0.0  ;;  %v3511_v50 = vmul.f32 %v4382_v15, %v3510_v34  ;;  %v3520_v13 = vsub.f32 1.5, %v3519_v33  ;;  %v3540_v35 = vsub.f32 1.5, %v3539_v29 }
 0x687   : > { %v3595_v42 = vsel %vm3594_vm5, %v4380_v49, %v3591_v22  ;;  %v3550_v45 = vsub.f32 1.5, %v3549_v7  ;;  %v3569_v60 = vmul.f32 0.5, %v3568_v14  ;;  %vm3572_vm3 = vweird.f32 %v8117_v38 }
 0x688   : > { %3756 = vst [vmem:[%s8096_s15 + $0x30] sm:$0xff] %v3738_v20  ;;  %v3685_v31 = vmul.f32 %v3595_v42, %v7998_v16  ;;  %v3515_v26 = vsel %vm3514_vm6, %v4382_v15, %v3511_v50  ;;  %v8132_v16 = vadd.f32 1e-05, %v3468_v63  ;;  %v3541_v53 = vmul.f32 %v4386_v36, %v3540_v35  ;;  %vm3574_vm2 = vmor %vm3572_vm3, %vm3573_vm14 }
 0x689   : > { %v3677_v18 = vmul.f32 %v3515_v26, %v7972_v23  ;;  %v3521_v23 = vmul.f32 %v4384_v3, %v3520_v13  ;;  %v3551_v34 = vmul.f32 %v4388_v44, %v3550_v45  ;;  %vm3602_vm7 = vweird.f32 %v8134_v17 }
 0x68a   : > { %v3704_v48 = vmul.f32 %v8070_v0, %v3685_v31  ;;  %4391 = vrsqrt.f32 %v8132_v16  ;;  %v3545_v56 = vsel %vm3544_vm15, %v4386_v36, %v3541_v53  ;;  %vm3582_vm4 = vweird.f32 %v8132_v16 }
 0x68b   : > { %v3696_v49 = vmul.f32 %v8070_v0, %v3677_v18  ;;  %v3525_v6 = vsel %vm3524_vm1, %v4384_v3, %v3521_v23  ;;  %4393 = vrsqrt.f32 %v8134_v17  ;;  %v3680_v5 = vmul.f32 %v3545_v56, %v7987_v61 }
 0x68c   : > { %v3723_v15 = vadd.f32 %v8073_v52, %v3704_v48  ;;  %v3678_v62 = vmul.f32 %v3525_v6, %v7993_v11  ;;  %v3570_v61 = vsub.f32 1.5, %v3569_v60  ;;  %v3555_v50 = vsel %vm3554_vm12, %v4388_v44, %v3551_v34 }
 0x68d   : > { %v3715_v9 = vadd.f32 %v8073_v52, %v3696_v49  ;;  %v3699_v12 = vmul.f32 %v8070_v0, %v3680_v5  ;;  %v3681_v42 = vmul.f32 %v3555_v50, %v8012_v47 }
 0x68e   : > { %v3741_v2 = vmax.f32 %v3723_v15, 0.0  ;;  %v3697_v27 = vmul.f32 %v8070_v0, %v3678_v62  ;;  %v3571_v31 = vmul.f32 %v4390_v8, %v3570_v61 }
 0x68f   : > { %v3733_v54 = vmax.f32 %v3715_v9, 0.0  ;;  %v3718_v22 = vadd.f32 %v8073_v52, %v3699_v12  ;;  %v3700_v33 = vmul.f32 %v8070_v0, %v3681_v42 }
 0x690   : > { %3759 = vst [vmem:[%s8096_s15 + $0x48] sm:$0xff] %v3741_v2  ;;  %v4392_v3 = vpop.eup %4391  ;;  %v3716_v11 = vadd.f32 %v8073_v52, %v3697_v27  ;;  %v3575_v1 = vsel %vm3574_vm2, %v4390_v8, %v3571_v31 }
 0x691   : > { %3751 = vst [vmem:[%s8096_s15 + $0x8] sm:$0xff] %v3733_v54  ;;  %v3577_v57 = vmul.f32 %v4392_v3, %v8132_v16  ;;  %v4394_v20 = vpop.eup %4393  ;;  %v3736_v4 = vmax.f32 %v3718_v22, 0.0  ;;  %v3683_v46 = vmul.f32 %v3575_v1, %v8015_v24  ;;  %vm3583_vm13 = vweird.f32 %v4392_v3 }
 0x692   : > { %v3734_v36 = vmax.f32 %v3716_v11, 0.0  ;;  %v3597_v28 = vmul.f32 %v4394_v20, %v8134_v17  ;;  %v3719_v63 = vadd.f32 %v8073_v52, %v3700_v33  ;;  %vm3584_vm5 = vmor %vm3582_vm4, %vm3583_vm13  ;;  %vm3603_vm6 = vweird.f32 %v4394_v20 }
 0x693   : > { %v3578_v58 = vmul.f32 %v4392_v3, %v3577_v57  ;;  %3754 = vst [vmem:[%s8096_s15 + $0x20] sm:$0xff] %v3736_v4  ;;  %v3702_v48 = vmul.f32 %v8070_v0, %v3683_v46  ;;  %vm3604_vm8 = vmor %vm3602_vm7, %vm3603_vm6 }
 0x694   : > { %3752 = vst [vmem:[%s8096_s15 + $0x10] sm:$0xff] %v3734_v36  ;;  %v3598_v19 = vmul.f32 %v4394_v20, %v3597_v28  ;;  %v3737_v29 = vmax.f32 %v3719_v63, 0.0 }
 0x695   : > { %v3579_v26 = vmul.f32 0.5, %v3578_v58  ;;  %v3721_v24 = vadd.f32 %v8073_v52, %v3702_v48 }
 0x696   : > { %v3599_v43 = vmul.f32 0.5, %v3598_v19  ;;  %3755 = vst [vmem:[%s8096_s15 + $0x28] sm:$0xff] %v3737_v29 }
 0x697   : > { %v3580_v18 = vsub.f32 1.5, %v3579_v26  ;;  %v3739_v59 = vmax.f32 %v3721_v24, 0.0 }
 0x698   : > { %v3600_v44 = vsub.f32 1.5, %v3599_v43 }
 0x699   : > { %v3581_v13 = vmul.f32 %v4392_v3, %v3580_v18  ;;  %3757 = vst [vmem:[%s8096_s15 + $0x38] sm:$0xff] %v3739_v59 }
 0x69a   : > { %v3601_v35 = vmul.f32 %v4394_v20, %v3600_v44 }
 0x69b   : > { %v3447_v38 = vpop.xlane.xlu0 %3446  ;;  %v3585_v15 = vsel %vm3584_vm5, %v4392_v3, %v3581_v13 }
 0x69c   : > { %v3471_v47 = vmul.f32 0.03125, %v3447_v38  ;;  %v3684_v23 = vmul.f32 %v3585_v15, %v8022_v32  ;;  %v3605_v8 = vsel %vm3604_vm8, %v4394_v20, %v3601_v35 }
 0x69d   : > { %v3686_v9 = vmul.f32 %v3605_v8, %v8025_v41 }
 0x69e   : > { %v3489_v49 = vadd.f32 1e-05, %v3471_v47  ;;  %v3703_v16 = vmul.f32 %v8070_v0, %v3684_v23 }
 0x69f   : > { %v3705_v6 = vmul.f32 %v8070_v0, %v3686_v9 }
 0x6a0   : > { %4395 = vrsqrt.f32 %v3489_v49  ;;  %v3722_v2 = vadd.f32 %v8073_v52, %v3703_v16  ;;  %vm3612_vm1 = vweird.f32 %v3489_v49 }
 0x6a1   : > { %v3724_v40 = vadd.f32 %v8073_v52, %v3705_v6 }
 0x6a2   : > { %v3740_v32 = vmax.f32 %v3722_v2, 0.0 }
 0x6a3   : > { %v3742_v62 = vmax.f32 %v3724_v40, 0.0 }
 0x6a4   : > { %3758 = vst [vmem:[%s8096_s15 + $0x40] sm:$0xff] %v3740_v32 }
 0x6a5   : > { %3760 = vst [vmem:[%s8096_s15 + $0x50] sm:$0xff] %v3742_v62 }
 0x6a6   : > { %v4396_v53 = vpop.eup %4395 }
 0x6a7   : > { %v3607_v54 = vmul.f32 %v4396_v53, %v3489_v49  ;;  %vm3613_vm9 = vweird.f32 %v4396_v53 }
 0x6a8   : > { %v3449_v17 = vpop.xlane.xlu1 %3448  ;;  %vm3614_vm10 = vmor %vm3612_vm1, %vm3613_vm9 }
 0x6a9   : > { %v3608_v51 = vmul.f32 %v4396_v53, %v3607_v54  ;;  %v3472_v56 = vmul.f32 0.03125, %v3449_v17 }
 0x6ab   : > { %v3609_v7 = vmul.f32 0.5, %v3608_v51  ;;  %v3490_v27 = vadd.f32 1e-05, %v3472_v56 }
 0x6ad   : > { %v3610_v5 = vsub.f32 1.5, %v3609_v7  ;;  %4397 = vrsqrt.f32 %v3490_v27  ;;  %vm3622_vm11 = vweird.f32 %v3490_v27 }
 0x6af   : > { %v3611_v41 = vmul.f32 %v4396_v53, %v3610_v5 }
 0x6b1   : > { %v3615_v14 = vsel %vm3614_vm10, %v4396_v53, %v3611_v41 }
 0x6b2   : > { %v3687_v45 = vmul.f32 %v3615_v14, %v8036_v55 }
 0x6b3   : > { %v4398_v3 = vpop.eup %4397 }
 0x6b4   : > { %v3706_v11 = vmul.f32 %v8070_v0, %v3687_v45  ;;  %v3617_v12 = vmul.f32 %v4398_v3, %v3490_v27  ;;  %vm3623_vm15 = vweird.f32 %v4398_v3 }
 0x6b5   : > { %v3451_v60 = vpop.xlane.xlu2 %3450  ;;  %vm3624_vm0 = vmor %vm3622_vm11, %vm3623_vm15 }
 0x6b6   : > { %v3725_v34 = vadd.f32 %v8073_v52, %v3706_v11  ;;  %v3618_v57 = vmul.f32 %v4398_v3, %v3617_v12  ;;  %v3473_v36 = vmul.f32 0.03125, %v3451_v60 }
 0x6b8   : > { %v3743_v22 = vmax.f32 %v3725_v34, 0.0  ;;  %v3619_v61 = vmul.f32 0.5, %v3618_v57  ;;  %v3491_v20 = vadd.f32 1e-05, %v3473_v36 }
 0x6ba   : > { %3761 = vst [vmem:[%s8096_s15 + $0x58] sm:$0xff] %v3743_v22  ;;  %v3620_v50 = vsub.f32 1.5, %v3619_v61  ;;  %4399 = vrsqrt.f32 %v3491_v20  ;;  %vm3632_vm14 = vweird.f32 %v3491_v20 }
 0x6bc   : > { %v3621_v58 = vmul.f32 %v4398_v3, %v3620_v50 }
 0x6be   : > { %v3625_v55 = vsel %vm3624_vm0, %v4398_v3, %v3621_v58 }
 0x6bf   : > { %v3688_v4 = vmul.f32 %v3625_v55, %v8042_v30 }
 0x6c0   : > { %v4400_v42 = vpop.eup %4399 }
 0x6c1   : > { %v3707_v31 = vmul.f32 %v8070_v0, %v3688_v4  ;;  %v3627_v28 = vmul.f32 %v4400_v42, %v3491_v20  ;;  %vm3633_vm12 = vweird.f32 %v4400_v42 }
 0x6c2   : > { %vm3634_vm3 = vmor %vm3632_vm14, %vm3633_vm12 }
 0x6c3   : > { %v3726_v26 = vadd.f32 %v8073_v52, %v3707_v31  ;;  %v3628_v33 = vmul.f32 %v4400_v42, %v3627_v28 }
 0x6c4   : > { %v3453_v46 = vpop.xlane.xlu0 %3452 }
 0x6c5   : > { %v3744_v1 = vmax.f32 %v3726_v26, 0.0  ;;  %v3629_v19 = vmul.f32 0.5, %v3628_v33  ;;  %v3474_v18 = vmul.f32 0.03125, %v3453_v46 }
 0x6c7   : > { %3762 = vst [vmem:[%s8096_s15 + $0x60] sm:$0xff] %v3744_v1  ;;  %v3630_v38 = vsub.f32 1.5, %v3629_v19  ;;  %v3492_v63 = vadd.f32 1e-05, %v3474_v18 }
 0x6c9   : > { %v3631_v43 = vmul.f32 %v4400_v42, %v3630_v38  ;;  %4401 = vrsqrt.f32 %v3492_v63  ;;  %vm3642_vm13 = vweird.f32 %v3492_v63 }
 0x6cb   : > { %v3635_v30 = vsel %vm3634_vm3, %v4400_v42, %v3631_v43 }
 0x6cc   : > { %v3689_v47 = vmul.f32 %v3635_v30, %v8048_v37 }
 0x6cd   : > { %v3455_v44 = vpop.xlane.xlu1 %3454 }
 0x6ce   : > { %v3708_v48 = vmul.f32 %v8070_v0, %v3689_v47  ;;  %v3475_v24 = vmul.f32 0.03125, %v3455_v44 }
 0x6cf   : > { %v4402_v13 = vpop.eup %4401 }
 0x6d0   : > { %v3727_v29 = vadd.f32 %v8073_v52, %v3708_v48  ;;  %v3637_v49 = vmul.f32 %v4402_v13, %v3492_v63  ;;  %v3493_v35 = vadd.f32 1e-05, %v3475_v24  ;;  %vm3643_vm2 = vweird.f32 %v4402_v13 }
 0x6d1   : > { %vm3644_vm4 = vmor %vm3642_vm13, %vm3643_vm2 }
 0x6d2   : > { %v3745_v15 = vmax.f32 %v3727_v29, 0.0  ;;  %v3638_v23 = vmul.f32 %v4402_v13, %v3637_v49  ;;  %4403 = vrsqrt.f32 %v3493_v35  ;;  %vm3652_vm6 = vweird.f32 %v3493_v35 }
 0x6d4   : > { %3763 = vst [vmem:[%s8096_s15 + $0x68] sm:$0xff] %v3745_v15  ;;  %v3639_v59 = vmul.f32 0.5, %v3638_v23 }
 0x6d6   : > { %v3640_v16 = vsub.f32 1.5, %v3639_v59 }
 0x6d8   : > { %v3641_v8 = vmul.f32 %v4402_v13, %v3640_v16  ;;  %v4404_v37 = vpop.eup %4403 }
 0x6d9   : > { %v3647_v6 = vmul.f32 %v4404_v37, %v3493_v35  ;;  %vm3653_vm5 = vweird.f32 %v4404_v37 }
 0x6da   : > { %v3645_v9 = vsel %vm3644_vm4, %v4402_v13, %v3641_v8  ;;  %vm3654_vm7 = vmor %vm3652_vm6, %vm3653_vm5 }
 0x6db   : > { %v3690_v2 = vmul.f32 %v3645_v9, %v8054_v10  ;;  %v3648_v32 = vmul.f32 %v4404_v37, %v3647_v6 }
 0x6dd   : > { %v3709_v53 = vmul.f32 %v8070_v0, %v3690_v2  ;;  %v3649_v54 = vmul.f32 0.5, %v3648_v32 }
 0x6df   : > { %v3728_v40 = vadd.f32 %v8073_v52, %v3709_v53  ;;  %v3650_v62 = vsub.f32 1.5, %v3649_v54 }
 0x6e1   : > { %v3746_v17 = vmax.f32 %v3728_v40, 0.0  ;;  %v3651_v51 = vmul.f32 %v4404_v37, %v3650_v62 }
 0x6e3   : > { %3764 = vst [vmem:[%s8096_s15 + $0x70] sm:$0xff] %v3746_v17  ;;  %v3655_v56 = vsel %vm3654_vm7, %v4404_v37, %v3651_v51 }
 0x6e4   : > { %v3691_v7 = vmul.f32 %v3655_v56, %v8060_v21  ;;  %v3459_v3 = vpop.xlane.xlu0 %3458 }
 0x6e5   : > { %v3457_v27 = vpop.xlane.xlu2 %3456  ;;  %v3477_v11 = vmul.f32 0.03125, %v3459_v3 }
 0x6e6   : > { %v3710_v10 = vmul.f32 %v8070_v0, %v3691_v7  ;;  %v3476_v5 = vmul.f32 0.03125, %v3457_v27 }
 0x6e7   : > { %v3495_v12 = vadd.f32 1e-05, %v3477_v11 }
 0x6e8   : > { %v3729_v41 = vadd.f32 %v8073_v52, %v3710_v10  ;;  %v3494_v14 = vadd.f32 1e-05, %v3476_v5 }
 0x6e9   : > { %vm3672_vm15 = vweird.f32 %v3495_v12 }
 0x6ea   : > { %v3747_v45 = vmax.f32 %v3729_v41, 0.0  ;;  %4405 = vrsqrt.f32 %v3494_v14  ;;  %vm3662_vm9 = vweird.f32 %v3494_v14 }
 0x6eb   : > { %4407 = vrsqrt.f32 %v3495_v12 }
 0x6ec   : > { %3765 = vst [vmem:[%s8096_s15 + $0x78] sm:$0xff] %v3747_v45 }
 0x6f0   : > { %v4406_v60 = vpop.eup %4405 }
 0x6f1   : > { %v3657_v34 = vmul.f32 %v4406_v60, %v3494_v14  ;;  %v4408_v21 = vpop.eup %4407  ;;  %vm3663_vm8 = vweird.f32 %v4406_v60 }
 0x6f2   : > { %v3667_v61 = vmul.f32 %v4408_v21, %v3495_v12  ;;  %vm3664_vm1 = vmor %vm3662_vm9, %vm3663_vm8  ;;  %vm3673_vm10 = vweird.f32 %v4408_v21 }
 0x6f3   : > { %v3658_v57 = vmul.f32 %v4406_v60, %v3657_v34  ;;  %vm3674_vm11 = vmor %vm3672_vm15, %vm3673_vm10 }
 0x6f4   : > { %v3668_v50 = vmul.f32 %v4408_v21, %v3667_v61 }
 0x6f5   : > { %v3659_v36 = vmul.f32 0.5, %v3658_v57 }
 0x6f6   : > { %v3669_v55 = vmul.f32 0.5, %v3668_v50 }
 0x6f7   : > { %v3660_v22 = vsub.f32 1.5, %v3659_v36 }
 0x6f8   : > { %v3670_v42 = vsub.f32 1.5, %v3669_v55 }
 0x6f9   : > { %v3661_v20 = vmul.f32 %v4406_v60, %v3660_v22 }
 0x6fa   : > { %v3671_v28 = vmul.f32 %v4408_v21, %v3670_v42 }
 0x6fb   : > { %v3665_v58 = vsel %vm3664_vm1, %v4406_v60, %v3661_v20 }
 0x6fc   : > { %v3692_v4 = vmul.f32 %v3665_v58, %v8068_v25  ;;  %v3675_v33 = vsel %vm3674_vm11, %v4408_v21, %v3671_v28 }
 0x6fd   : > { %v3693_v19 = vmul.f32 %v3675_v33, %v8080_v39 }
 0x6fe   : > { %v3711_v31 = vmul.f32 %v8070_v0, %v3692_v4 }
 0x6ff   : > { %v3712_v25 = vmul.f32 %v8070_v0, %v3693_v19 }
 0x700   : > { %v3730_v26 = vadd.f32 %v8073_v52, %v3711_v31 }
 0x701   : > { %v3731_v46 = vadd.f32 %v8073_v52, %v3712_v25 }
 0x702   : > { %v3748_v1 = vmax.f32 %v3730_v26, 0.0 }
 0x703   : > { %v3749_v18 = vmax.f32 %v3731_v46, 0.0 }
 0x704   : > { %3766 = vst [vmem:[%s8096_s15 + $0x80] sm:$0xff] %v3748_v1 }
 0x705   : > { %3767 = vst [vmem:[%s8096_s15 + $0x88] sm:$0xff] %v3749_v18 }
 0x706   : > { %4651 = shalt.err (!%p4648_p8)
}
 0x707   : > { %s4718_s2 = smov 128   ;;  %s4719_s26 = smov 8  }
 0x708   : > { %4030 = dma.vmem_to_hbm [thread:$0]  (%p4853_p0), %s3782_s8, 2304, %s3784_s14, %s3769_s5, %s4718_s2, %s4718_s2, %s4719_s26  }
 0x709 PF: > { %s3798_s16 = sand.u32 1, %s4694_s24   ;;  %p8588_p10 = scmp.ge.s32.totalorder %s4706_s27, 2 }
 0x70a   : > { %s3799_s12 = scalar_lea.sflag [#allocation4], %s3798_s16 }
 0x70b   : > { %p4056_p11 = pnand %p8588_p10, %p4861_p6 }
 0x70d   : > { %p4057_p12 = pneg %p4056_p11 }
 0x70f   : > { %4689 = dma.done.wait (%p4057_p12), %s3799_s12, 2304  }
 0x710   : > { %4691 = vsyncadd (%p4057_p12), %s3799_s12, 4294964992  ;;  %s8589_s27 = sld [smem:[#allocation22_spill]]  ;;  %s8592_s24 = smov %s4698_s25 }
 0x711   : > { %s8590_s9 = sld [smem:[#allocation21_spill]] }
 0x712   : > { %s8591_s26 = sld [smem:[#allocation23_spill]] }
 0x716   : > { %p25_p2 = scmp.ge.s32.totalorder %s8589_s27, 4  }
 0x717   : > { %s8593_s25 = smov %s8590_s9 }
 0x718   :  { %27 = sbr.rel (!%p25_p2) target bundleno = 15 (0xf), region = 126 }
 0x71d   :  { %3805 = vsyncpa [#allocation3], 1 }
 0x71e   :  { %3807 = vsyncpa [#allocation3 + $0x1], 1 }
 0x71f   :  { %3808 = vsyncpa [#allocation6], 1 }
 0x720   :  { %3810 = vsyncpa [#allocation6 + $0x1], 1 }
 0x721   :  { %3811 = vsyncpa [#allocation9], 1 }
 0x722   :  { %3812 = vsyncpa [#allocation12], 1 }
 0x723   :  { %3813 = vsyncpa [#allocation4], 1 }
 0x724   :  { %3815 = vsyncpa [#allocation4 + $0x1], 1 }

</bundles_post_ra>
